<compile_context>
chip_gen: v7x
topology: tpu7x:2x2x1
jax: 0.10.0
libtpu: 0.0.40
codegen_flags: <defaults>
</compile_context>

<pallas_src>
import functools

import jax
import jax.numpy as jnp
from jax.experimental import pallas as pl
from jax.experimental.pallas import tpu as pltpu

GP = 128  # padded GRU width: gru_size (= nodes*latent = 96) -> 128-lane aligned gates


# ----------------------------------------------------------------------------
# Fused forward kernel (single grid-less pallas_call, time loop unrolled)
# ----------------------------------------------------------------------------

def _gat_forward_kernel(h_ref, small_ref, wi_ref, wh_ref, b_ref, heada_ref, out_ref,
                        *, nodes, latent, hidden_dim, target_len, t_in):
    f32 = jnp.float32
    L = latent

    # ---- constants (built once from 2-D iota; reused across the unrolled loop) ----
    eye_n = (jax.lax.broadcasted_iota(jnp.int32, (nodes, nodes), 0)
             == jax.lax.broadcasted_iota(jnp.int32, (nodes, nodes), 1)).astype(f32)
    n_idx = jax.lax.broadcasted_iota(jnp.int32, (nodes, GP), 0)
    m_idx = jax.lax.broadcasted_iota(jnp.int32, (nodes, GP), 1)
    # scatter masks: S[l][n, m] = 1 iff m == n*latent + l   (row-major flatten layout)
    S = [(m_idx == n_idx * L + l).astype(f32) for l in range(L)]

    def col_to_row(col):                        # (N,1) -> (1,N): VPU mult + sublane reduce
        return jnp.sum(col * eye_n, axis=0, keepdims=True)

    def flatten_nl(v):                          # (nodes, latent) -> (1, GP), zeros past G
        acc = jnp.sum(v[:, 0:1] * S[0], axis=0, keepdims=True)
        for l in range(1, L):
            acc = acc + jnp.sum(v[:, l:l + 1] * S[l], axis=0, keepdims=True)
        return acc

    def gat_attn(z, a_src, a_dst):              # z (N,D); a_* (1,D)
        es = jnp.sum(z * a_src, axis=1, keepdims=True)        # (N,1)
        ed = jnp.sum(z * a_dst, axis=1, keepdims=True)        # (N,1)
        e = ed + col_to_row(es)                                # (N,N), e[dst, src]
        e = jnp.where(e >= 0.0, e, 0.01 * e)                   # leaky_relu(0.01)
        e = e - jnp.max(e, axis=1, keepdims=True)
        p = jnp.exp(e)
        alpha = p * pl.reciprocal(jnp.sum(p, axis=1, keepdims=True), approx=True)
        return jnp.dot(alpha, z, preferred_element_type=f32)   # (N, D)

    # ---- packed-slab row offsets (must match _pack_params ordering) ----
    o_l2, o_a2s, o_a2d = 3, 3 + L, 4 + L
    o_w1p, o_b1p = 5 + L, 5 + 2 * L
    o_bp, o_cp = 6 + 2 * L, 13 + 2 * L
    H2 = 2 * hidden_dim

    l1w = small_ref[0:1, 0:L]
    a1s = small_ref[1:2, 0:L]
    a1d = small_ref[2:3, 0:L]
    a2s = small_ref[o_a2s:o_a2s + 1, 0:L]
    a2d = small_ref[o_a2d:o_a2d + 1, 0:L]
    b1p = small_ref[o_b1p:o_b1p + 1, 0:L]
    w2_rows = [small_ref[o_l2 + l:o_l2 + l + 1, 0:L] for l in range(L)]
    w1p_rows = [small_ref[o_w1p + l:o_w1p + l + 1, 0:L] for l in range(L)]
    bi = b_ref[0:1, :]
    bh = b_ref[1:2, :]

    hidden = jnp.zeros((1, GP), f32)            # padded GRU hidden state (lanes >= G are 0)
    z1 = None                                   # layer-1 projected features of current input
    for i in range(target_len):
        if i < t_in:
            z1 = h_ref[i] * l1w                 # (nodes, latent); in_dim == 1 broadcast

        # MultiHeadGATLayer #1 (num_heads=1)
        h1 = gat_attn(z1, a1s, a1d)             # (nodes, latent)
        rnn_in = flatten_nl(h1)                 # (1, GP)

        # GRU cell (seq=1, batch=1); gates [r|z|n] at 128-aligned offsets
        gi = jnp.dot(rnn_in, wi_ref[...], preferred_element_type=f32) + bi      # (1, 3*GP)
        gh = jnp.dot(hidden, wh_ref[...], preferred_element_type=f32) + bh      # (1, 3*GP)
        r = jax.nn.sigmoid(gi[:, 0:GP] + gh[:, 0:GP])
        zg = jax.nn.sigmoid(gi[:, GP:2 * GP] + gh[:, GP:2 * GP])
        ng = jnp.tanh(gi[:, 2 * GP:3 * GP] + r * gh[:, 2 * GP:3 * GP])
        hy = (1.0 - zg) * ng + zg * hidden      # (1, GP); padded lanes stay exactly 0

        # unflatten fused into consumers: cols[l][n] = hy[0, n*latent + l]
        cols = [jnp.sum(S[l] * hy, axis=1, keepdims=True) for l in range(L)]    # (nodes,1)

        # MultiHeadGATLayer #2: z2 = out24 @ l2_fc_w done as VPU broadcast mults
        z2 = cols[0] * w2_rows[0]
        for l in range(1, L):
            z2 = z2 + cols[l] * w2_rows[l]
        h2 = gat_attn(z2, a2s, a2d)             # (nodes, latent)
        hidden = flatten_nl(h2)                 # (1, GP) -> next GRU hidden state

        # hid2in folded into layer-1 projection for the next (generated) step
        if (i + 1 < target_len) and (i + 1 >= t_in):
            z1 = cols[0] * w1p_rows[0] + b1p
            for l in range(1, L):
                z1 = z1 + cols[l] * w1p_rows[l]

    # Head (affine chain precomposed host-side): out = hidden @ A + t @ Bp + cp
    hsl = h_ref[0, 14:21, :]                    # (7, 1), in_dim == 1
    t_term = jnp.sum(hsl * small_ref[o_bp:o_bp + 7, 0:H2], axis=0, keepdims=True)  # (1, 2H)
    out_ref[...] = (jnp.dot(hidden, heada_ref[...], preferred_element_type=f32)
                    + t_term + small_ref[o_cp:o_cp + 1, 0:H2])


# ----------------------------------------------------------------------------
# Host-side weight pre-composition + packing (22 params -> 5 buffers)
# ----------------------------------------------------------------------------

def _pack_params(params):
    nodes, latent, hidden = params['nodes'], params['latent_dim'], params['hidden_dim']
    G = nodes * latent
    f32 = jnp.float32
    mm = functools.partial(jnp.matmul, precision=jax.lax.Precision.HIGHEST)

    # hid2in folded into GAT layer 1 (its output only enters via  x @ l1_fc_w)
    w1p = mm(params['hid2in_w'], params['l1_fc_w'])                      # (latent, latent)
    b1p = mm(params['hid2in_b'], params['l1_fc_w'])                      # (1, latent)

    # affine head collapsed: out = hidden @ A + t @ Bp + cp,  t = h[0,14:21,:] as (1,7)
    m34 = mm(params['hid3_w'], params['hid2hid_w'])                      # (H, 2H)
    A = mm(mm(params['hid1_w'], params['hid2_wa']), m34)                 # (G, 2H)
    Bp = mm(mm(params['table2hid_w'], params['hid2_wb']), m34)           # (7, 2H)
    cp = (mm(mm(params['hid1_b'], params['hid2_wa'])
             + mm(params['table2hid_b'], params['hid2_wb'])
             + params['hid2_b'], m34)
          + mm(params['hid3_b'], params['hid2hid_w']) + params['hid2hid_b'])   # (1, 2H)

    def row(v):
        v = jnp.asarray(v, f32).reshape(-1)
        return jnp.zeros((1, GP), f32).at[0, :v.shape[0]].set(v)

    rows = [row(params['l1_fc_w'][0]),                       # 0: layer-1 weight row
            row(params['l1_a'][:, 0]),                       # 1: layer-1 a_src
            row(params['l1_a'][:, 1])]                       # 2: layer-1 a_dst
    rows += [row(params['l2_fc_w'][l]) for l in range(latent)]   # 3..2+L: layer-2 rows
    rows += [row(params['l2_a'][:, 0]),                      # 3+L: layer-2 a_src
             row(params['l2_a'][:, 1])]                      # 4+L: layer-2 a_dst
    rows += [row(w1p[l]) for l in range(latent)]             # 5+L..4+2L: folded hid2in rows
    rows += [row(b1p[0])]                                    # 5+2L
    rows += [row(Bp[j]) for j in range(7)]                   # 6+2L..12+2L
    rows += [row(cp[0])]                                     # 13+2L
    small = jnp.concatenate(rows, axis=0)
    pad = (-small.shape[0]) % 8
    if pad:
        small = jnp.concatenate([small, jnp.zeros((pad, GP), f32)], axis=0)

    def pad_w(w):                                            # (G,3G) -> (GP,3GP)
        out = jnp.zeros((GP, 3 * GP), f32)
        for g in range(3):
            out = out.at[:G, g * GP:g * GP + G].set(w[:, g * G:(g + 1) * G])
        return out

    def pad_b(b):                                            # (1,3G) -> (1,3GP)
        out = jnp.zeros((1, 3 * GP), f32)
        for g in range(3):
            out = out.at[0, g * GP:g * GP + G].set(b[0, g * G:(g + 1) * G])
        return out

    wi_p = pad_w(params['gru_wi'])
    wh_p = pad_w(params['gru_wh'])
    b_p = jnp.concatenate([pad_b(params['gru_bi']), pad_b(params['gru_bh'])], axis=0)
    a_p = jnp.zeros((GP, 2 * hidden), f32).at[:G, :].set(A)
    return small, wi_p, wh_p, b_p, a_p


def gat_forward(params, h, target_len):
    """h: (T_in, nodes, in_dim) f32. Returns (zmean, zlogvar), each (1, hidden_dim)."""
    nodes, latent, hidden_dim = params['nodes'], params['latent_dim'], params['hidden_dim']
    t_in = int(h.shape[0])
    target_len = int(target_len)
    assert h.shape[2] == 1 and nodes >= 21 and nodes * latent <= GP and 2 * hidden_dim <= GP

    small, wi_p, wh_p, b_p, a_p = _pack_params(params)
    kernel = functools.partial(_gat_forward_kernel, nodes=nodes, latent=latent,
                               hidden_dim=hidden_dim, target_len=target_len, t_in=t_in)
    inputs = (h.astype(jnp.float32), small, wi_p, wh_p, b_p, a_p)
    out = pl.pallas_call(
        kernel,
        out_shape=jax.ShapeDtypeStruct((1, 2 * hidden_dim), jnp.float32),
        in_specs=[pl.BlockSpec(memory_space=pltpu.MemorySpace.VMEM)] * len(inputs),
        out_specs=pl.BlockSpec(memory_space=pltpu.MemorySpace.VMEM),
    )(*inputs)
    return out[:, :hidden_dim], out[:, hidden_dim:]


# ----------------------------------------------------------------------------
# Pure-JAX reference (mirrors the PyTorch forward, raw un-composed weights)
# ----------------------------------------------------------------------------

def _gat_layer_ref(x, w, a_cat):
    z = x @ w
    es = z @ a_cat[:, 0:1]
    ed = z @ a_cat[:, 1:2]
    e = ed + es.T
    e = jnp.where(e >= 0.0, e, 0.01 * e)
    e = e - e.max(axis=1, keepdims=True)
    p = jnp.exp(e)
    alpha = p / p.sum(axis=1, keepdims=True)
    return alpha @ z


def gat_forward_ref(params, h, target_len):
    nodes, latent, hidden_dim = params['nodes'], params['latent_dim'], params['hidden_dim']
    G = nodes * latent
    temp = h[0]
    t = h[0, 14:21, :].reshape(1, 7)
    table = t @ params['table2hid_w'] + params['table2hid_b']
    hidden = jnp.zeros((1, G), jnp.float32)
    for i in range(target_len):
        if i < h.shape[0]:
            temp = h[i]
        h1 = _gat_layer_ref(temp, params['l1_fc_w'], params['l1_a'])
        x = h1.reshape(1, G)
        gi = x @ params['gru_wi'] + params['gru_bi']
        gh = hidden @ params['gru_wh'] + params['gru_bh']
        r = jax.nn.sigmoid(gi[:, :G] + gh[:, :G])
        zg = jax.nn.sigmoid(gi[:, G:2 * G] + gh[:, G:2 * G])
        ng = jnp.tanh(gi[:, 2 * G:] + r * gh[:, 2 * G:])
        hy = (1.0 - zg) * ng + zg * hidden
        out = hy.reshape(nodes, latent)
        hidden = _gat_layer_ref(out, params['l2_fc_w'], params['l2_a']).reshape(1, G)
        temp = out @ params['hid2in_w'] + params['hid2in_b']
    h0 = hidden @ params['hid1_w'] + params['hid1_b']
    h0 = h0 @ params['hid2_wa'] + table @ params['hid2_wb'] + params['hid2_b']
    h0 = h0 @ params['hid3_w'] + params['hid3_b']
    h0 = h0 @ params['hid2hid_w'] + params['hid2hid_b']
    return h0[:, :hidden_dim], h0[:, hidden_dim:]


# ----------------------------------------------------------------------------
# Deterministic parameter construction
# ----------------------------------------------------------------------------

def _xavier(key, shape, gain=1.4142135623730951):
    fan_in, fan_out = shape[0], shape[-1]
    std = gain * (2.0 / (fan_in + fan_out)) ** 0.5
    return std * jax.random.normal(key, shape, jnp.float32)


def make_params(key, nodes, in_dim, latent_dim, hidden_dim):
    gru_size = nodes * latent_dim
    keys = jax.random.split(key, 40)
    ki = iter(keys)

    def nrm(shape, scale=0.1):
        return scale * jax.random.normal(next(ki), shape, jnp.float32)

    p = dict(nodes=nodes, latent_dim=latent_dim, hidden_dim=hidden_dim)

    p['l1_fc_w'] = _xavier(next(ki), (in_dim, latent_dim))
    a1 = _xavier(next(ki), (2 * latent_dim, 1))
    p['l1_a'] = jnp.concatenate([a1[:latent_dim, :], a1[latent_dim:, :]], axis=1)
    p['l2_fc_w'] = _xavier(next(ki), (latent_dim, latent_dim))
    a2 = _xavier(next(ki), (2 * latent_dim, 1))
    p['l2_a'] = jnp.concatenate([a2[:latent_dim, :], a2[latent_dim:, :]], axis=1)

    p['table2hid_w'] = nrm((7, hidden_dim))
    p['table2hid_b'] = nrm((1, hidden_dim))
    p['hid2in_w'] = nrm((latent_dim, in_dim))
    p['hid2in_b'] = nrm((1, in_dim))

    # GRU(gru_size, gru_size): gate order [r, z, n], stored (in, out), gates along out axis
    p['gru_wi'] = jnp.concatenate([nrm((gru_size, gru_size), 0.05) for _ in range(3)], axis=1)
    p['gru_wh'] = jnp.concatenate([nrm((gru_size, gru_size), 0.05) for _ in range(3)], axis=1)
    p['gru_bi'] = jnp.concatenate([nrm((1, gru_size), 0.05) for _ in range(3)], axis=1)
    p['gru_bh'] = jnp.concatenate([nrm((1, gru_size), 0.05) for _ in range(3)], axis=1)

    p['hid1_w'] = nrm((gru_size, hidden_dim))
    p['hid1_b'] = nrm((1, hidden_dim))
    w2 = nrm((2 * hidden_dim, hidden_dim))
    p['hid2_wa'], p['hid2_wb'] = w2[:hidden_dim, :], w2[hidden_dim:, :]
    p['hid2_b'] = nrm((1, hidden_dim))
    p['hid3_w'] = nrm((hidden_dim, hidden_dim))
    p['hid3_b'] = nrm((1, hidden_dim))
    p['hid2hid_w'] = nrm((hidden_dim, 2 * hidden_dim))
    p['hid2hid_b'] = nrm((1, 2 * hidden_dim))
    return p


# ----------------------------------------------------------------------------
# main
# ----------------------------------------------------------------------------

if __name__ == "__main__":
    nodes = 24          # graph nodes (>= 21 because of h[0, 14:21, :])
    in_dim = 1          # required by .reshape(1, 7) on a (7, in_dim) slice
    latent_dim = 4
    hidden_dim = 16
    t_in = 2            # number of provided input frames
    t_steps = 3         # target.size()[0]

    key = jax.random.PRNGKey(0)
    k_param, k_h = jax.random.split(key, 2)

    params = make_params(k_param, nodes, in_dim, latent_dim, hidden_dim)
    h = jax.random.normal(k_h, (t_in, nodes, in_dim), jnp.float32)

    zmean, zlogvar = gat_forward(params, h, t_steps)
    jax.block_until_ready((zmean, zlogvar))
    assert zmean.shape == (1, hidden_dim) and zlogvar.shape == (1, hidden_dim)

    with jax.default_matmul_precision("highest"):
        zm_ref, zl_ref = gat_forward_ref(params, h, t_steps)
    ok = bool(jnp.allclose(zmean, zm_ref, atol=2e-2, rtol=5e-2)
              and jnp.allclose(zlogvar, zl_ref, atol=2e-2, rtol=5e-2))
    assert ok, (float(jnp.max(jnp.abs(zmean - zm_ref))),
                float(jnp.max(jnp.abs(zlogvar - zl_ref))))
    print("KERNEL_OK")
</pallas_src>

<mosaic_0001>
module attributes {stable_mosaic.version = 11 : i64} {
  func.func @_gat_forward_kernel(%arg0: memref<2x24x1xf32, #tpu.memory_space<vmem>>, %arg1: memref<24x128xf32, #tpu.memory_space<vmem>>, %arg2: memref<128x384xf32, #tpu.memory_space<vmem>>, %arg3: memref<128x384xf32, #tpu.memory_space<vmem>>, %arg4: memref<2x384xf32, #tpu.memory_space<vmem>>, %arg5: memref<128x32xf32, #tpu.memory_space<vmem>>, %arg6: memref<1x32xf32, #tpu.memory_space<vmem>>) attributes {dimension_semantics = [], scalar_prefetch = 0 : i64, scratch_operands = 0 : i64, tpu.core_type = #tpu.core_type<tc>} {
    %0 = tpu.iota {dimensions = array<i32: 0>} : vector<24x24xi32>
    %1 = tpu.iota {dimensions = array<i32: 1>} : vector<24x24xi32>
    %2 = arith.cmpi eq, %0, %1 : vector<24x24xi32>
    %3 = arith.extui %2 : vector<24x24xi1> to vector<24x24xi32>
    %4 = arith.sitofp %3 : vector<24x24xi32> to vector<24x24xf32>
    %5 = tpu.iota {dimensions = array<i32: 0>} : vector<24x128xi32>
    %6 = tpu.iota {dimensions = array<i32: 1>} : vector<24x128xi32>
    %c4_i32 = arith.constant 4 : i32
    %7 = vector.broadcast %c4_i32 : i32 to vector<24x128xi32>
    %8 = arith.muli %5, %7 : vector<24x128xi32>
    %c0_i32 = arith.constant 0 : i32
    %9 = vector.broadcast %c0_i32 : i32 to vector<24x128xi32>
    %10 = arith.addi %8, %9 : vector<24x128xi32>
    %11 = arith.cmpi eq, %6, %10 : vector<24x128xi32>
    %12 = arith.extui %11 : vector<24x128xi1> to vector<24x128xi32>
    %13 = arith.sitofp %12 : vector<24x128xi32> to vector<24x128xf32>
    %c4_i32_0 = arith.constant 4 : i32
    %14 = vector.broadcast %c4_i32_0 : i32 to vector<24x128xi32>
    %15 = arith.muli %5, %14 : vector<24x128xi32>
    %c1_i32 = arith.constant 1 : i32
    %16 = vector.broadcast %c1_i32 : i32 to vector<24x128xi32>
    %17 = arith.addi %15, %16 : vector<24x128xi32>
    %18 = arith.cmpi eq, %6, %17 : vector<24x128xi32>
    %19 = arith.extui %18 : vector<24x128xi1> to vector<24x128xi32>
    %20 = arith.sitofp %19 : vector<24x128xi32> to vector<24x128xf32>
    %c4_i32_1 = arith.constant 4 : i32
    %21 = vector.broadcast %c4_i32_1 : i32 to vector<24x128xi32>
    %22 = arith.muli %5, %21 : vector<24x128xi32>
    %c2_i32 = arith.constant 2 : i32
    %23 = vector.broadcast %c2_i32 : i32 to vector<24x128xi32>
    %24 = arith.addi %22, %23 : vector<24x128xi32>
    %25 = arith.cmpi eq, %6, %24 : vector<24x128xi32>
    %26 = arith.extui %25 : vector<24x128xi1> to vector<24x128xi32>
    %27 = arith.sitofp %26 : vector<24x128xi32> to vector<24x128xf32>
    %c4_i32_2 = arith.constant 4 : i32
    %28 = vector.broadcast %c4_i32_2 : i32 to vector<24x128xi32>
    %29 = arith.muli %5, %28 : vector<24x128xi32>
    %c3_i32 = arith.constant 3 : i32
    %30 = vector.broadcast %c3_i32 : i32 to vector<24x128xi32>
    %31 = arith.addi %29, %30 : vector<24x128xi32>
    %32 = arith.cmpi eq, %6, %31 : vector<24x128xi32>
    %33 = arith.extui %32 : vector<24x128xi1> to vector<24x128xi32>
    %34 = arith.sitofp %33 : vector<24x128xi32> to vector<24x128xf32>
    %c0 = arith.constant 0 : index
    %c0_3 = arith.constant 0 : index
    %35 = vector.load %arg1[%c0, %c0_3] : memref<24x128xf32, #tpu.memory_space<vmem>>, vector<1x4xf32>
    %c1 = arith.constant 1 : index
    %c0_4 = arith.constant 0 : index
    %36 = vector.load %arg1[%c1, %c0_4] : memref<24x128xf32, #tpu.memory_space<vmem>>, vector<1x4xf32>
    %c2 = arith.constant 2 : index
    %c0_5 = arith.constant 0 : index
    %37 = vector.load %arg1[%c2, %c0_5] : memref<24x128xf32, #tpu.memory_space<vmem>>, vector<1x4xf32>
    %c7 = arith.constant 7 : index
    %c0_6 = arith.constant 0 : index
    %38 = vector.load %arg1[%c7, %c0_6] : memref<24x128xf32, #tpu.memory_space<vmem>>, vector<1x4xf32>
    %c8 = arith.constant 8 : index
    %c0_7 = arith.constant 0 : index
    %39 = vector.load %arg1[%c8, %c0_7] : memref<24x128xf32, #tpu.memory_space<vmem>>, vector<1x4xf32>
    %c13 = arith.constant 13 : index
    %c0_8 = arith.constant 0 : index
    %40 = vector.load %arg1[%c13, %c0_8] : memref<24x128xf32, #tpu.memory_space<vmem>>, vector<1x4xf32>
    %c3 = arith.constant 3 : index
    %c0_9 = arith.constant 0 : index
    %41 = vector.load %arg1[%c3, %c0_9] : memref<24x128xf32, #tpu.memory_space<vmem>>, vector<1x4xf32>
    %c4 = arith.constant 4 : index
    %c0_10 = arith.constant 0 : index
    %42 = vector.load %arg1[%c4, %c0_10] : memref<24x128xf32, #tpu.memory_space<vmem>>, vector<1x4xf32>
    %c5 = arith.constant 5 : index
    %c0_11 = arith.constant 0 : index
    %43 = vector.load %arg1[%c5, %c0_11] : memref<24x128xf32, #tpu.memory_space<vmem>>, vector<1x4xf32>
    %c6 = arith.constant 6 : index
    %c0_12 = arith.constant 0 : index
    %44 = vector.load %arg1[%c6, %c0_12] : memref<24x128xf32, #tpu.memory_space<vmem>>, vector<1x4xf32>
    %c9 = arith.constant 9 : index
    %c0_13 = arith.constant 0 : index
    %45 = vector.load %arg1[%c9, %c0_13] : memref<24x128xf32, #tpu.memory_space<vmem>>, vector<1x4xf32>
    %c10 = arith.constant 10 : index
    %c0_14 = arith.constant 0 : index
    %46 = vector.load %arg1[%c10, %c0_14] : memref<24x128xf32, #tpu.memory_space<vmem>>, vector<1x4xf32>
    %c11 = arith.constant 11 : index
    %c0_15 = arith.constant 0 : index
    %47 = vector.load %arg1[%c11, %c0_15] : memref<24x128xf32, #tpu.memory_space<vmem>>, vector<1x4xf32>
    %c12 = arith.constant 12 : index
    %c0_16 = arith.constant 0 : index
    %48 = vector.load %arg1[%c12, %c0_16] : memref<24x128xf32, #tpu.memory_space<vmem>>, vector<1x4xf32>
    %c0_17 = arith.constant 0 : index
    %c0_18 = arith.constant 0 : index
    %49 = vector.load %arg4[%c0_17, %c0_18] : memref<2x384xf32, #tpu.memory_space<vmem>>, vector<1x384xf32>
    %c1_19 = arith.constant 1 : index
    %c0_20 = arith.constant 0 : index
    %50 = vector.load %arg4[%c1_19, %c0_20] : memref<2x384xf32, #tpu.memory_space<vmem>>, vector<1x384xf32>
    %cst = arith.constant 0.000000e+00 : f32
    %51 = vector.broadcast %cst : f32 to vector<1x128xf32>
    %c0_21 = arith.constant 0 : index
    %c0_22 = arith.constant 0 : index
    %c0_23 = arith.constant 0 : index
    %52 = vector.load %arg0[%c0_21, %c0_22, %c0_23] : memref<2x24x1xf32, #tpu.memory_space<vmem>>, vector<1x24x1xf32>
    %53 = vector.shape_cast %52 : vector<1x24x1xf32> to vector<24x1xf32>
    %54 = vector.broadcast %53 : vector<24x1xf32> to vector<24x4xf32>
    %55 = vector.broadcast %35 : vector<1x4xf32> to vector<24x4xf32>
    %56 = arith.mulf %54, %55 : vector<24x4xf32>
    %57 = vector.broadcast %36 : vector<1x4xf32> to vector<24x4xf32>
    %58 = arith.mulf %56, %57 : vector<24x4xf32>
    %cst_24 = arith.constant dense<0.000000e+00> : vector<24xf32>
    %59 = vector.multi_reduction <add>, %58, %cst_24 [1] : vector<24x4xf32> to vector<24xf32>
    %60 = vector.shape_cast %59 : vector<24xf32> to vector<24x1xf32>
    %61 = vector.broadcast %37 : vector<1x4xf32> to vector<24x4xf32>
    %62 = arith.mulf %56, %61 : vector<24x4xf32>
    %cst_25 = arith.constant dense<0.000000e+00> : vector<24xf32>
    %63 = vector.multi_reduction <add>, %62, %cst_25 [1] : vector<24x4xf32> to vector<24xf32>
    %64 = vector.shape_cast %63 : vector<24xf32> to vector<24x1xf32>
    %65 = vector.broadcast %60 : vector<24x1xf32> to vector<24x24xf32>
    %66 = arith.mulf %65, %4 : vector<24x24xf32>
    %cst_26 = arith.constant dense<0.000000e+00> : vector<24xf32>
    %67 = vector.multi_reduction <add>, %66, %cst_26 [0] : vector<24x24xf32> to vector<24xf32>
    %68 = vector.shape_cast %67 : vector<24xf32> to vector<1x24xf32>
    %69 = vector.broadcast %64 : vector<24x1xf32> to vector<24x24xf32>
    %70 = vector.broadcast %68 : vector<1x24xf32> to vector<24x24xf32>
    %71 = arith.addf %69, %70 : vector<24x24xf32>
    %cst_27 = arith.constant 0.000000e+00 : f32
    %72 = vector.broadcast %cst_27 : f32 to vector<24x24xf32>
    %73 = arith.cmpf oge, %71, %72 : vector<24x24xf32>
    %cst_28 = arith.constant 0.00999999977 : f32
    %74 = vector.broadcast %cst_28 : f32 to vector<24x24xf32>
    %75 = arith.mulf %74, %71 : vector<24x24xf32>
    %76 = arith.select %73, %71, %75 : vector<24x24xi1>, vector<24x24xf32>
    %cst_29 = arith.constant dense<0xFF800000> : vector<24xf32>
    %77 = vector.multi_reduction <maximumf>, %76, %cst_29 [1] : vector<24x24xf32> to vector<24xf32>
    %78 = vector.shape_cast %77 : vector<24xf32> to vector<24x1xf32>
    %79 = vector.broadcast %78 : vector<24x1xf32> to vector<24x24xf32>
    %80 = arith.subf %76, %79 : vector<24x24xf32>
    %81 = math.exp %80 : vector<24x24xf32>
    %cst_30 = arith.constant dense<0.000000e+00> : vector<24xf32>
    %82 = vector.multi_reduction <add>, %81, %cst_30 [1] : vector<24x24xf32> to vector<24xf32>
    %83 = vector.shape_cast %82 : vector<24xf32> to vector<24x1xf32>
    %84 = tpu.reciprocal %83 {approx = true} : vector<24x1xf32> -> vector<24x1xf32>
    %85 = vector.broadcast %84 : vector<24x1xf32> to vector<24x24xf32>
    %86 = arith.mulf %81, %85 : vector<24x24xf32>
    %cst_31 = arith.constant dense<0.000000e+00> : vector<24x4xf32>
    %87 = tpu.matmul %86, %56, %cst_31 {dimension_numbers = #tpu.dot_dimension_numbers<[1], [0], [0], [1], [0, 0, 1, 1], [], []>} : vector<24x24xf32>, vector<24x4xf32>, vector<24x4xf32> -> vector<24x4xf32>
    %88 = vector.extract_strided_slice %87 {offsets = [0, 0], sizes = [24, 1], strides = [1, 1]} : vector<24x4xf32> to vector<24x1xf32>
    %89 = vector.broadcast %88 : vector<24x1xf32> to vector<24x128xf32>
    %90 = arith.mulf %89, %13 : vector<24x128xf32>
    %cst_32 = arith.constant dense<0.000000e+00> : vector<128xf32>
    %91 = vector.multi_reduction <add>, %90, %cst_32 [0] : vector<24x128xf32> to vector<128xf32>
    %92 = vector.shape_cast %91 : vector<128xf32> to vector<1x128xf32>
    %93 = vector.extract_strided_slice %87 {offsets = [0, 1], sizes = [24, 1], strides = [1, 1]} : vector<24x4xf32> to vector<24x1xf32>
    %94 = vector.broadcast %93 : vector<24x1xf32> to vector<24x128xf32>
    %95 = arith.mulf %94, %20 : vector<24x128xf32>
    %cst_33 = arith.constant dense<0.000000e+00> : vector<128xf32>
    %96 = vector.multi_reduction <add>, %95, %cst_33 [0] : vector<24x128xf32> to vector<128xf32>
    %97 = vector.shape_cast %96 : vector<128xf32> to vector<1x128xf32>
    %98 = arith.addf %92, %97 : vector<1x128xf32>
    %99 = vector.extract_strided_slice %87 {offsets = [0, 2], sizes = [24, 1], strides = [1, 1]} : vector<24x4xf32> to vector<24x1xf32>
    %100 = vector.broadcast %99 : vector<24x1xf32> to vector<24x128xf32>
    %101 = arith.mulf %100, %27 : vector<24x128xf32>
    %cst_34 = arith.constant dense<0.000000e+00> : vector<128xf32>
    %102 = vector.multi_reduction <add>, %101, %cst_34 [0] : vector<24x128xf32> to vector<128xf32>
    %103 = vector.shape_cast %102 : vector<128xf32> to vector<1x128xf32>
    %104 = arith.addf %98, %103 : vector<1x128xf32>
    %105 = vector.extract_strided_slice %87 {offsets = [0, 3], sizes = [24, 1], strides = [1, 1]} : vector<24x4xf32> to vector<24x1xf32>
    %106 = vector.broadcast %105 : vector<24x1xf32> to vector<24x128xf32>
    %107 = arith.mulf %106, %34 : vector<24x128xf32>
    %cst_35 = arith.constant dense<0.000000e+00> : vector<128xf32>
    %108 = vector.multi_reduction <add>, %107, %cst_35 [0] : vector<24x128xf32> to vector<128xf32>
    %109 = vector.shape_cast %108 : vector<128xf32> to vector<1x128xf32>
    %110 = arith.addf %104, %109 : vector<1x128xf32>
    %c0_36 = arith.constant 0 : index
    %c0_37 = arith.constant 0 : index
    %111 = vector.load %arg2[%c0_36, %c0_37] : memref<128x384xf32, #tpu.memory_space<vmem>>, vector<128x384xf32>
    %cst_38 = arith.constant dense<0.000000e+00> : vector<1x384xf32>
    %112 = tpu.matmul %110, %111, %cst_38 {dimension_numbers = #tpu.dot_dimension_numbers<[1], [0], [0], [1], [0, 0, 1, 1], [], []>} : vector<1x128xf32>, vector<128x384xf32>, vector<1x384xf32> -> vector<1x384xf32>
    %113 = arith.addf %112, %49 : vector<1x384xf32>
    %c0_39 = arith.constant 0 : index
    %c0_40 = arith.constant 0 : index
    %114 = vector.load %arg3[%c0_39, %c0_40] : memref<128x384xf32, #tpu.memory_space<vmem>>, vector<128x384xf32>
    %cst_41 = arith.constant dense<0.000000e+00> : vector<1x384xf32>
    %115 = tpu.matmul %51, %114, %cst_41 {dimension_numbers = #tpu.dot_dimension_numbers<[1], [0], [0], [1], [0, 0, 1, 1], [], []>} : vector<1x128xf32>, vector<128x384xf32>, vector<1x384xf32> -> vector<1x384xf32>
    %116 = arith.addf %115, %50 : vector<1x384xf32>
    %117 = vector.extract_strided_slice %113 {offsets = [0, 0], sizes = [1, 128], strides = [1, 1]} : vector<1x384xf32> to vector<1x128xf32>
    %118 = vector.extract_strided_slice %116 {offsets = [0, 0], sizes = [1, 128], strides = [1, 1]} : vector<1x384xf32> to vector<1x128xf32>
    %119 = arith.addf %117, %118 : vector<1x128xf32>
    %120 = arith.negf %119 : vector<1x128xf32>
    %121 = math.exp %120 : vector<1x128xf32>
    %cst_42 = arith.constant 1.000000e+00 : f32
    %122 = vector.broadcast %cst_42 : f32 to vector<1x128xf32>
    %123 = arith.addf %122, %121 : vector<1x128xf32>
    %124 = arith.divf %122, %123 : vector<1x128xf32>
    %125 = vector.extract_strided_slice %113 {offsets = [0, 128], sizes = [1, 128], strides = [1, 1]} : vector<1x384xf32> to vector<1x128xf32>
    %126 = vector.extract_strided_slice %116 {offsets = [0, 128], sizes = [1, 128], strides = [1, 1]} : vector<1x384xf32> to vector<1x128xf32>
    %127 = arith.addf %125, %126 : vector<1x128xf32>
    %128 = arith.negf %127 : vector<1x128xf32>
    %129 = math.exp %128 : vector<1x128xf32>
    %cst_43 = arith.constant 1.000000e+00 : f32
    %130 = vector.broadcast %cst_43 : f32 to vector<1x128xf32>
    %131 = arith.addf %130, %129 : vector<1x128xf32>
    %132 = arith.divf %130, %131 : vector<1x128xf32>
    %133 = vector.extract_strided_slice %113 {offsets = [0, 256], sizes = [1, 128], strides = [1, 1]} : vector<1x384xf32> to vector<1x128xf32>
    %134 = vector.extract_strided_slice %116 {offsets = [0, 256], sizes = [1, 128], strides = [1, 1]} : vector<1x384xf32> to vector<1x128xf32>
    %135 = arith.mulf %124, %134 : vector<1x128xf32>
    %136 = arith.addf %133, %135 : vector<1x128xf32>
    %137 = math.tanh %136 : vector<1x128xf32>
    %cst_44 = arith.constant 1.000000e+00 : f32
    %138 = vector.broadcast %cst_44 : f32 to vector<1x128xf32>
    %139 = arith.subf %138, %132 : vector<1x128xf32>
    %140 = arith.mulf %139, %137 : vector<1x128xf32>
    %141 = arith.mulf %132, %51 : vector<1x128xf32>
    %142 = arith.addf %140, %141 : vector<1x128xf32>
    %143 = vector.broadcast %142 : vector<1x128xf32> to vector<24x128xf32>
    %144 = arith.mulf %13, %143 : vector<24x128xf32>
    %cst_45 = arith.constant dense<0.000000e+00> : vector<24xf32>
    %145 = vector.multi_reduction <add>, %144, %cst_45 [1] : vector<24x128xf32> to vector<24xf32>
    %146 = vector.shape_cast %145 : vector<24xf32> to vector<24x1xf32>
    %147 = vector.broadcast %142 : vector<1x128xf32> to vector<24x128xf32>
    %148 = arith.mulf %20, %147 : vector<24x128xf32>
    %cst_46 = arith.constant dense<0.000000e+00> : vector<24xf32>
    %149 = vector.multi_reduction <add>, %148, %cst_46 [1] : vector<24x128xf32> to vector<24xf32>
    %150 = vector.shape_cast %149 : vector<24xf32> to vector<24x1xf32>
    %151 = vector.broadcast %142 : vector<1x128xf32> to vector<24x128xf32>
    %152 = arith.mulf %27, %151 : vector<24x128xf32>
    %cst_47 = arith.constant dense<0.000000e+00> : vector<24xf32>
    %153 = vector.multi_reduction <add>, %152, %cst_47 [1] : vector<24x128xf32> to vector<24xf32>
    %154 = vector.shape_cast %153 : vector<24xf32> to vector<24x1xf32>
    %155 = vector.broadcast %142 : vector<1x128xf32> to vector<24x128xf32>
    %156 = arith.mulf %34, %155 : vector<24x128xf32>
    %cst_48 = arith.constant dense<0.000000e+00> : vector<24xf32>
    %157 = vector.multi_reduction <add>, %156, %cst_48 [1] : vector<24x128xf32> to vector<24xf32>
    %158 = vector.shape_cast %157 : vector<24xf32> to vector<24x1xf32>
    %159 = vector.broadcast %146 : vector<24x1xf32> to vector<24x4xf32>
    %160 = vector.broadcast %41 : vector<1x4xf32> to vector<24x4xf32>
    %161 = arith.mulf %159, %160 : vector<24x4xf32>
    %162 = vector.broadcast %150 : vector<24x1xf32> to vector<24x4xf32>
    %163 = vector.broadcast %42 : vector<1x4xf32> to vector<24x4xf32>
    %164 = arith.mulf %162, %163 : vector<24x4xf32>
    %165 = arith.addf %161, %164 : vector<24x4xf32>
    %166 = vector.broadcast %154 : vector<24x1xf32> to vector<24x4xf32>
    %167 = vector.broadcast %43 : vector<1x4xf32> to vector<24x4xf32>
    %168 = arith.mulf %166, %167 : vector<24x4xf32>
    %169 = arith.addf %165, %168 : vector<24x4xf32>
    %170 = vector.broadcast %158 : vector<24x1xf32> to vector<24x4xf32>
    %171 = vector.broadcast %44 : vector<1x4xf32> to vector<24x4xf32>
    %172 = arith.mulf %170, %171 : vector<24x4xf32>
    %173 = arith.addf %169, %172 : vector<24x4xf32>
    %174 = vector.broadcast %38 : vector<1x4xf32> to vector<24x4xf32>
    %175 = arith.mulf %173, %174 : vector<24x4xf32>
    %cst_49 = arith.constant dense<0.000000e+00> : vector<24xf32>
    %176 = vector.multi_reduction <add>, %175, %cst_49 [1] : vector<24x4xf32> to vector<24xf32>
    %177 = vector.shape_cast %176 : vector<24xf32> to vector<24x1xf32>
    %178 = vector.broadcast %39 : vector<1x4xf32> to vector<24x4xf32>
    %179 = arith.mulf %173, %178 : vector<24x4xf32>
    %cst_50 = arith.constant dense<0.000000e+00> : vector<24xf32>
    %180 = vector.multi_reduction <add>, %179, %cst_50 [1] : vector<24x4xf32> to vector<24xf32>
    %181 = vector.shape_cast %180 : vector<24xf32> to vector<24x1xf32>
    %182 = vector.broadcast %177 : vector<24x1xf32> to vector<24x24xf32>
    %183 = arith.mulf %182, %4 : vector<24x24xf32>
    %cst_51 = arith.constant dense<0.000000e+00> : vector<24xf32>
    %184 = vector.multi_reduction <add>, %183, %cst_51 [0] : vector<24x24xf32> to vector<24xf32>
    %185 = vector.shape_cast %184 : vector<24xf32> to vector<1x24xf32>
    %186 = vector.broadcast %181 : vector<24x1xf32> to vector<24x24xf32>
    %187 = vector.broadcast %185 : vector<1x24xf32> to vector<24x24xf32>
    %188 = arith.addf %186, %187 : vector<24x24xf32>
    %cst_52 = arith.constant 0.000000e+00 : f32
    %189 = vector.broadcast %cst_52 : f32 to vector<24x24xf32>
    %190 = arith.cmpf oge, %188, %189 : vector<24x24xf32>
    %cst_53 = arith.constant 0.00999999977 : f32
    %191 = vector.broadcast %cst_53 : f32 to vector<24x24xf32>
    %192 = arith.mulf %191, %188 : vector<24x24xf32>
    %193 = arith.select %190, %188, %192 : vector<24x24xi1>, vector<24x24xf32>
    %cst_54 = arith.constant dense<0xFF800000> : vector<24xf32>
    %194 = vector.multi_reduction <maximumf>, %193, %cst_54 [1] : vector<24x24xf32> to vector<24xf32>
    %195 = vector.shape_cast %194 : vector<24xf32> to vector<24x1xf32>
    %196 = vector.broadcast %195 : vector<24x1xf32> to vector<24x24xf32>
    %197 = arith.subf %193, %196 : vector<24x24xf32>
    %198 = math.exp %197 : vector<24x24xf32>
    %cst_55 = arith.constant dense<0.000000e+00> : vector<24xf32>
    %199 = vector.multi_reduction <add>, %198, %cst_55 [1] : vector<24x24xf32> to vector<24xf32>
    %200 = vector.shape_cast %199 : vector<24xf32> to vector<24x1xf32>
    %201 = tpu.reciprocal %200 {approx = true} : vector<24x1xf32> -> vector<24x1xf32>
    %202 = vector.broadcast %201 : vector<24x1xf32> to vector<24x24xf32>
    %203 = arith.mulf %198, %202 : vector<24x24xf32>
    %cst_56 = arith.constant dense<0.000000e+00> : vector<24x4xf32>
    %204 = tpu.matmul %203, %173, %cst_56 {dimension_numbers = #tpu.dot_dimension_numbers<[1], [0], [0], [1], [0, 0, 1, 1], [], []>} : vector<24x24xf32>, vector<24x4xf32>, vector<24x4xf32> -> vector<24x4xf32>
    %205 = vector.extract_strided_slice %204 {offsets = [0, 0], sizes = [24, 1], strides = [1, 1]} : vector<24x4xf32> to vector<24x1xf32>
    %206 = vector.broadcast %205 : vector<24x1xf32> to vector<24x128xf32>
    %207 = arith.mulf %206, %13 : vector<24x128xf32>
    %cst_57 = arith.constant dense<0.000000e+00> : vector<128xf32>
    %208 = vector.multi_reduction <add>, %207, %cst_57 [0] : vector<24x128xf32> to vector<128xf32>
    %209 = vector.shape_cast %208 : vector<128xf32> to vector<1x128xf32>
    %210 = vector.extract_strided_slice %204 {offsets = [0, 1], sizes = [24, 1], strides = [1, 1]} : vector<24x4xf32> to vector<24x1xf32>
    %211 = vector.broadcast %210 : vector<24x1xf32> to vector<24x128xf32>
    %212 = arith.mulf %211, %20 : vector<24x128xf32>
    %cst_58 = arith.constant dense<0.000000e+00> : vector<128xf32>
    %213 = vector.multi_reduction <add>, %212, %cst_58 [0] : vector<24x128xf32> to vector<128xf32>
    %214 = vector.shape_cast %213 : vector<128xf32> to vector<1x128xf32>
    %215 = arith.addf %209, %214 : vector<1x128xf32>
    %216 = vector.extract_strided_slice %204 {offsets = [0, 2], sizes = [24, 1], strides = [1, 1]} : vector<24x4xf32> to vector<24x1xf32>
    %217 = vector.broadcast %216 : vector<24x1xf32> to vector<24x128xf32>
    %218 = arith.mulf %217, %27 : vector<24x128xf32>
    %cst_59 = arith.constant dense<0.000000e+00> : vector<128xf32>
    %219 = vector.multi_reduction <add>, %218, %cst_59 [0] : vector<24x128xf32> to vector<128xf32>
    %220 = vector.shape_cast %219 : vector<128xf32> to vector<1x128xf32>
    %221 = arith.addf %215, %220 : vector<1x128xf32>
    %222 = vector.extract_strided_slice %204 {offsets = [0, 3], sizes = [24, 1], strides = [1, 1]} : vector<24x4xf32> to vector<24x1xf32>
    %223 = vector.broadcast %222 : vector<24x1xf32> to vector<24x128xf32>
    %224 = arith.mulf %223, %34 : vector<24x128xf32>
    %cst_60 = arith.constant dense<0.000000e+00> : vector<128xf32>
    %225 = vector.multi_reduction <add>, %224, %cst_60 [0] : vector<24x128xf32> to vector<128xf32>
    %226 = vector.shape_cast %225 : vector<128xf32> to vector<1x128xf32>
    %227 = arith.addf %221, %226 : vector<1x128xf32>
    %c1_61 = arith.constant 1 : index
    %c0_62 = arith.constant 0 : index
    %c0_63 = arith.constant 0 : index
    %228 = vector.load %arg0[%c1_61, %c0_62, %c0_63] : memref<2x24x1xf32, #tpu.memory_space<vmem>>, vector<1x24x1xf32>
    %229 = vector.shape_cast %228 : vector<1x24x1xf32> to vector<24x1xf32>
    %230 = vector.broadcast %229 : vector<24x1xf32> to vector<24x4xf32>
    %231 = vector.broadcast %35 : vector<1x4xf32> to vector<24x4xf32>
    %232 = arith.mulf %230, %231 : vector<24x4xf32>
    %233 = vector.broadcast %36 : vector<1x4xf32> to vector<24x4xf32>
    %234 = arith.mulf %232, %233 : vector<24x4xf32>
    %cst_64 = arith.constant dense<0.000000e+00> : vector<24xf32>
    %235 = vector.multi_reduction <add>, %234, %cst_64 [1] : vector<24x4xf32> to vector<24xf32>
    %236 = vector.shape_cast %235 : vector<24xf32> to vector<24x1xf32>
    %237 = vector.broadcast %37 : vector<1x4xf32> to vector<24x4xf32>
    %238 = arith.mulf %232, %237 : vector<24x4xf32>
    %cst_65 = arith.constant dense<0.000000e+00> : vector<24xf32>
    %239 = vector.multi_reduction <add>, %238, %cst_65 [1] : vector<24x4xf32> to vector<24xf32>
    %240 = vector.shape_cast %239 : vector<24xf32> to vector<24x1xf32>
    %241 = vector.broadcast %236 : vector<24x1xf32> to vector<24x24xf32>
    %242 = arith.mulf %241, %4 : vector<24x24xf32>
    %cst_66 = arith.constant dense<0.000000e+00> : vector<24xf32>
    %243 = vector.multi_reduction <add>, %242, %cst_66 [0] : vector<24x24xf32> to vector<24xf32>
    %244 = vector.shape_cast %243 : vector<24xf32> to vector<1x24xf32>
    %245 = vector.broadcast %240 : vector<24x1xf32> to vector<24x24xf32>
    %246 = vector.broadcast %244 : vector<1x24xf32> to vector<24x24xf32>
    %247 = arith.addf %245, %246 : vector<24x24xf32>
    %cst_67 = arith.constant 0.000000e+00 : f32
    %248 = vector.broadcast %cst_67 : f32 to vector<24x24xf32>
    %249 = arith.cmpf oge, %247, %248 : vector<24x24xf32>
    %cst_68 = arith.constant 0.00999999977 : f32
    %250 = vector.broadcast %cst_68 : f32 to vector<24x24xf32>
    %251 = arith.mulf %250, %247 : vector<24x24xf32>
    %252 = arith.select %249, %247, %251 : vector<24x24xi1>, vector<24x24xf32>
    %cst_69 = arith.constant dense<0xFF800000> : vector<24xf32>
    %253 = vector.multi_reduction <maximumf>, %252, %cst_69 [1] : vector<24x24xf32> to vector<24xf32>
    %254 = vector.shape_cast %253 : vector<24xf32> to vector<24x1xf32>
    %255 = vector.broadcast %254 : vector<24x1xf32> to vector<24x24xf32>
    %256 = arith.subf %252, %255 : vector<24x24xf32>
    %257 = math.exp %256 : vector<24x24xf32>
    %cst_70 = arith.constant dense<0.000000e+00> : vector<24xf32>
    %258 = vector.multi_reduction <add>, %257, %cst_70 [1] : vector<24x24xf32> to vector<24xf32>
    %259 = vector.shape_cast %258 : vector<24xf32> to vector<24x1xf32>
    %260 = tpu.reciprocal %259 {approx = true} : vector<24x1xf32> -> vector<24x1xf32>
    %261 = vector.broadcast %260 : vector<24x1xf32> to vector<24x24xf32>
    %262 = arith.mulf %257, %261 : vector<24x24xf32>
    %cst_71 = arith.constant dense<0.000000e+00> : vector<24x4xf32>
    %263 = tpu.matmul %262, %232, %cst_71 {dimension_numbers = #tpu.dot_dimension_numbers<[1], [0], [0], [1], [0, 0, 1, 1], [], []>} : vector<24x24xf32>, vector<24x4xf32>, vector<24x4xf32> -> vector<24x4xf32>
    %264 = vector.extract_strided_slice %263 {offsets = [0, 0], sizes = [24, 1], strides = [1, 1]} : vector<24x4xf32> to vector<24x1xf32>
    %265 = vector.broadcast %264 : vector<24x1xf32> to vector<24x128xf32>
    %266 = arith.mulf %265, %13 : vector<24x128xf32>
    %cst_72 = arith.constant dense<0.000000e+00> : vector<128xf32>
    %267 = vector.multi_reduction <add>, %266, %cst_72 [0] : vector<24x128xf32> to vector<128xf32>
    %268 = vector.shape_cast %267 : vector<128xf32> to vector<1x128xf32>
    %269 = vector.extract_strided_slice %263 {offsets = [0, 1], sizes = [24, 1], strides = [1, 1]} : vector<24x4xf32> to vector<24x1xf32>
    %270 = vector.broadcast %269 : vector<24x1xf32> to vector<24x128xf32>
    %271 = arith.mulf %270, %20 : vector<24x128xf32>
    %cst_73 = arith.constant dense<0.000000e+00> : vector<128xf32>
    %272 = vector.multi_reduction <add>, %271, %cst_73 [0] : vector<24x128xf32> to vector<128xf32>
    %273 = vector.shape_cast %272 : vector<128xf32> to vector<1x128xf32>
    %274 = arith.addf %268, %273 : vector<1x128xf32>
    %275 = vector.extract_strided_slice %263 {offsets = [0, 2], sizes = [24, 1], strides = [1, 1]} : vector<24x4xf32> to vector<24x1xf32>
    %276 = vector.broadcast %275 : vector<24x1xf32> to vector<24x128xf32>
    %277 = arith.mulf %276, %27 : vector<24x128xf32>
    %cst_74 = arith.constant dense<0.000000e+00> : vector<128xf32>
    %278 = vector.multi_reduction <add>, %277, %cst_74 [0] : vector<24x128xf32> to vector<128xf32>
    %279 = vector.shape_cast %278 : vector<128xf32> to vector<1x128xf32>
    %280 = arith.addf %274, %279 : vector<1x128xf32>
    %281 = vector.extract_strided_slice %263 {offsets = [0, 3], sizes = [24, 1], strides = [1, 1]} : vector<24x4xf32> to vector<24x1xf32>
    %282 = vector.broadcast %281 : vector<24x1xf32> to vector<24x128xf32>
    %283 = arith.mulf %282, %34 : vector<24x128xf32>
    %cst_75 = arith.constant dense<0.000000e+00> : vector<128xf32>
    %284 = vector.multi_reduction <add>, %283, %cst_75 [0] : vector<24x128xf32> to vector<128xf32>
    %285 = vector.shape_cast %284 : vector<128xf32> to vector<1x128xf32>
    %286 = arith.addf %280, %285 : vector<1x128xf32>
    %c0_76 = arith.constant 0 : index
    %c0_77 = arith.constant 0 : index
    %287 = vector.load %arg2[%c0_76, %c0_77] : memref<128x384xf32, #tpu.memory_space<vmem>>, vector<128x384xf32>
    %cst_78 = arith.constant dense<0.000000e+00> : vector<1x384xf32>
    %288 = tpu.matmul %286, %287, %cst_78 {dimension_numbers = #tpu.dot_dimension_numbers<[1], [0], [0], [1], [0, 0, 1, 1], [], []>} : vector<1x128xf32>, vector<128x384xf32>, vector<1x384xf32> -> vector<1x384xf32>
    %289 = arith.addf %288, %49 : vector<1x384xf32>
    %c0_79 = arith.constant 0 : index
    %c0_80 = arith.constant 0 : index
    %290 = vector.load %arg3[%c0_79, %c0_80] : memref<128x384xf32, #tpu.memory_space<vmem>>, vector<128x384xf32>
    %cst_81 = arith.constant dense<0.000000e+00> : vector<1x384xf32>
    %291 = tpu.matmul %227, %290, %cst_81 {dimension_numbers = #tpu.dot_dimension_numbers<[1], [0], [0], [1], [0, 0, 1, 1], [], []>} : vector<1x128xf32>, vector<128x384xf32>, vector<1x384xf32> -> vector<1x384xf32>
    %292 = arith.addf %291, %50 : vector<1x384xf32>
    %293 = vector.extract_strided_slice %289 {offsets = [0, 0], sizes = [1, 128], strides = [1, 1]} : vector<1x384xf32> to vector<1x128xf32>
    %294 = vector.extract_strided_slice %292 {offsets = [0, 0], sizes = [1, 128], strides = [1, 1]} : vector<1x384xf32> to vector<1x128xf32>
    %295 = arith.addf %293, %294 : vector<1x128xf32>
    %296 = arith.negf %295 : vector<1x128xf32>
    %297 = math.exp %296 : vector<1x128xf32>
    %cst_82 = arith.constant 1.000000e+00 : f32
    %298 = vector.broadcast %cst_82 : f32 to vector<1x128xf32>
    %299 = arith.addf %298, %297 : vector<1x128xf32>
    %300 = arith.divf %298, %299 : vector<1x128xf32>
    %301 = vector.extract_strided_slice %289 {offsets = [0, 128], sizes = [1, 128], strides = [1, 1]} : vector<1x384xf32> to vector<1x128xf32>
    %302 = vector.extract_strided_slice %292 {offsets = [0, 128], sizes = [1, 128], strides = [1, 1]} : vector<1x384xf32> to vector<1x128xf32>
    %303 = arith.addf %301, %302 : vector<1x128xf32>
    %304 = arith.negf %303 : vector<1x128xf32>
    %305 = math.exp %304 : vector<1x128xf32>
    %cst_83 = arith.constant 1.000000e+00 : f32
    %306 = vector.broadcast %cst_83 : f32 to vector<1x128xf32>
    %307 = arith.addf %306, %305 : vector<1x128xf32>
    %308 = arith.divf %306, %307 : vector<1x128xf32>
    %309 = vector.extract_strided_slice %289 {offsets = [0, 256], sizes = [1, 128], strides = [1, 1]} : vector<1x384xf32> to vector<1x128xf32>
    %310 = vector.extract_strided_slice %292 {offsets = [0, 256], sizes = [1, 128], strides = [1, 1]} : vector<1x384xf32> to vector<1x128xf32>
    %311 = arith.mulf %300, %310 : vector<1x128xf32>
    %312 = arith.addf %309, %311 : vector<1x128xf32>
    %313 = math.tanh %312 : vector<1x128xf32>
    %cst_84 = arith.constant 1.000000e+00 : f32
    %314 = vector.broadcast %cst_84 : f32 to vector<1x128xf32>
    %315 = arith.subf %314, %308 : vector<1x128xf32>
    %316 = arith.mulf %315, %313 : vector<1x128xf32>
    %317 = arith.mulf %308, %227 : vector<1x128xf32>
    %318 = arith.addf %316, %317 : vector<1x128xf32>
    %319 = vector.broadcast %318 : vector<1x128xf32> to vector<24x128xf32>
    %320 = arith.mulf %13, %319 : vector<24x128xf32>
    %cst_85 = arith.constant dense<0.000000e+00> : vector<24xf32>
    %321 = vector.multi_reduction <add>, %320, %cst_85 [1] : vector<24x128xf32> to vector<24xf32>
    %322 = vector.shape_cast %321 : vector<24xf32> to vector<24x1xf32>
    %323 = vector.broadcast %318 : vector<1x128xf32> to vector<24x128xf32>
    %324 = arith.mulf %20, %323 : vector<24x128xf32>
    %cst_86 = arith.constant dense<0.000000e+00> : vector<24xf32>
    %325 = vector.multi_reduction <add>, %324, %cst_86 [1] : vector<24x128xf32> to vector<24xf32>
    %326 = vector.shape_cast %325 : vector<24xf32> to vector<24x1xf32>
    %327 = vector.broadcast %318 : vector<1x128xf32> to vector<24x128xf32>
    %328 = arith.mulf %27, %327 : vector<24x128xf32>
    %cst_87 = arith.constant dense<0.000000e+00> : vector<24xf32>
    %329 = vector.multi_reduction <add>, %328, %cst_87 [1] : vector<24x128xf32> to vector<24xf32>
    %330 = vector.shape_cast %329 : vector<24xf32> to vector<24x1xf32>
    %331 = vector.broadcast %318 : vector<1x128xf32> to vector<24x128xf32>
    %332 = arith.mulf %34, %331 : vector<24x128xf32>
    %cst_88 = arith.constant dense<0.000000e+00> : vector<24xf32>
    %333 = vector.multi_reduction <add>, %332, %cst_88 [1] : vector<24x128xf32> to vector<24xf32>
    %334 = vector.shape_cast %333 : vector<24xf32> to vector<24x1xf32>
    %335 = vector.broadcast %322 : vector<24x1xf32> to vector<24x4xf32>
    %336 = vector.broadcast %41 : vector<1x4xf32> to vector<24x4xf32>
    %337 = arith.mulf %335, %336 : vector<24x4xf32>
    %338 = vector.broadcast %326 : vector<24x1xf32> to vector<24x4xf32>
    %339 = vector.broadcast %42 : vector<1x4xf32> to vector<24x4xf32>
    %340 = arith.mulf %338, %339 : vector<24x4xf32>
    %341 = arith.addf %337, %340 : vector<24x4xf32>
    %342 = vector.broadcast %330 : vector<24x1xf32> to vector<24x4xf32>
    %343 = vector.broadcast %43 : vector<1x4xf32> to vector<24x4xf32>
    %344 = arith.mulf %342, %343 : vector<24x4xf32>
    %345 = arith.addf %341, %344 : vector<24x4xf32>
    %346 = vector.broadcast %334 : vector<24x1xf32> to vector<24x4xf32>
    %347 = vector.broadcast %44 : vector<1x4xf32> to vector<24x4xf32>
    %348 = arith.mulf %346, %347 : vector<24x4xf32>
    %349 = arith.addf %345, %348 : vector<24x4xf32>
    %350 = vector.broadcast %38 : vector<1x4xf32> to vector<24x4xf32>
    %351 = arith.mulf %349, %350 : vector<24x4xf32>
    %cst_89 = arith.constant dense<0.000000e+00> : vector<24xf32>
    %352 = vector.multi_reduction <add>, %351, %cst_89 [1] : vector<24x4xf32> to vector<24xf32>
    %353 = vector.shape_cast %352 : vector<24xf32> to vector<24x1xf32>
    %354 = vector.broadcast %39 : vector<1x4xf32> to vector<24x4xf32>
    %355 = arith.mulf %349, %354 : vector<24x4xf32>
    %cst_90 = arith.constant dense<0.000000e+00> : vector<24xf32>
    %356 = vector.multi_reduction <add>, %355, %cst_90 [1] : vector<24x4xf32> to vector<24xf32>
    %357 = vector.shape_cast %356 : vector<24xf32> to vector<24x1xf32>
    %358 = vector.broadcast %353 : vector<24x1xf32> to vector<24x24xf32>
    %359 = arith.mulf %358, %4 : vector<24x24xf32>
    %cst_91 = arith.constant dense<0.000000e+00> : vector<24xf32>
    %360 = vector.multi_reduction <add>, %359, %cst_91 [0] : vector<24x24xf32> to vector<24xf32>
    %361 = vector.shape_cast %360 : vector<24xf32> to vector<1x24xf32>
    %362 = vector.broadcast %357 : vector<24x1xf32> to vector<24x24xf32>
    %363 = vector.broadcast %361 : vector<1x24xf32> to vector<24x24xf32>
    %364 = arith.addf %362, %363 : vector<24x24xf32>
    %cst_92 = arith.constant 0.000000e+00 : f32
    %365 = vector.broadcast %cst_92 : f32 to vector<24x24xf32>
    %366 = arith.cmpf oge, %364, %365 : vector<24x24xf32>
    %cst_93 = arith.constant 0.00999999977 : f32
    %367 = vector.broadcast %cst_93 : f32 to vector<24x24xf32>
    %368 = arith.mulf %367, %364 : vector<24x24xf32>
    %369 = arith.select %366, %364, %368 : vector<24x24xi1>, vector<24x24xf32>
    %cst_94 = arith.constant dense<0xFF800000> : vector<24xf32>
    %370 = vector.multi_reduction <maximumf>, %369, %cst_94 [1] : vector<24x24xf32> to vector<24xf32>
    %371 = vector.shape_cast %370 : vector<24xf32> to vector<24x1xf32>
    %372 = vector.broadcast %371 : vector<24x1xf32> to vector<24x24xf32>
    %373 = arith.subf %369, %372 : vector<24x24xf32>
    %374 = math.exp %373 : vector<24x24xf32>
    %cst_95 = arith.constant dense<0.000000e+00> : vector<24xf32>
    %375 = vector.multi_reduction <add>, %374, %cst_95 [1] : vector<24x24xf32> to vector<24xf32>
    %376 = vector.shape_cast %375 : vector<24xf32> to vector<24x1xf32>
    %377 = tpu.reciprocal %376 {approx = true} : vector<24x1xf32> -> vector<24x1xf32>
    %378 = vector.broadcast %377 : vector<24x1xf32> to vector<24x24xf32>
    %379 = arith.mulf %374, %378 : vector<24x24xf32>
    %cst_96 = arith.constant dense<0.000000e+00> : vector<24x4xf32>
    %380 = tpu.matmul %379, %349, %cst_96 {dimension_numbers = #tpu.dot_dimension_numbers<[1], [0], [0], [1], [0, 0, 1, 1], [], []>} : vector<24x24xf32>, vector<24x4xf32>, vector<24x4xf32> -> vector<24x4xf32>
    %381 = vector.extract_strided_slice %380 {offsets = [0, 0], sizes = [24, 1], strides = [1, 1]} : vector<24x4xf32> to vector<24x1xf32>
    %382 = vector.broadcast %381 : vector<24x1xf32> to vector<24x128xf32>
    %383 = arith.mulf %382, %13 : vector<24x128xf32>
    %cst_97 = arith.constant dense<0.000000e+00> : vector<128xf32>
    %384 = vector.multi_reduction <add>, %383, %cst_97 [0] : vector<24x128xf32> to vector<128xf32>
    %385 = vector.shape_cast %384 : vector<128xf32> to vector<1x128xf32>
    %386 = vector.extract_strided_slice %380 {offsets = [0, 1], sizes = [24, 1], strides = [1, 1]} : vector<24x4xf32> to vector<24x1xf32>
    %387 = vector.broadcast %386 : vector<24x1xf32> to vector<24x128xf32>
    %388 = arith.mulf %387, %20 : vector<24x128xf32>
    %cst_98 = arith.constant dense<0.000000e+00> : vector<128xf32>
    %389 = vector.multi_reduction <add>, %388, %cst_98 [0] : vector<24x128xf32> to vector<128xf32>
    %390 = vector.shape_cast %389 : vector<128xf32> to vector<1x128xf32>
    %391 = arith.addf %385, %390 : vector<1x128xf32>
    %392 = vector.extract_strided_slice %380 {offsets = [0, 2], sizes = [24, 1], strides = [1, 1]} : vector<24x4xf32> to vector<24x1xf32>
    %393 = vector.broadcast %392 : vector<24x1xf32> to vector<24x128xf32>
    %394 = arith.mulf %393, %27 : vector<24x128xf32>
    %cst_99 = arith.constant dense<0.000000e+00> : vector<128xf32>
    %395 = vector.multi_reduction <add>, %394, %cst_99 [0] : vector<24x128xf32> to vector<128xf32>
    %396 = vector.shape_cast %395 : vector<128xf32> to vector<1x128xf32>
    %397 = arith.addf %391, %396 : vector<1x128xf32>
    %398 = vector.extract_strided_slice %380 {offsets = [0, 3], sizes = [24, 1], strides = [1, 1]} : vector<24x4xf32> to vector<24x1xf32>
    %399 = vector.broadcast %398 : vector<24x1xf32> to vector<24x128xf32>
    %400 = arith.mulf %399, %34 : vector<24x128xf32>
    %cst_100 = arith.constant dense<0.000000e+00> : vector<128xf32>
    %401 = vector.multi_reduction <add>, %400, %cst_100 [0] : vector<24x128xf32> to vector<128xf32>
    %402 = vector.shape_cast %401 : vector<128xf32> to vector<1x128xf32>
    %403 = arith.addf %397, %402 : vector<1x128xf32>
    %404 = vector.broadcast %322 : vector<24x1xf32> to vector<24x4xf32>
    %405 = vector.broadcast %45 : vector<1x4xf32> to vector<24x4xf32>
    %406 = arith.mulf %404, %405 : vector<24x4xf32>
    %407 = vector.broadcast %40 : vector<1x4xf32> to vector<24x4xf32>
    %408 = arith.addf %406, %407 : vector<24x4xf32>
    %409 = vector.broadcast %326 : vector<24x1xf32> to vector<24x4xf32>
    %410 = vector.broadcast %46 : vector<1x4xf32> to vector<24x4xf32>
    %411 = arith.mulf %409, %410 : vector<24x4xf32>
    %412 = arith.addf %408, %411 : vector<24x4xf32>
    %413 = vector.broadcast %330 : vector<24x1xf32> to vector<24x4xf32>
    %414 = vector.broadcast %47 : vector<1x4xf32> to vector<24x4xf32>
    %415 = arith.mulf %413, %414 : vector<24x4xf32>
    %416 = arith.addf %412, %415 : vector<24x4xf32>
    %417 = vector.broadcast %334 : vector<24x1xf32> to vector<24x4xf32>
    %418 = vector.broadcast %48 : vector<1x4xf32> to vector<24x4xf32>
    %419 = arith.mulf %417, %418 : vector<24x4xf32>
    %420 = arith.addf %416, %419 : vector<24x4xf32>
    %421 = vector.broadcast %36 : vector<1x4xf32> to vector<24x4xf32>
    %422 = arith.mulf %420, %421 : vector<24x4xf32>
    %cst_101 = arith.constant dense<0.000000e+00> : vector<24xf32>
    %423 = vector.multi_reduction <add>, %422, %cst_101 [1] : vector<24x4xf32> to vector<24xf32>
    %424 = vector.shape_cast %423 : vector<24xf32> to vector<24x1xf32>
    %425 = vector.broadcast %37 : vector<1x4xf32> to vector<24x4xf32>
    %426 = arith.mulf %420, %425 : vector<24x4xf32>
    %cst_102 = arith.constant dense<0.000000e+00> : vector<24xf32>
    %427 = vector.multi_reduction <add>, %426, %cst_102 [1] : vector<24x4xf32> to vector<24xf32>
    %428 = vector.shape_cast %427 : vector<24xf32> to vector<24x1xf32>
    %429 = vector.broadcast %424 : vector<24x1xf32> to vector<24x24xf32>
    %430 = arith.mulf %429, %4 : vector<24x24xf32>
    %cst_103 = arith.constant dense<0.000000e+00> : vector<24xf32>
    %431 = vector.multi_reduction <add>, %430, %cst_103 [0] : vector<24x24xf32> to vector<24xf32>
    %432 = vector.shape_cast %431 : vector<24xf32> to vector<1x24xf32>
    %433 = vector.broadcast %428 : vector<24x1xf32> to vector<24x24xf32>
    %434 = vector.broadcast %432 : vector<1x24xf32> to vector<24x24xf32>
    %435 = arith.addf %433, %434 : vector<24x24xf32>
    %cst_104 = arith.constant 0.000000e+00 : f32
    %436 = vector.broadcast %cst_104 : f32 to vector<24x24xf32>
    %437 = arith.cmpf oge, %435, %436 : vector<24x24xf32>
    %cst_105 = arith.constant 0.00999999977 : f32
    %438 = vector.broadcast %cst_105 : f32 to vector<24x24xf32>
    %439 = arith.mulf %438, %435 : vector<24x24xf32>
    %440 = arith.select %437, %435, %439 : vector<24x24xi1>, vector<24x24xf32>
    %cst_106 = arith.constant dense<0xFF800000> : vector<24xf32>
    %441 = vector.multi_reduction <maximumf>, %440, %cst_106 [1] : vector<24x24xf32> to vector<24xf32>
    %442 = vector.shape_cast %441 : vector<24xf32> to vector<24x1xf32>
    %443 = vector.broadcast %442 : vector<24x1xf32> to vector<24x24xf32>
    %444 = arith.subf %440, %443 : vector<24x24xf32>
    %445 = math.exp %444 : vector<24x24xf32>
    %cst_107 = arith.constant dense<0.000000e+00> : vector<24xf32>
    %446 = vector.multi_reduction <add>, %445, %cst_107 [1] : vector<24x24xf32> to vector<24xf32>
    %447 = vector.shape_cast %446 : vector<24xf32> to vector<24x1xf32>
    %448 = tpu.reciprocal %447 {approx = true} : vector<24x1xf32> -> vector<24x1xf32>
    %449 = vector.broadcast %448 : vector<24x1xf32> to vector<24x24xf32>
    %450 = arith.mulf %445, %449 : vector<24x24xf32>
    %cst_108 = arith.constant dense<0.000000e+00> : vector<24x4xf32>
    %451 = tpu.matmul %450, %420, %cst_108 {dimension_numbers = #tpu.dot_dimension_numbers<[1], [0], [0], [1], [0, 0, 1, 1], [], []>} : vector<24x24xf32>, vector<24x4xf32>, vector<24x4xf32> -> vector<24x4xf32>
    %452 = vector.extract_strided_slice %451 {offsets = [0, 0], sizes = [24, 1], strides = [1, 1]} : vector<24x4xf32> to vector<24x1xf32>
    %453 = vector.broadcast %452 : vector<24x1xf32> to vector<24x128xf32>
    %454 = arith.mulf %453, %13 : vector<24x128xf32>
    %cst_109 = arith.constant dense<0.000000e+00> : vector<128xf32>
    %455 = vector.multi_reduction <add>, %454, %cst_109 [0] : vector<24x128xf32> to vector<128xf32>
    %456 = vector.shape_cast %455 : vector<128xf32> to vector<1x128xf32>
    %457 = vector.extract_strided_slice %451 {offsets = [0, 1], sizes = [24, 1], strides = [1, 1]} : vector<24x4xf32> to vector<24x1xf32>
    %458 = vector.broadcast %457 : vector<24x1xf32> to vector<24x128xf32>
    %459 = arith.mulf %458, %20 : vector<24x128xf32>
    %cst_110 = arith.constant dense<0.000000e+00> : vector<128xf32>
    %460 = vector.multi_reduction <add>, %459, %cst_110 [0] : vector<24x128xf32> to vector<128xf32>
    %461 = vector.shape_cast %460 : vector<128xf32> to vector<1x128xf32>
    %462 = arith.addf %456, %461 : vector<1x128xf32>
    %463 = vector.extract_strided_slice %451 {offsets = [0, 2], sizes = [24, 1], strides = [1, 1]} : vector<24x4xf32> to vector<24x1xf32>
    %464 = vector.broadcast %463 : vector<24x1xf32> to vector<24x128xf32>
    %465 = arith.mulf %464, %27 : vector<24x128xf32>
    %cst_111 = arith.constant dense<0.000000e+00> : vector<128xf32>
    %466 = vector.multi_reduction <add>, %465, %cst_111 [0] : vector<24x128xf32> to vector<128xf32>
    %467 = vector.shape_cast %466 : vector<128xf32> to vector<1x128xf32>
    %468 = arith.addf %462, %467 : vector<1x128xf32>
    %469 = vector.extract_strided_slice %451 {offsets = [0, 3], sizes = [24, 1], strides = [1, 1]} : vector<24x4xf32> to vector<24x1xf32>
    %470 = vector.broadcast %469 : vector<24x1xf32> to vector<24x128xf32>
    %471 = arith.mulf %470, %34 : vector<24x128xf32>
    %cst_112 = arith.constant dense<0.000000e+00> : vector<128xf32>
    %472 = vector.multi_reduction <add>, %471, %cst_112 [0] : vector<24x128xf32> to vector<128xf32>
    %473 = vector.shape_cast %472 : vector<128xf32> to vector<1x128xf32>
    %474 = arith.addf %468, %473 : vector<1x128xf32>
    %c0_113 = arith.constant 0 : index
    %c0_114 = arith.constant 0 : index
    %475 = vector.load %arg2[%c0_113, %c0_114] : memref<128x384xf32, #tpu.memory_space<vmem>>, vector<128x384xf32>
    %cst_115 = arith.constant dense<0.000000e+00> : vector<1x384xf32>
    %476 = tpu.matmul %474, %475, %cst_115 {dimension_numbers = #tpu.dot_dimension_numbers<[1], [0], [0], [1], [0, 0, 1, 1], [], []>} : vector<1x128xf32>, vector<128x384xf32>, vector<1x384xf32> -> vector<1x384xf32>
    %477 = arith.addf %476, %49 : vector<1x384xf32>
    %c0_116 = arith.constant 0 : index
    %c0_117 = arith.constant 0 : index
    %478 = vector.load %arg3[%c0_116, %c0_117] : memref<128x384xf32, #tpu.memory_space<vmem>>, vector<128x384xf32>
    %cst_118 = arith.constant dense<0.000000e+00> : vector<1x384xf32>
    %479 = tpu.matmul %403, %478, %cst_118 {dimension_numbers = #tpu.dot_dimension_numbers<[1], [0], [0], [1], [0, 0, 1, 1], [], []>} : vector<1x128xf32>, vector<128x384xf32>, vector<1x384xf32> -> vector<1x384xf32>
    %480 = arith.addf %479, %50 : vector<1x384xf32>
    %481 = vector.extract_strided_slice %477 {offsets = [0, 0], sizes = [1, 128], strides = [1, 1]} : vector<1x384xf32> to vector<1x128xf32>
    %482 = vector.extract_strided_slice %480 {offsets = [0, 0], sizes = [1, 128], strides = [1, 1]} : vector<1x384xf32> to vector<1x128xf32>
    %483 = arith.addf %481, %482 : vector<1x128xf32>
    %484 = arith.negf %483 : vector<1x128xf32>
    %485 = math.exp %484 : vector<1x128xf32>
    %cst_119 = arith.constant 1.000000e+00 : f32
    %486 = vector.broadcast %cst_119 : f32 to vector<1x128xf32>
    %487 = arith.addf %486, %485 : vector<1x128xf32>
    %488 = arith.divf %486, %487 : vector<1x128xf32>
    %489 = vector.extract_strided_slice %477 {offsets = [0, 128], sizes = [1, 128], strides = [1, 1]} : vector<1x384xf32> to vector<1x128xf32>
    %490 = vector.extract_strided_slice %480 {offsets = [0, 128], sizes = [1, 128], strides = [1, 1]} : vector<1x384xf32> to vector<1x128xf32>
    %491 = arith.addf %489, %490 : vector<1x128xf32>
    %492 = arith.negf %491 : vector<1x128xf32>
    %493 = math.exp %492 : vector<1x128xf32>
    %cst_120 = arith.constant 1.000000e+00 : f32
    %494 = vector.broadcast %cst_120 : f32 to vector<1x128xf32>
    %495 = arith.addf %494, %493 : vector<1x128xf32>
    %496 = arith.divf %494, %495 : vector<1x128xf32>
    %497 = vector.extract_strided_slice %477 {offsets = [0, 256], sizes = [1, 128], strides = [1, 1]} : vector<1x384xf32> to vector<1x128xf32>
    %498 = vector.extract_strided_slice %480 {offsets = [0, 256], sizes = [1, 128], strides = [1, 1]} : vector<1x384xf32> to vector<1x128xf32>
    %499 = arith.mulf %488, %498 : vector<1x128xf32>
    %500 = arith.addf %497, %499 : vector<1x128xf32>
    %501 = math.tanh %500 : vector<1x128xf32>
    %cst_121 = arith.constant 1.000000e+00 : f32
    %502 = vector.broadcast %cst_121 : f32 to vector<1x128xf32>
    %503 = arith.subf %502, %496 : vector<1x128xf32>
    %504 = arith.mulf %503, %501 : vector<1x128xf32>
    %505 = arith.mulf %496, %403 : vector<1x128xf32>
    %506 = arith.addf %504, %505 : vector<1x128xf32>
    %507 = vector.broadcast %506 : vector<1x128xf32> to vector<24x128xf32>
    %508 = arith.mulf %13, %507 : vector<24x128xf32>
    %cst_122 = arith.constant dense<0.000000e+00> : vector<24xf32>
    %509 = vector.multi_reduction <add>, %508, %cst_122 [1] : vector<24x128xf32> to vector<24xf32>
    %510 = vector.shape_cast %509 : vector<24xf32> to vector<24x1xf32>
    %511 = vector.broadcast %506 : vector<1x128xf32> to vector<24x128xf32>
    %512 = arith.mulf %20, %511 : vector<24x128xf32>
    %cst_123 = arith.constant dense<0.000000e+00> : vector<24xf32>
    %513 = vector.multi_reduction <add>, %512, %cst_123 [1] : vector<24x128xf32> to vector<24xf32>
    %514 = vector.shape_cast %513 : vector<24xf32> to vector<24x1xf32>
    %515 = vector.broadcast %506 : vector<1x128xf32> to vector<24x128xf32>
    %516 = arith.mulf %27, %515 : vector<24x128xf32>
    %cst_124 = arith.constant dense<0.000000e+00> : vector<24xf32>
    %517 = vector.multi_reduction <add>, %516, %cst_124 [1] : vector<24x128xf32> to vector<24xf32>
    %518 = vector.shape_cast %517 : vector<24xf32> to vector<24x1xf32>
    %519 = vector.broadcast %506 : vector<1x128xf32> to vector<24x128xf32>
    %520 = arith.mulf %34, %519 : vector<24x128xf32>
    %cst_125 = arith.constant dense<0.000000e+00> : vector<24xf32>
    %521 = vector.multi_reduction <add>, %520, %cst_125 [1] : vector<24x128xf32> to vector<24xf32>
    %522 = vector.shape_cast %521 : vector<24xf32> to vector<24x1xf32>
    %523 = vector.broadcast %510 : vector<24x1xf32> to vector<24x4xf32>
    %524 = vector.broadcast %41 : vector<1x4xf32> to vector<24x4xf32>
    %525 = arith.mulf %523, %524 : vector<24x4xf32>
    %526 = vector.broadcast %514 : vector<24x1xf32> to vector<24x4xf32>
    %527 = vector.broadcast %42 : vector<1x4xf32> to vector<24x4xf32>
    %528 = arith.mulf %526, %527 : vector<24x4xf32>
    %529 = arith.addf %525, %528 : vector<24x4xf32>
    %530 = vector.broadcast %518 : vector<24x1xf32> to vector<24x4xf32>
    %531 = vector.broadcast %43 : vector<1x4xf32> to vector<24x4xf32>
    %532 = arith.mulf %530, %531 : vector<24x4xf32>
    %533 = arith.addf %529, %532 : vector<24x4xf32>
    %534 = vector.broadcast %522 : vector<24x1xf32> to vector<24x4xf32>
    %535 = vector.broadcast %44 : vector<1x4xf32> to vector<24x4xf32>
    %536 = arith.mulf %534, %535 : vector<24x4xf32>
    %537 = arith.addf %533, %536 : vector<24x4xf32>
    %538 = vector.broadcast %38 : vector<1x4xf32> to vector<24x4xf32>
    %539 = arith.mulf %537, %538 : vector<24x4xf32>
    %cst_126 = arith.constant dense<0.000000e+00> : vector<24xf32>
    %540 = vector.multi_reduction <add>, %539, %cst_126 [1] : vector<24x4xf32> to vector<24xf32>
    %541 = vector.shape_cast %540 : vector<24xf32> to vector<24x1xf32>
    %542 = vector.broadcast %39 : vector<1x4xf32> to vector<24x4xf32>
    %543 = arith.mulf %537, %542 : vector<24x4xf32>
    %cst_127 = arith.constant dense<0.000000e+00> : vector<24xf32>
    %544 = vector.multi_reduction <add>, %543, %cst_127 [1] : vector<24x4xf32> to vector<24xf32>
    %545 = vector.shape_cast %544 : vector<24xf32> to vector<24x1xf32>
    %546 = vector.broadcast %541 : vector<24x1xf32> to vector<24x24xf32>
    %547 = arith.mulf %546, %4 : vector<24x24xf32>
    %cst_128 = arith.constant dense<0.000000e+00> : vector<24xf32>
    %548 = vector.multi_reduction <add>, %547, %cst_128 [0] : vector<24x24xf32> to vector<24xf32>
    %549 = vector.shape_cast %548 : vector<24xf32> to vector<1x24xf32>
    %550 = vector.broadcast %545 : vector<24x1xf32> to vector<24x24xf32>
    %551 = vector.broadcast %549 : vector<1x24xf32> to vector<24x24xf32>
    %552 = arith.addf %550, %551 : vector<24x24xf32>
    %cst_129 = arith.constant 0.000000e+00 : f32
    %553 = vector.broadcast %cst_129 : f32 to vector<24x24xf32>
    %554 = arith.cmpf oge, %552, %553 : vector<24x24xf32>
    %cst_130 = arith.constant 0.00999999977 : f32
    %555 = vector.broadcast %cst_130 : f32 to vector<24x24xf32>
    %556 = arith.mulf %555, %552 : vector<24x24xf32>
    %557 = arith.select %554, %552, %556 : vector<24x24xi1>, vector<24x24xf32>
    %cst_131 = arith.constant dense<0xFF800000> : vector<24xf32>
    %558 = vector.multi_reduction <maximumf>, %557, %cst_131 [1] : vector<24x24xf32> to vector<24xf32>
    %559 = vector.shape_cast %558 : vector<24xf32> to vector<24x1xf32>
    %560 = vector.broadcast %559 : vector<24x1xf32> to vector<24x24xf32>
    %561 = arith.subf %557, %560 : vector<24x24xf32>
    %562 = math.exp %561 : vector<24x24xf32>
    %cst_132 = arith.constant dense<0.000000e+00> : vector<24xf32>
    %563 = vector.multi_reduction <add>, %562, %cst_132 [1] : vector<24x24xf32> to vector<24xf32>
    %564 = vector.shape_cast %563 : vector<24xf32> to vector<24x1xf32>
    %565 = tpu.reciprocal %564 {approx = true} : vector<24x1xf32> -> vector<24x1xf32>
    %566 = vector.broadcast %565 : vector<24x1xf32> to vector<24x24xf32>
    %567 = arith.mulf %562, %566 : vector<24x24xf32>
    %cst_133 = arith.constant dense<0.000000e+00> : vector<24x4xf32>
    %568 = tpu.matmul %567, %537, %cst_133 {dimension_numbers = #tpu.dot_dimension_numbers<[1], [0], [0], [1], [0, 0, 1, 1], [], []>} : vector<24x24xf32>, vector<24x4xf32>, vector<24x4xf32> -> vector<24x4xf32>
    %569 = vector.extract_strided_slice %568 {offsets = [0, 0], sizes = [24, 1], strides = [1, 1]} : vector<24x4xf32> to vector<24x1xf32>
    %570 = vector.broadcast %569 : vector<24x1xf32> to vector<24x128xf32>
    %571 = arith.mulf %570, %13 : vector<24x128xf32>
    %cst_134 = arith.constant dense<0.000000e+00> : vector<128xf32>
    %572 = vector.multi_reduction <add>, %571, %cst_134 [0] : vector<24x128xf32> to vector<128xf32>
    %573 = vector.shape_cast %572 : vector<128xf32> to vector<1x128xf32>
    %574 = vector.extract_strided_slice %568 {offsets = [0, 1], sizes = [24, 1], strides = [1, 1]} : vector<24x4xf32> to vector<24x1xf32>
    %575 = vector.broadcast %574 : vector<24x1xf32> to vector<24x128xf32>
    %576 = arith.mulf %575, %20 : vector<24x128xf32>
    %cst_135 = arith.constant dense<0.000000e+00> : vector<128xf32>
    %577 = vector.multi_reduction <add>, %576, %cst_135 [0] : vector<24x128xf32> to vector<128xf32>
    %578 = vector.shape_cast %577 : vector<128xf32> to vector<1x128xf32>
    %579 = arith.addf %573, %578 : vector<1x128xf32>
    %580 = vector.extract_strided_slice %568 {offsets = [0, 2], sizes = [24, 1], strides = [1, 1]} : vector<24x4xf32> to vector<24x1xf32>
    %581 = vector.broadcast %580 : vector<24x1xf32> to vector<24x128xf32>
    %582 = arith.mulf %581, %27 : vector<24x128xf32>
    %cst_136 = arith.constant dense<0.000000e+00> : vector<128xf32>
    %583 = vector.multi_reduction <add>, %582, %cst_136 [0] : vector<24x128xf32> to vector<128xf32>
    %584 = vector.shape_cast %583 : vector<128xf32> to vector<1x128xf32>
    %585 = arith.addf %579, %584 : vector<1x128xf32>
    %586 = vector.extract_strided_slice %568 {offsets = [0, 3], sizes = [24, 1], strides = [1, 1]} : vector<24x4xf32> to vector<24x1xf32>
    %587 = vector.broadcast %586 : vector<24x1xf32> to vector<24x128xf32>
    %588 = arith.mulf %587, %34 : vector<24x128xf32>
    %cst_137 = arith.constant dense<0.000000e+00> : vector<128xf32>
    %589 = vector.multi_reduction <add>, %588, %cst_137 [0] : vector<24x128xf32> to vector<128xf32>
    %590 = vector.shape_cast %589 : vector<128xf32> to vector<1x128xf32>
    %591 = arith.addf %585, %590 : vector<1x128xf32>
    %c0_138 = arith.constant 0 : index
    %c14 = arith.constant 14 : index
    %c0_139 = arith.constant 0 : index
    %592 = vector.load %arg0[%c0_138, %c14, %c0_139] : memref<2x24x1xf32, #tpu.memory_space<vmem>>, vector<1x7x1xf32>
    %593 = vector.shape_cast %592 : vector<1x7x1xf32> to vector<7x1xf32>
    %c14_140 = arith.constant 14 : index
    %c0_141 = arith.constant 0 : index
    %594 = vector.load %arg1[%c14_140, %c0_141] : memref<24x128xf32, #tpu.memory_space<vmem>>, vector<7x32xf32>
    %595 = vector.broadcast %593 : vector<7x1xf32> to vector<7x32xf32>
    %596 = arith.mulf %595, %594 : vector<7x32xf32>
    %cst_142 = arith.constant dense<0.000000e+00> : vector<32xf32>
    %597 = vector.multi_reduction <add>, %596, %cst_142 [0] : vector<7x32xf32> to vector<32xf32>
    %598 = vector.shape_cast %597 : vector<32xf32> to vector<1x32xf32>
    %c0_143 = arith.constant 0 : index
    %c0_144 = arith.constant 0 : index
    %599 = vector.load %arg5[%c0_143, %c0_144] : memref<128x32xf32, #tpu.memory_space<vmem>>, vector<128x32xf32>
    %cst_145 = arith.constant dense<0.000000e+00> : vector<1x32xf32>
    %600 = tpu.matmul %591, %599, %cst_145 {dimension_numbers = #tpu.dot_dimension_numbers<[1], [0], [0], [1], [0, 0, 1, 1], [], []>} : vector<1x128xf32>, vector<128x32xf32>, vector<1x32xf32> -> vector<1x32xf32>
    %601 = arith.addf %600, %598 : vector<1x32xf32>
    %c21 = arith.constant 21 : index
    %c0_146 = arith.constant 0 : index
    %602 = vector.load %arg1[%c21, %c0_146] : memref<24x128xf32, #tpu.memory_space<vmem>>, vector<1x32xf32>
    %603 = arith.addf %601, %602 : vector<1x32xf32>
    %c0_147 = arith.constant 0 : index
    %c0_148 = arith.constant 0 : index
    %604 = vector.load %arg6[%c0_147, %c0_148] : memref<1x32xf32, #tpu.memory_space<vmem>>, vector<1x32xf32>
    tpu.vector_store %arg6[%c0_147, %c0_148], %603 {strides = array<i32>} : memref<1x32xf32, #tpu.memory_space<vmem>>, vector<1x32xf32>,
    return
  }
}

</mosaic_0001>

<bundles_post_ra>
// kernel: tpu_custom_call.1
= control target key start
LH: loop header
LB: loop body
LE: loop exit
PB: predicated region body
PF: predicated region fallthrough
CT: control target
= control target key end

     0   :  { %11 = vsyncpa [#allocation3], 0  ;;  %s5494_s0 = inlined_call_operand.vmem [shape: f32[2,24,1], index: 0, kind: input, shape index: {}]   ;;  %s5495_s1 = inlined_call_operand.vmem [shape: f32[24,128], index: 1, kind: input, shape index: {}]   ;;  %s5496_s2 = inlined_call_operand.hbm [shape: f32[128,384], index: 2, kind: input, shape index: {}]   ;;  %s5497_s3 = inlined_call_operand.hbm [shape: f32[128,384], index: 3, kind: input, shape index: {}]   ;;  %s5498_s4 = inlined_call_operand.vmem [shape: f32[2,384], index: 4, kind: input, shape index: {}]   ;;  %s5499_s5 = inlined_call_operand.vmem [shape: f32[128,32], index: 5, kind: input, shape index: {}]   ;;  %s5500_s6 = inlined_call_operand.hbm [shape: f32[1,32], index: 6, kind: output, shape index: {}]  }
   0x1   :  { %12 = vsyncpa [#allocation6], 0 }
   0x2   :  { %13 = vsyncpa [#allocation4], 0  ;;  %s4428_s21 = smov [#allocation2]   ;;  %s4356_s25 = scalar_lea.hbm %s5496_s2, 6144 }
   0x3   :  { %s23_s22 = sshll.u32 %s4428_s21, 4  ;;  %p4357_p0 = scmp.ne.s32.totalorder %s5496_s2, %s4356_s25  ;;  %s24_s22 = int_to_ptr.vmem [resolvable:$true] %s23_s22 }
   0x4   :  { %p4360_p1 = scmp.lt.u32.totalorder %s4356_s25, %s5496_s2 }
   0x6   :  { %p4362_p2 = pnand %p4360_p1, %p4357_p0 }
   0x8   :  { %4365 = shalt.err (!%p4362_p2)
}
   0x9   :  { %s4366_s30 = scalar_lea.vmem %s24_s22, 6144  ;;  %p4371_p4 = scmp.lt.s32.totalorder %s24_s22, %s24_s22 }
   0xa   :  { %p4367_p3 = scmp.ne.s32.totalorder %s24_s22, %s4366_s30  ;;  %p4372_p5 = scmp.lt.s32.totalorder %s4366_s30, %s4366_s30 }
   0xc   :  { %p4373_p6 = por %p4372_p5, %p4371_p4 }
   0xe   :  { %p4374_p7 = pnand %p4373_p6, %p4367_p3 }
  0x10   :  { %4377 = shalt.err (!%p4374_p7)
}
  0x11   :  { %s4429_s7 = smov 384   ;;  %s4430_s8 = smov 24  }
  0x12   :  { %29 = dma.hbm_to_vmem [thread:$0]  %s5496_s2, 6144, %s24_s22, [#allocation3], %s4429_s7, %s4429_s7, %s4430_s8  }
  0x13   :  { %s4431_s11 = smov [#allocation5]   ;;  %s4378_s15 = scalar_lea.hbm %s5497_s3, 6144 }
  0x14   :  { %s35_s12 = sshll.u32 %s4431_s11, 4  ;;  %p4379_p8 = scmp.ne.s32.totalorder %s5497_s3, %s4378_s15  ;;  %s36_s12 = int_to_ptr.vmem [resolvable:$true] %s35_s12 }
  0x15   :  { %p4382_p9 = scmp.lt.u32.totalorder %s4378_s15, %s5497_s3 }
  0x17   :  { %p4384_p10 = pnand %p4382_p9, %p4379_p8 }
  0x19   :  { %4387 = shalt.err (!%p4384_p10)
}
  0x1a   :  { %s4388_s20 = scalar_lea.vmem %s36_s12, 6144  ;;  %p4393_p12 = scmp.lt.s32.totalorder %s36_s12, %s36_s12 }
  0x1b   :  { %p4389_p11 = scmp.ne.s32.totalorder %s36_s12, %s4388_s20  ;;  %p4394_p13 = scmp.lt.s32.totalorder %s4388_s20, %s4388_s20 }
  0x1d   :  { %p4395_p0 = por %p4394_p13, %p4393_p12 }
  0x1f   :  { %p4396_p1 = pnand %p4395_p0, %p4389_p11 }
  0x21   :  { %4399 = shalt.err (!%p4396_p1)
}
  0x22   :  { %41 = dma.hbm_to_vmem [thread:$0]  %s5497_s3, 6144, %s36_s12, [#allocation6], %s4429_s7, %s4429_s7, %s4430_s8  }
  0x23   :  { %4422 = dma.done.wait [#allocation3], 6144  }
  0x24   :  { %4423 = vsyncadd [#allocation3], 4294961152 }
  0x25   :  { %4424 = dma.done.wait [#allocation6], 6144  }
  0x26   :  { %4425 = vsyncadd [#allocation6], 4294961152  ;;  %v5501_v0 = vmov 0   ;;  %v132_v1 = vld [vmem:[%s5494_s0] sm:$0xff]  ;;  %v134_v2 = vld [vmem:[%s5494_s0 + $0x10] sm:$0xff]  ;;  %v5509_v4 = vmov 0.0|0.0   ;;  %v52_v28 = vlaneseq }
  0x27   :  { %4174 = vset.pattern.permute.xlu0 %v5501_v0  ;;  %4175 = vset.pattern.permute.xlu1 %v5501_v0  ;;  %v133_v3 = vld [vmem:[%s5494_s0 + $0x8] sm:$0xff]  ;;  %v4515_v5 = vld [vmem:[%s5495_s1] ss:$0 sm:$0xff]  ;;  %v3236_v7 = vld [vmem:[%s5495_s1 + $0x1] ss:$0 sm:$0xff]  ;;  %vm164_vm0 = vcmask 31744  }
  0x28   :  { %137 = vperm.xlu0 %4174, %v132_v1   ;;  %147 = vperm.xlu1 %4175, %v134_v2   ;;  %v3237_v10 = vld [vmem:[%s5495_s1 + $0x2] ss:$0 sm:$0xff]  ;;  %v5515_v23 = vmov 0.0   ;;  %v4533_v29 = vshrl.u32 %v52_v28, 7  ;;  %v4535_v30 = vand.u32 127, %v52_v28  ;;  %vm193_vm4 = vcmask 195584  }
  0x29   :  { %3766 = vmatprep.subr.bf16.mxu1 %v5509_v4  ;;  %3801 = vmatprep.subr.bf16.mxu0 %v5509_v4  ;;  %vm4435_vm8 = vmmov 0   ;;  %s4439_s3 = smov [#allocation7]  }
  0x2a   :  { %v4538_v31 = vadd.s32 8, %v4533_v29  ;;  %vm58_vm1 = vcmp.eq.s32.totalorder %v4533_v29, %v4535_v30  ;;  %v4545_v32 = vadd.s32 16, %v4533_v29  ;;  %3437 = vmatprep.mubr.msk.f32.mxu1 %vm4435_vm8, %v5515_v23  ;;  %3478 = vmatprep.mubr.msk.f32.mxu0 %vm4435_vm8, %v5515_v23  ;;  %s3209_s26 = sshll.u32 %s4439_s3, 4  ;;  %s3210_s26 = int_to_ptr.vmem [resolvable:$true] %s3209_s26 }
  0x2b   :  { %v4548_v33 = vsel %vm58_vm1, 1.0, %v5515_v23  ;;  %s4400_s27 = scalar_lea.vmem %s3210_s26, 16  ;;  %s4404_s28 = scalar_lea.vmem %s3210_s26, 32 }
  0x2c   :  { %142 = vperm.xlu0 %4174, %v133_v3   ;;  %vm59_vm2 = vcmp.eq.s32.totalorder %v4538_v31, %v4535_v30  ;;  %vm60_vm3 = vcmp.eq.s32.totalorder %v4545_v32, %v4535_v30  ;;  %p4401_p2 = scmp.ne.s32.totalorder %s3210_s26, %s4400_s27  ;;  %p4405_p3 = scmp.lt.s32.totalorder %s3210_s26, %s3210_s26 }
  0x2d   :  { %v4551_v35 = vsel %vm59_vm2, 1.0, %v5515_v23  ;;  %v4558_v39 = vsel %vm60_vm3, 1.0, %v5515_v23  ;;  %p4406_p4 = scmp.lt.s32.totalorder %s4404_s28, %s4400_s27 }
  0x2f   :  { %p4407_p5 = por %p4406_p4, %p4405_p3 }
  0x31   :  { %p4408_p6 = pnand %p4407_p5, %p4401_p2 }
  0xa7   :  { %v138_v6 = vpop.permute.xlu0 %137  ;;  %v148_v8 = vpop.permute.xlu1 %147 }
  0xa8   :  { %v154_v9 = vmul.f32 %v4515_v5, %v138_v6  ;;  %v156_v12 = vmul.f32 %v4515_v5, %v148_v8 }
  0xaa   :  { %v161_v11 = vmul.f32 %v3236_v7, %v154_v9  ;;  %v178_v16 = vmul.f32 %v3237_v10, %v154_v9  ;;  %v163_v19 = vmul.f32 %v3236_v7, %v156_v12  ;;  %v180_v20 = vmul.f32 %v3237_v10, %v156_v12 }
  0xab   :  { %v143_v13 = vpop.permute.xlu0 %142 }
  0xac   :  { %v155_v14 = vmul.f32 %v4515_v5, %v143_v13  ;;  %v165_v15 = vsel %vm164_vm0, %v161_v11, 0.0  ;;  %v181_v22 = vsel %vm164_vm0, %v178_v16, 0.0  ;;  %v171_v24 = vsel %vm164_vm0, %v163_v19, 0.0 }
  0xad   :  { %166 = vadd.xlane.f32.xlu1 %v165_v15  ;;  %v187_v25 = vsel %vm164_vm0, %v180_v20, 0.0 }
  0xae   :  { %v3767_v17 = vpack.c.bf16 %v155_v14, %v154_v9  ;;  %v162_v18 = vmul.f32 %v3236_v7, %v155_v14  ;;  %v179_v26 = vmul.f32 %v3237_v10, %v155_v14 }
  0xb0   :  { %3768 = vmatpush3.bf16.msra.mxu1 %v3767_v17  ;;  %v168_v21 = vsel %vm164_vm0, %v162_v18, 0.0  ;;  %v184_v27 = vsel %vm164_vm0, %v179_v26, 0.0 }
  0xb1   :  { %169 = vadd.xlane.f32.xlu0 %v168_v21  ;;  %182 = vadd.xlane.f32.xlu1 %v181_v22  ;;  %v5507_v22 = vmov 1  }
  0xb2   :  { %3435 = vmatprep.subr.mxu1 %v5515_v23  ;;  %4176 = vset.pattern.permute.xlu1 %v5507_v22 }
  0xb4   :  { %3436 = vmatpush3.msra.mxu1 %v156_v12 }
  0xb5   :  { %172 = vadd.xlane.f32.xlu0 %v171_v24  ;;  %188 = vadd.xlane.f32.xlu1 %v187_v25 }
  0xb9   :  { %185 = vadd.xlane.f32.xlu0 %v184_v27 }
 0x13a   :  { %v167_v34 = vpop.xlane.xlu1 %166 }
 0x13b   :  { %v190_v37 = vmul.f32 %v4548_v33, %v167_v34 }
 0x13d   :  { %v194_v42 = vsel %vm193_vm4, %v190_v37, 0.0 }
 0x13e   :  { %v170_v36 = vpop.xlane.xlu0 %169  ;;  %v183_v50 = vpop.xlane.xlu1 %182 }
 0x13f   :  { %v191_v38 = vmul.f32 %v4551_v35, %v170_v36 }
 0x141   :  { %v195_v40 = vsel %vm193_vm4, %v191_v38, 0.0 }
 0x142   :  { %v173_v41 = vpop.xlane.xlu0 %172  ;;  %v196_v44 = vadd.f32 %v195_v40, %v194_v42  ;;  %v189_v54 = vpop.xlane.xlu1 %188 }
 0x143   :  { %v192_v43 = vmul.f32 %v4558_v39, %v173_v41 }
 0x145   :  { %v197_v45 = vsel %vm193_vm4, %v192_v43, 0.0  ;;  %v5505_v43 = vmov 2  }
 0x146   :  { %v198_v46 = vadd.f32 %v197_v45, %v196_v44  ;;  %v186_v55 = vpop.xlane.xlu0 %185 }
 0x148   :  { %v199_v47 = vrot.slane %v198_v46, 4 }
 0x14a   :  { %v200_v48 = vadd.f32 %v199_v47, %v198_v46  ;;  %v5503_v47 = vmov 3  }
 0x14c   :  { %v201_v49 = vrot.slane %v200_v48, 2 }
 0x14e   :  { %v202_v51 = vadd.f32 %v201_v49, %v200_v48  ;;  %v438_v48 = vld [vmem:[#allocation2 + $0x8] sm:$0xff]  ;;  %v441_v49 = vld [vmem:[#allocation2 + $0x20] sm:$0xff] }
 0x150   :  { %v203_v52 = vrot.slane %v202_v51, 1 }
 0x152   :  { %v204_v53 = vadd.f32 %v203_v52, %v202_v51  ;;  %v437_v51 = vld [vmem:[#allocation2] sm:$0xff]  ;;  %v440_v52 = vld [vmem:[#allocation2 + $0x18] sm:$0xff] }
 0x154   :  { %v207_v56 = vadd.f32 %v204_v53, %v189_v54  ;;  %v206_v57 = vadd.f32 %v204_v53, %v186_v55  ;;  %v205_v58 = vadd.f32 %v204_v53, %v183_v50  ;;  %v4592_v50 = vpack.c.bf16 %v441_v49, %v438_v48  ;;  %v439_v54 = vld [vmem:[#allocation2 + $0x10] sm:$0xff]  ;;  %v442_v55 = vld [vmem:[#allocation2 + $0x28] sm:$0xff]  ;;  %v469_v49 = vld [vmem:[#allocation2 + $0x100] sm:$0xff] }
 0x155   :  { %v4596_v53 = vpack.c.bf16 %v440_v52, %v437_v51  ;;  %v472_v51 = vld [vmem:[#allocation2 + $0x118] sm:$0xff] }
 0x156   :  { %vm209_vm5 = vcmp.ge.f32.partialorder %v206_v57, 0.0  ;;  %v212_v59 = vmul.f32 0.01, %v206_v57  ;;  %vm208_vm6 = vcmp.ge.f32.partialorder %v205_v58, 0.0  ;;  %v211_v60 = vmul.f32 0.01, %v205_v58  ;;  %3770 = vmatprep.subr.bf16.mxu1 %v4592_v50 }
 0x157   :  { %vm210_vm7 = vcmp.ge.f32.partialorder %v207_v56, 0.0  ;;  %v213_v61 = vmul.f32 0.01, %v207_v56  ;;  %v4656_v52 = vpack.c.bf16 %v472_v51, %v469_v49  ;;  %v69_v49 = vmul.u32 4, %v4545_v32 }
 0x158   :  { %v215_v62 = vsel %vm209_vm5, %v206_v57, %v212_v59  ;;  %v214_v63 = vsel %vm208_vm6, %v205_v58, %v211_v60  ;;  %v444_v57 = vld [vmem:[#allocation2 + $0x38] sm:$0xff]  ;;  %v447_v58 = vld [vmem:[#allocation2 + $0x50] sm:$0xff] }
 0x159   :  { %v220_v1 = vsel %vm193_vm4, %v215_v62, -inf  ;;  %v217_v2 = vsel %vm193_vm4, %v214_v63, -inf  ;;  %v216_v3 = vsel %vm210_vm7, %v207_v56, %v213_v61  ;;  %v4599_v56 = vpack.c.bf16 %v442_v55, %v439_v54  ;;  %v443_v60 = vld [vmem:[#allocation2 + $0x30] sm:$0xff]  ;;  %v446_v61 = vld [vmem:[#allocation2 + $0x48] sm:$0xff]  ;;  %v477_v55 = vld [vmem:[#allocation2 + $0x140] sm:$0xff] }
 0x15a   :  { %221 = vmax.xlane.f32.xlu1 %v220_v1  ;;  %218 = vmax.xlane.f32.xlu0 %v217_v2  ;;  %v223_v6 = vsel %vm193_vm4, %v216_v3, -inf  ;;  %v4603_v59 = vpack.c.bf16 %v447_v58, %v444_v57  ;;  %v448_v1 = vld [vmem:[#allocation2 + $0x58] sm:$0xff]  ;;  %v474_v54 = vld [vmem:[#allocation2 + $0x128] sm:$0xff]  ;;  %v473_v58 = vld [vmem:[#allocation2 + $0x120] sm:$0xff]  ;;  %vm72_vm11 = vcmp.eq.s32.totalorder %v4535_v30, %v69_v49 }
 0x15b   :  { %3803 = vmatpush3.bf16.msra.mxu0 %v4599_v56  ;;  %v4660_v57 = vpack.c.bf16 %v477_v55, %v474_v54 }
 0x15c   :  { %3804 = vmatprep.subr.bf16.mxu0 %v5509_v4 }
 0x15d   :  { %5604 = vst [vmem:[#allocation12_spill] sm:$0xff] %v4660_v57 }
 0x15e   :  { %224 = vmax.xlane.f32.xlu0 %v223_v6  ;;  %v453_v6 = vld [vmem:[#allocation2 + $0x80] sm:$0xff] }
 0x1e7   :  { %v219_v7 = vpop.xlane.xlu0 %218  ;;  %v222_v8 = vpop.xlane.xlu1 %221 }
 0x1e8   :  { %v226_v9 = vsub.f32 %v214_v63, %v219_v7  ;;  %v227_v10 = vsub.f32 %v215_v62, %v222_v8  ;;  %v4606_v62 = vpack.c.bf16 %v446_v61, %v443_v60  ;;  %v445_v63 = vld [vmem:[#allocation2 + $0x40] sm:$0xff]  ;;  %v476_v60 = vld [vmem:[#allocation2 + $0x138] sm:$0xff] }
 0x1e9   :  { %v4611_v2 = vpack.c.bf16 %v448_v1, %v445_v63  ;;  %v449_v8 = vld [vmem:[#allocation2 + $0x60] sm:$0xff]  ;;  %v4662_v61 = vpack.c.bf16 %v476_v60, %v473_v58  ;;  %v475_v63 = vld [vmem:[#allocation2 + $0x130] sm:$0xff]  ;;  %v478_v1 = vld [vmem:[#allocation2 + $0x148] sm:$0xff] }
 0x1ea   :  { %v229_v11 = vmul.f32 1.442695, %v226_v9  ;;  %v231_v12 = vmul.f32 1.442695, %v227_v10  ;;  %v452_v9 = vld [vmem:[#allocation2 + $0x78] sm:$0xff] }
 0x1eb   :  { %v225_v13 = vpop.xlane.xlu0 %224  ;;  %3806 = vmatpush3.bf16.msra.mxu0 %v4611_v2  ;;  %v4617_v10 = vpack.c.bf16 %v452_v9, %v449_v8  ;;  %5605 = vst [vmem:[#allocation13_spill] sm:$0xff] %v4662_v61  ;;  %v483_v8 = vld [vmem:[#allocation2 + $0x170] sm:$0xff] }
 0x1ec   :  { %4238 = vpow2.f32 %v229_v11  ;;  %v228_v14 = vsub.f32 %v216_v3, %v225_v13  ;;  %v450_v3 = vld [vmem:[#allocation2 + $0x68] sm:$0xff]  ;;  %3807 = vmatprep.subr.bf16.mxu0 %v5509_v4  ;;  %v451_v11 = vld [vmem:[#allocation2 + $0x70] sm:$0xff] }
 0x1ed   :  { %4240 = vpow2.f32 %v231_v12  ;;  %v4615_v7 = vpack.c.bf16 %v453_v6, %v450_v3  ;;  %v454_v12 = vld [vmem:[#allocation2 + $0x88] sm:$0xff]  ;;  %v4666_v3 = vpack.c.bf16 %v478_v1, %v475_v63  ;;  %v480_v6 = vld [vmem:[#allocation2 + $0x158] sm:$0xff] }
 0x1ee   :  { %v233_v15 = vmul.f32 1.442695, %v228_v14  ;;  %v4622_v13 = vpack.c.bf16 %v454_v12, %v451_v11  ;;  %v456_v14 = vld [vmem:[#allocation2 + $0x98] sm:$0xff]  ;;  %v4670_v9 = vpack.c.bf16 %v483_v8, %v480_v6  ;;  %v479_v11 = vld [vmem:[#allocation2 + $0x150] sm:$0xff]  ;;  %v482_v12 = vld [vmem:[#allocation2 + $0x168] sm:$0xff]  ;;  %v4709_v8 = vsel %vm72_vm11, 1.0, %v5515_v23 }
 0x1f0   :  { %4242 = vpow2.f32 %v233_v15  ;;  %v459_v15 = vld [vmem:[#allocation2 + $0xb0] sm:$0xff]  ;;  %3809 = vmatpush3.bf16.msra.mxu0 %v4622_v13  ;;  %5606 = vst [vmem:[#allocation14_spill] sm:$0xff] %v4670_v9 }
 0x1f1   :  { %3810 = vmatprep.subr.bf16.mxu0 %v5509_v4 }
 0x1f6   :  { %v4239_v16 = vpop.eup %4238 }
 0x1f7   :  { %v4241_v17 = vpop.eup %4240  ;;  %v235_v18 = vsel %vm193_vm4, %v4239_v16, 0.0 }
 0x1f8   :  { %236 = vadd.xlane.f32.xlu1 %v235_v18  ;;  %v238_v19 = vsel %vm193_vm4, %v4241_v17, 0.0  ;;  %v458_v18 = vld [vmem:[#allocation2 + $0xa8] sm:$0xff] }
 0x1f9   :  { %239 = vadd.xlane.f32.xlu0 %v238_v19 }
 0x1fa   :  { %v4243_v20 = vpop.eup %4242 }
 0x1fb   :  { %v241_v21 = vsel %vm193_vm4, %v4243_v20, 0.0 }
 0x1fc   :  { %242 = vadd.xlane.f32.xlu1 %v241_v21  ;;  %v460_v21 = vld [vmem:[#allocation2 + $0xb8] sm:$0xff] }
 0x285   :  { %v237_v24 = vpop.xlane.xlu1 %236 }
 0x286   :  { %v240_v25 = vpop.xlane.xlu0 %239  ;;  %4244 = vrcp.f32 %v237_v24 }
 0x287   :  { %4246 = vrcp.f32 %v240_v25  ;;  %v462_v25 = vld [vmem:[#allocation2 + $0xc8] sm:$0xff] }
 0x289   :  { %v243_v26 = vpop.xlane.xlu1 %242 }
 0x28a   :  { %4248 = vrcp.f32 %v243_v26  ;;  %v465_v26 = vld [vmem:[#allocation2 + $0xe0] sm:$0xff] }
 0x290   :  { %v4245_v27 = vpop.eup %4244 }
 0x291   :  { %v247_v28 = vmul.f32 %v4245_v27, %v4239_v16  ;;  %v4247_v34 = vpop.eup %4246  ;;  %v4627_v16 = vpack.c.bf16 %v459_v15, %v456_v14  ;;  %v4639_v27 = vpack.c.bf16 %v465_v26, %v462_v25  ;;  %v4672_v14 = vpack.c.bf16 %v482_v12, %v479_v11  ;;  %v481_v15 = vld [vmem:[#allocation2 + $0x160] sm:$0xff]  ;;  %v3252_v26 = vld [vmem:[%s5494_s0 + $0x18] sm:$0xff] }
 0x292   :  { %v248_v36 = vmul.f32 %v4247_v34, %v4241_v17  ;;  %v455_v17 = vld [vmem:[#allocation2 + $0x90] sm:$0xff]  ;;  %v464_v34 = vld [vmem:[#allocation2 + $0xd8] sm:$0xff] }
 0x293   :  { %3438 = vmatmul.mubr.msk.f32.vlgmr.msra.gmra.mrb[0].mxu1 %vm193_vm4, %v247_v28  ;;  %v4629_v19 = vpack.c.bf16 %v458_v18, %v455_v17  ;;  %v461_v28 = vld [vmem:[#allocation2 + $0xc0] sm:$0xff]  ;;  %5607 = vst [vmem:[#allocation15_spill] sm:$0xff] %v4672_v14  ;;  %v484_v17 = vld [vmem:[#allocation2 + $0x178] sm:$0xff] }
 0x294   :  { %3440 = vmatprep.mubr.msk.f32.mxu1 %vm4435_vm8, %v5515_v23  ;;  %v4249_v37 = vpop.eup %4248  ;;  %3772 = vmatpush1.bf16.msra.mxu1 %v4596_v53  ;;  %v4676_v18 = vpack.c.bf16 %v484_v17, %v481_v15  ;;  %v93_v17 = vadd.s32 2, %v69_v49 }
 0x295   :  { %v249_v38 = vmul.f32 %v4249_v37, %v4243_v20  ;;  %3774 = vmatprep.subr.bf16.mxu1 %v4603_v59  ;;  %v457_v20 = vld [vmem:[#allocation2 + $0xa0] sm:$0xff]  ;;  %v463_v37 = vld [vmem:[#allocation2 + $0xd0] sm:$0xff] }
 0x296   :  { %v4633_v24 = vpack.c.bf16 %v460_v21, %v457_v20  ;;  %v643_v20 = vld [vmem:[#allocation5 + $0x8] sm:$0xff]  ;;  %v646_v21 = vld [vmem:[#allocation5 + $0x20] sm:$0xff]  ;;  %vm96_vm3 = vcmp.eq.s32.totalorder %v4535_v30, %v93_v17 }
 0x297   :  { %3441 = vmatmul.mubr.msk.f32.gmra.mrb[2].mxu1 %vm193_vm4, %v248_v36  ;;  %v4641_v36 = vpack.c.bf16 %v464_v34, %v461_v28  ;;  %v4680_v25 = vpack.c.bf16 %v646_v21, %v643_v20  ;;  %v3253_v28 = vld [vmem:[%s5494_s0 + $0x20] sm:$0xff]  ;;  %v3254_v34 = vld [vmem:[%s5494_s0 + $0x28] sm:$0xff] }
 0x298   :  { %3443 = vmatprep.mubr.msk.f32.mxu1 %vm4435_vm8, %v5515_v23  ;;  %3776 = vmatpush1.bf16.msra.mxu1 %v4606_v62 }
 0x299   :  { %3778 = vmatprep.subr.bf16.mxu1 %v4615_v7  ;;  %3812 = vmatpush3.bf16.msra.mxu0 %v4633_v24  ;;  %5608 = vst [vmem:[#allocation16_spill] sm:$0xff] %v4680_v25 }
 0x29a   :  { %3813 = vmatprep.subr.bf16.mxu0 %v5509_v4 }
 0x29b   :  { %3444 = vmatmul.mubr.msk.f32.gmra.mrb[4].mxu1 %vm193_vm4, %v249_v38  ;;  %v466_v38 = vld [vmem:[#allocation2 + $0xe8] sm:$0xff] }
 0x29c   :  { %565 = vmatprep.mubr.f32.mxu1 %v5515_v23  ;;  %3780 = vmatpush1.bf16.msra.mxu1 %v4617_v10 }
 0x29d   :  { %3782 = vmatprep.subr.bf16.mxu1 %v4627_v16 }
 0x2a0   :  { %3784 = vmatpush1.bf16.msra.mxu1 %v4629_v19 }
 0x2a1   :  { %3786 = vmatprep.subr.bf16.mxu1 %v4639_v27 }
 0x2a4   :  { %3788 = vmatpush1.bf16.msra.mxu1 %v4641_v36 }
 0x366   :  { %v325_v40 = vpop.f32.mrb[0].mxu1 }
 0x367   :  { %366 = vperm.xlu1 %4176, %v325_v40   ;;  %341 = vperm.xlu0 %4174, %v325_v40   ;;  %v3439_v41 = vpop.f32.mrb[1].mxu1 }
 0x368   :  { %v468_v41 = vld [vmem:[#allocation2 + $0xf8] sm:$0xff] }
 0x36a   :  { %v330_v42 = vpop.f32.mrb[2].mxu1 }
 0x36b   :  { %4178 = vset.pattern.permute.xlu1 %v5501_v0  ;;  %4177 = vset.pattern.permute.xlu0 %v5505_v43  ;;  %v3442_v44 = vpop.f32.mrb[3].mxu1 }
 0x36c   :  { %390 = vperm.xlu0 %4177, %v325_v40   ;;  %346 = vperm.xlu1 %4178, %v330_v42  }
 0x36e   :  { %v4585_v45 = vpop.f32.mrb[4].mxu1 }
 0x36f   :  { %v3445_v46 = vpop.f32.mrb[5].mxu1 }
 0x370   :  { %4179 = vset.pattern.permute.xlu0 %v5507_v22  ;;  %4181 = vset.pattern.permute.xlu1 %v5505_v43  ;;  %v470_v46 = vld [vmem:[#allocation2 + $0x108] sm:$0xff] }
 0x371   :  { %370 = vperm.xlu0 %4179, %v330_v42   ;;  %394 = vperm.xlu1 %4181, %v330_v42  }
 0x375   :  { %4180 = vset.pattern.permute.xlu0 %v5503_v47  ;;  %4182 = vset.pattern.permute.xlu1 %v5503_v47 }
 0x376   :  { %414 = vperm.xlu0 %4180, %v325_v40   ;;  %418 = vperm.xlu1 %4182, %v330_v42   ;;  %v4645_v40 = vpack.c.bf16 %v466_v38, %v463_v37  ;;  %v471_v42 = vld [vmem:[#allocation2 + $0x110] sm:$0xff] }
 0x377   :  { %v4649_v44 = vpack.c.bf16 %v471_v42, %v468_v41  ;;  %v68_v41 = vmul.u32 4, %v4538_v31  ;;  %v81_v31 = vadd.s32 1, %v69_v49 }
 0x378   :  { %3815 = vmatpush3.bf16.msra.mxu0 %v4645_v40 }
 0x379   :  { %3816 = vmatprep.subr.bf16.mxu0 %v5509_v4  ;;  %3790 = vmatprep.subr.bf16.mxu1 %v4649_v44  ;;  %vm71_vm9 = vcmp.eq.s32.totalorder %v4535_v30, %v68_v41  ;;  %v80_v51 = vadd.s32 1, %v68_v41  ;;  %v92_v32 = vadd.s32 2, %v68_v41  ;;  %vm84_vm14 = vcmp.eq.s32.totalorder %v4535_v30, %v81_v31 }
 0x37a   :  { %4183 = vset.pattern.permute.xlu1 %v5501_v0  ;;  %4187 = vset.pattern.permute.xlu0 %v5501_v0  ;;  %v4699_v58 = vsel %vm71_vm9, 1.0, %v5515_v23  ;;  %v105_v31 = vadd.s32 3, %v69_v49 }
 0x37b   :  { %351 = vperm.xlu1 %4183, %v4585_v45   ;;  %1229 = vperm.xlu0 %4187, %v3252_v26   ;;  %vm83_vm12 = vcmp.eq.s32.totalorder %v4535_v30, %v80_v51  ;;  %vm95_vm15 = vcmp.eq.s32.totalorder %v4535_v30, %v92_v32 }
 0x37c   :  { %3818 = vmatpush3.bf16.msra.mxu0 %v4656_v52  ;;  %v4713_v12 = vsel %vm83_vm12, 1.0, %v5515_v23  ;;  %vm108_vm6 = vcmp.eq.s32.totalorder %v4535_v30, %v105_v31 }
 0x37d   :  { %3819 = vmatprep.subr.bf16.mxu0 %v5509_v4 }
 0x37f   :  { %4184 = vset.pattern.permute.xlu1 %v5507_v22 }
 0x380   :  { %374 = vperm.xlu1 %4184, %v4585_v45   ;;  %3821 = vmatpush3.bf16.msra.mxu0 %v4666_v3 }
 0x381   :  { %3822 = vmatprep.subr.bf16.mxu0 %v5509_v4 }
 0x384   :  { %4185 = vset.pattern.permute.xlu1 %v5505_v43  ;;  %3824 = vmatpush3.bf16.msra.mxu0 %v4676_v18 }
 0x385   :  { %398 = vperm.xlu1 %4185, %v4585_v45   ;;  %3857 = vmatprep.subr.bf16.mxu0 %v5509_v4 }
 0x389   :  { %4186 = vset.pattern.permute.xlu1 %v5503_v47  ;;  %v4728_v47 = vsel %vm95_vm15, 1.0, %v5515_v23 }
 0x38a   :  { %422 = vperm.xlu1 %4186, %v4585_v45   ;;  %v467_v45 = vld [vmem:[#allocation2 + $0xf0] sm:$0xff]  ;;  %5611 = vst [vmem:[#allocation19_spill] sm:$0xff] %v4728_v47 }
 0x38b   :  { %v4652_v48 = vpack.c.bf16 %v470_v46, %v467_v45  ;;  %v67_v45 = vmul.u32 4, %v4533_v29 }
 0x38d   :  { %5603 = vst [vmem:[#allocation11_spill] sm:$0xff] %v4652_v48  ;;  %3792 = vmatpush1.bf16.msra.mxu1 %v4652_v48  ;;  %vm70_vm10 = vcmp.eq.s32.totalorder %v4535_v30, %v67_v45  ;;  %v79_v54 = vadd.s32 1, %v67_v45  ;;  %v91_v6 = vadd.s32 2, %v67_v45  ;;  %v642_v48 = vld [vmem:[#allocation5] sm:$0xff] }
 0x38e   :  { %4188 = vset.pattern.permute.xlu1 %v5501_v0  ;;  %3794 = vmatprep.subr.bf16.mxu1 %v4660_v57  ;;  %v4703_v63 = vsel %vm70_vm10, 1.0, %v5515_v23 }
 0x38f   :  { %1234 = vperm.xlu1 %4188, %v3253_v28   ;;  %vm82_vm13 = vcmp.eq.s32.totalorder %v4535_v30, %v79_v54  ;;  %v103_v28 = vadd.s32 3, %v67_v45  ;;  %vm94_vm1 = vcmp.eq.s32.totalorder %v4535_v30, %v91_v6  ;;  %v4724_v54 = vsel %vm84_vm14, 1.0, %v5515_v23 }
 0x390   :  { %v4716_v20 = vsel %vm82_vm13, 1.0, %v5515_v23  ;;  %5610 = vst [vmem:[#allocation18_spill] sm:$0xff] %v4724_v54  ;;  %v4731_v32 = vsel %vm94_vm1, 1.0, %v5515_v23 }
 0x391   :  { %3796 = vmatpush1.bf16.msra.mxu1 %v4662_v61  ;;  %5609 = vst [vmem:[#allocation17_spill] sm:$0xff] %v4716_v20  ;;  %5612 = vst [vmem:[#allocation20_spill] sm:$0xff] %v4731_v32  ;;  %vm106_vm2 = vcmp.eq.s32.totalorder %v4535_v30, %v103_v28 }
 0x392   :  { %3798 = vmatprep.subr.bf16.mxu1 %v4670_v9 }
 0x393   :  { %1239 = vperm.xlu1 %4188, %v3254_v34  }
 0x395   :  { %3800 = vmatpush1.bf16.msra.mxu1 %v4672_v14 }
 0x396   :  { %3826 = vmatprep.subr.bf16.mxu1 %v4680_v25 }
 0x3e6   :  { %v367_v37 = vpop.permute.xlu1 %366  ;;  %v342_v42 = vpop.permute.xlu0 %341 }
 0x3e7   :  { %v354_v11 = vmul.f32 %v4703_v63, %v342_v42  ;;  %v377_v0 = vmul.f32 %v4716_v20, %v367_v37 }
 0x3eb   :  { %v347_v38 = vpop.permute.xlu1 %346  ;;  %v391_v55 = vpop.permute.xlu0 %390 }
 0x3ec   :  { %v355_v1 = vmul.f32 %v4699_v58, %v347_v38  ;;  %v104_v38 = vadd.s32 3, %v68_v41  ;;  %v401_v49 = vmul.f32 %v4731_v32, %v391_v55 }
 0x3ee   :  { %v357_v26 = vadd.f32 %v355_v1, %v354_v11  ;;  %vm107_vm5 = vcmp.eq.s32.totalorder %v4535_v30, %v104_v38 }
 0x3ef   :  { %v4746_v17 = vsel %vm107_vm5, 1.0, %v5515_v23 }
 0x3f0   :  { %v395_v46 = vpop.permute.xlu1 %394  ;;  %v371_v15 = vpop.permute.xlu0 %370  ;;  %5615 = vst [vmem:[#allocation23_spill] sm:$0xff] %v4746_v17 }
 0x3f1   :  { %v378_v42 = vmul.f32 %v4713_v12, %v371_v15  ;;  %v402_v37 = vmul.f32 %v4728_v47, %v395_v46  ;;  %v4739_v15 = vsel %vm96_vm3, 1.0, %v5515_v23 }
 0x3f2   :  { %5613 = vst [vmem:[#allocation21_spill] sm:$0xff] %v4739_v15 }
 0x3f3   :  { %v380_v45 = vadd.f32 %v378_v42, %v377_v0  ;;  %v404_v38 = vadd.f32 %v402_v37, %v401_v49 }
 0x3f5   :  { %v419_v60 = vpop.permute.xlu1 %418 }
 0x3fa   :  { %v352_v21 = vpop.permute.xlu1 %351 }
 0x3fb   :  { %v356_v34 = vmul.f32 %v4709_v8, %v352_v21  ;;  %v4743_v21 = vsel %vm106_vm2, 1.0, %v5515_v23 }
 0x3fc   :  { %5614 = vst [vmem:[#allocation22_spill] sm:$0xff] %v4743_v21 }
 0x3fd   :  { %v358_v51 = vadd.f32 %v357_v26, %v356_v34  ;;  %v415_v26 = vpop.permute.xlu0 %414 }
 0x3fe   :  { %v425_v42 = vmul.f32 %v4743_v21, %v415_v26 }
 0x3ff   :  { %v375_v41 = vpop.permute.xlu1 %374  ;;  %v359_v1 = vrot.slane %v358_v51, 4 }
 0x400   :  { %v379_v6 = vmul.f32 %v4724_v54, %v375_v41  ;;  %v426_v41 = vmul.f32 %v4746_v17, %v419_v60 }
 0x401   :  { %v360_v0 = vadd.f32 %v359_v1, %v358_v51 }
 0x402   :  { %v381_v11 = vadd.f32 %v380_v45, %v379_v6  ;;  %v4753_v6 = vsel %vm108_vm6, 1.0, %v5515_v23  ;;  %v428_v1 = vadd.f32 %v426_v41, %v425_v42  ;;  %v645_v41 = vld [vmem:[#allocation5 + $0x18] sm:$0xff] }
 0x403   :  { %5616 = vst [vmem:[#allocation24_spill] sm:$0xff] %v4753_v6  ;;  %v361_v43 = vrot.slane %v360_v0, 2 }
 0x404   :  { %v382_v28 = vrot.slane %v381_v11, 4  ;;  %v399_v34 = vpop.permute.xlu1 %398 }
 0x405   :  { %v403_v46 = vmul.f32 %v4739_v15, %v399_v34  ;;  %v362_v37 = vadd.f32 %v361_v43, %v360_v0  ;;  %v649_v43 = vld [vmem:[#allocation5 + $0x38] sm:$0xff]  ;;  %v652_v0 = vld [vmem:[#allocation5 + $0x50] sm:$0xff] }
 0x406   :  { %v383_v55 = vadd.f32 %v382_v28, %v381_v11 }
 0x407   :  { %v405_v45 = vadd.f32 %v404_v38, %v403_v46  ;;  %v363_v11 = vrot.slane %v362_v37, 1 }
 0x408   :  { %v384_v22 = vrot.slane %v383_v55, 2 }
 0x409   :  { %v406_v4 = vrot.slane %v405_v45, 4  ;;  %v423_v51 = vpop.permute.xlu1 %422  ;;  %v364_v9 = vadd.f32 %v363_v11, %v362_v37  ;;  %v651_v37 = vld [vmem:[#allocation5 + $0x48] sm:$0xff]  ;;  %v5623_v11 = vmov 0.0|0.0  }
 0x40a   :  { %v385_v25 = vadd.f32 %v384_v22, %v383_v55  ;;  %v427_v30 = vmul.f32 %v4753_v6, %v423_v51  ;;  %v644_v55 = vld [vmem:[#allocation5 + $0x10] sm:$0xff] }
 0x40b   :  { %v407_v31 = vadd.f32 %v406_v4, %v405_v45  ;;  %v647_v4 = vld [vmem:[#allocation5 + $0x28] sm:$0xff] }
 0x40c   :  { %v429_v49 = vadd.f32 %v428_v1, %v427_v30  ;;  %v386_v26 = vrot.slane %v385_v25, 1  ;;  %v4756_v1 = vpack.c.bf16 %v645_v41, %v642_v48  ;;  %v648_v30 = vld [vmem:[#allocation5 + $0x30] sm:$0xff] }
 0x40d   :  { %v408_v34 = vrot.slane %v407_v31, 2 }
 0x40e   :  { %v430_v14 = vrot.slane %v429_v49, 4  ;;  %v387_v46 = vadd.f32 %v386_v26, %v385_v25  ;;  %5617 = vst [vmem:[#allocation25_spill] sm:$0xff] %v4756_v1  ;;  %v4763_v26 = vpack.c.bf16 %v651_v37, %v648_v30  ;;  %v667_v30 = vld [vmem:[#allocation5 + $0xc8] sm:$0xff] }
 0x40f   :  { %v409_v60 = vadd.f32 %v408_v34, %v407_v31  ;;  %v4760_v31 = vpack.c.bf16 %v652_v0, %v649_v43  ;;  %v658_v34 = vld [vmem:[#allocation5 + $0x80] sm:$0xff]  ;;  %v663_v0 = vld [vmem:[#allocation5 + $0xa8] sm:$0xff] }
 0x410   :  { %v431_v28 = vadd.f32 %v430_v14, %v429_v49  ;;  %v388_v42 = vadd.f32 %v387_v46, %v364_v9  ;;  %v4758_v14 = vpack.c.bf16 %v647_v4, %v644_v55  ;;  %v653_v49 = vld [vmem:[#allocation5 + $0x58] sm:$0xff]  ;;  %v655_v9 = vld [vmem:[#allocation5 + $0x68] sm:$0xff]  ;;  %5620 = vst [vmem:[#allocation28_spill] sm:$0xff] %v4763_v26  ;;  %v660_v55 = vld [vmem:[#allocation5 + $0x90] sm:$0xff] }
 0x411   :  { %v410_v38 = vrot.slane %v409_v60, 1  ;;  %5619 = vst [vmem:[#allocation27_spill] sm:$0xff] %v4760_v31  ;;  %v661_v46 = vld [vmem:[#allocation5 + $0x98] sm:$0xff]  ;;  %v4786_v37 = vpack.c.bf16 %v663_v0, %v660_v55 }
 0x412   :  { %v432_v23 = vrot.slane %v431_v28, 2  ;;  %5618 = vst [vmem:[#allocation26_spill] sm:$0xff] %v4758_v14 }
 0x413   :  { %v411_v61 = vadd.f32 %v410_v38, %v409_v60  ;;  %v657_v60 = vld [vmem:[#allocation5 + $0x78] sm:$0xff]  ;;  %v659_v38 = vld [vmem:[#allocation5 + $0x88] sm:$0xff]  ;;  %5628 = vst [vmem:[#allocation34_spill] sm:$0xff] %v4786_v37 }
 0x414   :  { %v433_v57 = vadd.f32 %v432_v23, %v431_v28  ;;  %v650_v23 = vld [vmem:[#allocation5 + $0x40] sm:$0xff]  ;;  %v656_v28 = vld [vmem:[#allocation5 + $0x70] sm:$0xff] }
 0x415   :  { %v412_v45 = vadd.f32 %v411_v61, %v388_v42  ;;  %v4766_v48 = vpack.c.bf16 %v653_v49, %v650_v23  ;;  %v4769_v61 = vpack.c.bf16 %v658_v34, %v655_v9  ;;  %v664_v42 = vld [vmem:[#allocation5 + $0xb0] sm:$0xff]  ;;  %v4779_v4 = vpack.c.bf16 %v659_v38, %v656_v28  ;;  %v666_v23 = vld [vmem:[#allocation5 + $0xc0] sm:$0xff]  ;;  %v669_v34 = vld [vmem:[#allocation5 + $0xd8] sm:$0xff] }
 0x416   :  { %v434_v22 = vrot.slane %v433_v57, 1  ;;  %v4782_v43 = vpack.c.bf16 %v664_v42, %v661_v46  ;;  %v673_v28 = vld [vmem:[#allocation5 + $0xf8] sm:$0xff]  ;;  %v676_v38 = vld [vmem:[#allocation5 + $0x110] sm:$0xff]  ;;  %v4796_v46 = vpack.c.bf16 %v669_v34, %v666_v23  ;;  %v678_v34 = vld [vmem:[#allocation5 + $0x120] sm:$0xff] }
 0x417   :  { %5621 = vst [vmem:[#allocation29_spill] sm:$0xff] %v4766_v48  ;;  %5622 = vst [vmem:[#allocation30_spill] sm:$0xff] %v4769_v61  ;;  %v672_v42 = vld [vmem:[#allocation5 + $0xf0] sm:$0xff]  ;;  %v4802_v0 = vpack.c.bf16 %v676_v38, %v673_v28  ;;  %v681_v28 = vld [vmem:[#allocation5 + $0x138] sm:$0xff] }
 0x418   :  { %v435_v51 = vadd.f32 %v434_v22, %v433_v57  ;;  %v654_v57 = vld [vmem:[#allocation5 + $0x60] sm:$0xff]  ;;  %v5624_v22 = vmov 0.0   ;;  %5626 = vst [vmem:[#allocation32_spill] sm:$0xff] %v4779_v4  ;;  %5627 = vst [vmem:[#allocation33_spill] sm:$0xff] %v4782_v43  ;;  %v680_v38 = vld [vmem:[#allocation5 + $0x130] sm:$0xff] }
 0x419   :  { %v4776_v41 = vpack.c.bf16 %v657_v60, %v654_v57  ;;  %v668_v57 = vld [vmem:[#allocation5 + $0xd0] sm:$0xff]  ;;  %v671_v60 = vld [vmem:[#allocation5 + $0xe8] sm:$0xff]  ;;  %5631 = vst [vmem:[#allocation37_spill] sm:$0xff] %v4796_v46  ;;  %5633 = vst [vmem:[#allocation39_spill] sm:$0xff] %v4802_v0 }
 0x41a   :  { %v436_v25 = vadd.f32 %v435_v51, %v412_v45  ;;  %v662_v45 = vld [vmem:[#allocation5 + $0xa0] sm:$0xff]  ;;  %v665_v51 = vld [vmem:[#allocation5 + $0xb8] sm:$0xff]  ;;  %v4799_v55 = vpack.c.bf16 %v671_v60, %v668_v57 }
 0x41b   :  { %5625 = vst [vmem:[#allocation31_spill] sm:$0xff] %v4776_v41  ;;  %v4789_v49 = vpack.c.bf16 %v665_v51, %v662_v45  ;;  %v675_v45 = vld [vmem:[#allocation5 + $0x108] sm:$0xff]  ;;  %v674_v51 = vld [vmem:[#allocation5 + $0x100] sm:$0xff] }
 0x41c   :  { %566 = vmatmul.mubr.f32.vlgmr.msra.gmra.mrb[6].mxu1 %v436_v25  ;;  %3479 = vmatmul.mubr.f32.vlgmr.msra.gmra.mrb[0].mxu0 %v436_v25  ;;  %v670_v25 = vld [vmem:[#allocation5 + $0xe0] sm:$0xff]  ;;  %5632 = vst [vmem:[#allocation38_spill] sm:$0xff] %v4799_v55  ;;  %v4806_v23 = vpack.c.bf16 %v675_v45, %v672_v42  ;;  %v4816_v42 = vpack.c.bf16 %v681_v28, %v678_v34  ;;  %v684_v45 = vld [vmem:[#allocation5 + $0x150] sm:$0xff] }
 0x41d   :  { %3828 = vmatpush1.bf16.msra.mxu1 %v4756_v1  ;;  %3859 = vmatpush3.bf16.msra.mxu0 %v4758_v14  ;;  %5629 = vst [vmem:[#allocation35_spill] sm:$0xff] %v4789_v49  ;;  %v4792_v9 = vpack.c.bf16 %v670_v25, %v667_v30  ;;  %v677_v30 = vld [vmem:[#allocation5 + $0x118] sm:$0xff]  ;;  %v679_v25 = vld [vmem:[#allocation5 + $0x128] sm:$0xff] }
 0x41e   :  { %3830 = vmatprep.subr.bf16.mxu1 %v4760_v31  ;;  %3860 = vmatprep.subr.bf16.mxu0 %v5623_v11  ;;  %5634 = vst [vmem:[#allocation40_spill] sm:$0xff] %v4806_v23  ;;  %v4809_v57 = vpack.c.bf16 %v677_v30, %v674_v51  ;;  %5637 = vst [vmem:[#allocation43_spill] sm:$0xff] %v4816_v42  ;;  %v687_v30 = vld [vmem:[#allocation5 + $0x168] sm:$0xff] }
 0x41f   :  { %770 = vmatprep.mubr.f32.mxu1 %v5624_v22  ;;  %3513 = vmatprep.mubr.msk.f32.mxu0 %vm4435_vm8, %v5624_v22  ;;  %5630 = vst [vmem:[#allocation36_spill] sm:$0xff] %v4792_v9 }
 0x420   :  { %5635 = vst [vmem:[#allocation41_spill] sm:$0xff] %v4809_v57 }
 0x421   :  { %3832 = vmatpush1.bf16.msra.mxu1 %v4763_v26  ;;  %3862 = vmatpush3.bf16.msra.mxu0 %v4766_v48 }
 0x422   :  { %3834 = vmatprep.subr.bf16.mxu1 %v4769_v61  ;;  %3863 = vmatprep.subr.bf16.mxu0 %v5623_v11 }
 0x425   :  { %3836 = vmatpush1.bf16.msra.mxu1 %v4776_v41  ;;  %3865 = vmatpush3.bf16.msra.mxu0 %v4779_v4 }
 0x426   :  { %3838 = vmatprep.subr.bf16.mxu1 %v4782_v43  ;;  %3866 = vmatprep.subr.bf16.mxu0 %v5623_v11  ;;  %v682_v43 = vld [vmem:[#allocation5 + $0x140] sm:$0xff] }
 0x427   :  { %v4812_v60 = vpack.c.bf16 %v682_v43, %v679_v25  ;;  %v686_v25 = vld [vmem:[#allocation5 + $0x160] sm:$0xff] }
 0x429   :  { %3840 = vmatpush1.bf16.msra.mxu1 %v4786_v37  ;;  %3868 = vmatpush3.bf16.msra.mxu0 %v4789_v49  ;;  %5636 = vst [vmem:[#allocation42_spill] sm:$0xff] %v4812_v60  ;;  %v685_v49 = vld [vmem:[#allocation5 + $0x158] sm:$0xff]  ;;  %v688_v37 = vld [vmem:[#allocation5 + $0x170] sm:$0xff] }
 0x42a   :  { %3842 = vmatprep.subr.bf16.mxu1 %v4792_v9  ;;  %3869 = vmatprep.subr.bf16.mxu0 %v5623_v11  ;;  %v683_v9 = vld [vmem:[#allocation5 + $0x148] sm:$0xff]  ;;  %v4822_v43 = vpack.c.bf16 %v688_v37, %v685_v49  ;;  %v1230_v37 = vpop.permute.xlu0 %1229  ;;  %v1235_v49 = vpop.permute.xlu1 %1234 }
 0x42b   :  { %v4819_v51 = vpack.c.bf16 %v683_v9, %v680_v38  ;;  %v4844_v9 = vmul.f32 %v4515_v5, %v1230_v37  ;;  %v4858_v37 = vsub.s32 0, %v4533_v29 }
 0x42c   :  { %5639 = vst [vmem:[#allocation45_spill] sm:$0xff] %v4822_v43 }
 0x42d   :  { %3844 = vmatpush1.bf16.msra.mxu1 %v4796_v46  ;;  %3871 = vmatpush3.bf16.msra.mxu0 %v4799_v55  ;;  %5638 = vst [vmem:[#allocation44_spill] sm:$0xff] %v4819_v51  ;;  %v4826_v55 = vpack.c.bf16 %v687_v30, %v684_v45  ;;  %5642 = vst [vmem:[#allocation48_spill] sm:$0xff] %v4858_v37 }
 0x42e   :  { %3846 = vmatprep.subr.bf16.mxu1 %v4802_v0  ;;  %3872 = vmatprep.subr.bf16.mxu0 %v5623_v11  ;;  %v689_v0 = vld [vmem:[#allocation5 + $0x178] sm:$0xff]  ;;  %v1240_v38 = vpop.permute.xlu1 %1239 }
 0x42f   :  { %5640 = vst [vmem:[#allocation46_spill] sm:$0xff] %v4826_v55  ;;  %v4829_v34 = vpack.c.bf16 %v689_v0, %v686_v25  ;;  %v4847_v0 = vmul.f32 %v4515_v5, %v1235_v49  ;;  %v4853_v45 = vmul.f32 %v4515_v5, %v1240_v38  ;;  %v3234_v49 = vld [vmem:[%s5498_s4 + $0x1] ss:$2 sm:$0x7]  ;;  %v492_v5 = vsub.s32 1, %v4533_v29 }
 0x431   :  { %3848 = vmatpush1.bf16.msra.mxu1 %v4806_v23  ;;  %3874 = vmatpush3.bf16.msra.mxu0 %v4809_v57  ;;  %5641 = vst [vmem:[#allocation47_spill] sm:$0xff] %v4829_v34  ;;  %v3885_v28 = vpack.c.bf16 %v4847_v0, %v4844_v9 }
 0x432   :  { %3850 = vmatprep.subr.bf16.mxu1 %v4812_v60  ;;  %3875 = vmatprep.subr.bf16.mxu0 %v5623_v11 }
 0x435   :  { %3852 = vmatpush1.bf16.msra.mxu1 %v4816_v42  ;;  %3877 = vmatpush3.bf16.msra.mxu0 %v4819_v51 }
 0x436   :  { %3854 = vmatprep.subr.bf16.mxu1 %v4822_v43  ;;  %3878 = vmatprep.subr.bf16.mxu0 %v5623_v11  ;;  %v698_v43 = vrot.slane %v3234_v49, %v492_v5 }
 0x439   :  { %3856 = vmatpush1.bf16.msra.mxu1 %v4826_v55  ;;  %3880 = vmatpush3.bf16.msra.mxu0 %v4829_v34  ;;  %v694_v34 = vrot.slane %v3234_v49, %v4858_v37 }
 0x43a   :  { %3884 = vmatprep.subr.bf16.mxu0 %v5623_v11  ;;  %3881 = vmatprep.subr.bf16.mxu1 %v5623_v11 }
 0x43c   :  { %771 = vmatmul.mubr.f32.vlgmr.msra.gmra.mrb[6].mxu1 %v5624_v22  ;;  %3514 = vmatmul.mubr.f32.vlgmr.msra.gmra.mrb[2].mxu0 %v5624_v22 }
 0x43d   :  { %3537 = vmatprep.mubr.msk.f32.mxu0 %vm4435_vm8, %v5624_v22  ;;  %3522 = vmatprep.mubr.msk.f32.mxu1 %vm4435_vm8, %v5624_v22 }
 0x43e   :  { %3886 = vmatpush3.bf16.msra.mxu0 %v3885_v28  ;;  %v129_v28 = vld [vmem:[%s5498_s4] ss:$2 sm:$0x7] }
 0x43f   :  { %3535 = vmatprep.subr.mxu0 %v5624_v22  ;;  %v489_v38 = vrot.slane %v129_v28, %v4858_v37  ;;  %v493_v55 = vrot.slane %v129_v28, %v492_v5 }
 0x441   :  { %v4871_v42 = vadd.f32 %v698_v43, %v493_v55 }
 0x442   :  { %3536 = vmatpush3.msra.mxu0 %v4853_v45 }
 0x443   :  { %3919 = vmatprep.subr.bf16.mxu0 %v5623_v11  ;;  %5644 = vst [vmem:[#allocation50_spill] sm:$0xff] %v4871_v42 }
 0x4ef   :  { %v638_v30 = vpop.f32.mrb[0].mxu0 }
 0x4f0   :  { %v3480_v25 = vpop.f32.mrb[1].mxu0 }
 0x4f1   :  { %v4869_v25 = vadd.f32 %v694_v34, %v489_v38  ;;  %v496_v34 = vsub.s32 2, %v4533_v29 }
 0x4f3   :  { %5643 = vst [vmem:[#allocation49_spill] sm:$0xff] %v4869_v25  ;;  %v4876_v5 = vrot.slane %v3234_v49, %v496_v34  ;;  %v4878_v43 = vrot.slane %v129_v28, %v496_v34 }
 0x4f5   :  { %5645 = vst [vmem:[#allocation51_spill] sm:$0xff] %v4876_v5  ;;  %5646 = vst [vmem:[#allocation52_spill] sm:$0xff] %v4878_v43 }
 0x50f   :  { %v772_v51 = vpop.f32.mrb[6].mxu1  ;;  %v843_v60 = vpop.f32.mrb[2].mxu0 }
 0x510   :  { %v4145_v57 = vadd.f32 %v4869_v25, %v772_v51  ;;  %v774_v23 = vpop.f32.mrb[7].mxu1  ;;  %v3515_v46 = vpop.f32.mrb[3].mxu0  ;;  %v844_v51 = vadd.f32 %v843_v60, %v4876_v5 }
 0x511   :  { %v4147_v41 = vadd.f32 %v4871_v42, %v774_v23 }
 0x512   :  { %v3241_v4 = vmul.f32 -1.442695, %v4145_v57  ;;  %v639_v57 = vadd.f32 %v638_v30, %v4878_v43 }
 0x513   :  { %v3242_v61 = vmul.f32 -1.442695, %v4147_v41 }
 0x514   :  { %4250 = vpow2.f32 %v3241_v4 }
 0x515   :  { %4252 = vpow2.f32 %v3242_v61 }
 0x51e   :  { %v4251_v48 = vpop.eup %4250 }
 0x51f   :  { %v851_v26 = vadd.f32 1.0, %v4251_v48  ;;  %v4253_v55 = vpop.eup %4252 }
 0x520   :  { %v858_v38 = vadd.f32 1.0, %v4253_v55 }
 0x521   :  { %4254 = vrcp.f32 %v851_v26 }
 0x522   :  { %4256 = vrcp.f32 %v858_v38 }
 0x52b   :  { %v4255_v46 = vpop.eup %4254 }
 0x52c   :  { %v861_v4 = vmul.f32 %v4255_v46, %v844_v51  ;;  %v4257_v61 = vpop.eup %4256 }
 0x52d   :  { %v864_v48 = vsub.f32 1.0, %v4257_v61  ;;  %v866_v23 = vmul.f32 0.0, %v4257_v61 }
 0x52e   :  { %v862_v41 = vadd.f32 %v861_v4, %v639_v57  ;;  %v4340_v57 = vld [vmem:[%s5495_s1 + $0x1] ss:$0 sm:$0xff] }
 0x52f   :  { %v1245_v4 = vmul.f32 %v4340_v57, %v4844_v9 }
 0x530   :  { %4258 = vtanh.f32 %v862_v41 }
 0x53a   :  { %v4259_v26 = vpop.eup %4258 }
 0x53b   :  { %v865_v29 = vmul.f32 %v4259_v26, %v864_v48  ;;  %v1248_v48 = vsel %vm164_vm0, %v1245_v4, 0.0  ;;  %v1247_v26 = vmul.f32 %v4340_v57, %v4853_v45 }
 0x53d   :  { %v867_v49 = vadd.f32 %v866_v23, %v865_v29  ;;  %v1246_v29 = vmul.f32 %v4340_v57, %v4847_v0 }
 0x53f   :  { %v871_v42 = vrot.slane %v867_v49, %v4858_v37  ;;  %v1254_v49 = vsel %vm164_vm0, %v1247_v26, 0.0  ;;  %v3244_v26 = vld [vmem:[%s5495_s1 + $0x4] ss:$0 sm:$0xff] }
 0x541   :  { %v873_v28 = vmul.f32 %v4699_v58, %v871_v42  ;;  %v872_v34 = vmul.f32 %v4703_v63, %v871_v42  ;;  %v874_v60 = vmul.f32 %v4709_v8, %v871_v42  ;;  %v881_v30 = vmul.f32 %v4716_v20, %v871_v42 }
 0x542   :  { %v890_v55 = vmul.f32 %v4731_v32, %v871_v42  ;;  %v882_v38 = vmul.f32 %v4713_v12, %v871_v42  ;;  %v892_v51 = vmul.f32 %v4739_v15, %v871_v42  ;;  %v883_v46 = vmul.f32 %v4724_v54, %v871_v42 }
 0x543   :  { %877 = vadd.xlane.f32.xlu1 %v873_v28  ;;  %875 = vadd.xlane.f32.xlu0 %v872_v34  ;;  %v900_v41 = vmul.f32 %v4746_v17, %v871_v42  ;;  %v891_v61 = vmul.f32 %v4728_v47, %v871_v42  ;;  %v899_v23 = vmul.f32 %v4743_v21, %v871_v42  ;;  %v4341_v28 = vld [vmem:[%s5495_s1 + $0x2] ss:$0 sm:$0xff] }
 0x544   :  { %v1258_v34 = vmul.f32 %v4341_v28, %v4847_v0 }
 0x547   :  { %879 = vadd.xlane.f32.xlu1 %v874_v60  ;;  %884 = vadd.xlane.f32.xlu0 %v881_v30  ;;  %v901_v60 = vmul.f32 %v4753_v6, %v871_v42  ;;  %v1251_v30 = vsel %vm164_vm0, %v1246_v29, 0.0 }
 0x54b   :  { %893 = vadd.xlane.f32.xlu1 %v890_v55  ;;  %886 = vadd.xlane.f32.xlu0 %v882_v38  ;;  %v1257_v55 = vmul.f32 %v4341_v28, %v4844_v9  ;;  %v1263_v38 = vsel %vm164_vm0, %v1258_v34, 0.0  ;;  %v3243_v9 = vld [vmem:[%s5495_s1 + $0x3] ss:$0 sm:$0xff] }
 0x54f   :  { %897 = vadd.xlane.f32.xlu1 %v892_v51  ;;  %888 = vadd.xlane.f32.xlu0 %v883_v46  ;;  %v1260_v51 = vsel %vm164_vm0, %v1257_v55, 0.0  ;;  %v1259_v46 = vmul.f32 %v4341_v28, %v4853_v45  ;;  %v3246_v55 = vld [vmem:[%s5495_s1 + $0x6] ss:$0 sm:$0xff] }
 0x551   :  { %v1266_v57 = vsel %vm164_vm0, %v1259_v46, 0.0 }
 0x553   :  { %904 = vadd.xlane.f32.xlu1 %v900_v41  ;;  %895 = vadd.xlane.f32.xlu0 %v891_v61 }
 0x557   :  { %902 = vadd.xlane.f32.xlu0 %v899_v23  ;;  %1249 = vadd.xlane.f32.xlu1 %v1248_v48 }
 0x55b   :  { %906 = vadd.xlane.f32.xlu0 %v901_v60  ;;  %1255 = vadd.xlane.f32.xlu1 %v1254_v49  ;;  %v3245_v49 = vld [vmem:[%s5495_s1 + $0x5] ss:$0 sm:$0xff] }
 0x55f   :  { %1252 = vadd.xlane.f32.xlu0 %v1251_v30  ;;  %1264 = vadd.xlane.f32.xlu1 %v1263_v38 }
 0x563   :  { %1261 = vadd.xlane.f32.xlu0 %v1260_v51 }
 0x567   :  { %1267 = vadd.xlane.f32.xlu0 %v1266_v57 }
 0x5d0   :  { %v876_v0 = vpop.xlane.xlu0 %875  ;;  %v878_v42 = vpop.xlane.xlu1 %877 }
 0x5d1   :  { %v913_v28 = vmul.f32 %v3243_v9, %v878_v42  ;;  %v912_v51 = vmul.f32 %v3243_v9, %v876_v0  ;;  %v3247_v42 = vld [vmem:[%s5495_s1 + $0x7] ss:$0 sm:$0xff] }
 0x5d4   :  { %v885_v4 = vpop.xlane.xlu0 %884  ;;  %v880_v41 = vpop.xlane.xlu1 %879 }
 0x5d5   :  { %v919_v34 = vmul.f32 %v3244_v26, %v885_v4  ;;  %v914_v43 = vmul.f32 %v3243_v9, %v880_v41 }
 0x5d7   :  { %v922_v5 = vadd.f32 %v919_v34, %v912_v51 }
 0x5d8   :  { %v887_v61 = vpop.xlane.xlu0 %886  ;;  %v894_v48 = vpop.xlane.xlu1 %893 }
 0x5d9   :  { %v920_v29 = vmul.f32 %v3244_v26, %v887_v61  ;;  %v929_v57 = vmul.f32 %v3245_v49, %v894_v48 }
 0x5db   :  { %v923_v46 = vadd.f32 %v920_v29, %v913_v28 }
 0x5dc   :  { %v889_v23 = vpop.xlane.xlu0 %888  ;;  %v898_v45 = vpop.xlane.xlu1 %897 }
 0x5dd   :  { %v921_v60 = vmul.f32 %v3244_v26, %v889_v23  ;;  %v932_v26 = vadd.f32 %v929_v57, %v922_v5  ;;  %v931_v6 = vmul.f32 %v3245_v49, %v898_v45 }
 0x5df   :  { %v924_v31 = vadd.f32 %v921_v60, %v914_v43  ;;  %v3248_v60 = vld [vmem:[%s5495_s1 + $0x8] ss:$0 sm:$0xff] }
 0x5e0   :  { %v896_v30 = vpop.xlane.xlu0 %895  ;;  %v905_v38 = vpop.xlane.xlu1 %904 }
 0x5e1   :  { %v930_v37 = vmul.f32 %v3245_v49, %v896_v30  ;;  %v940_v25 = vmul.f32 %v3246_v55, %v905_v38  ;;  %v934_v29 = vadd.f32 %v931_v6, %v924_v31 }
 0x5e3   :  { %v933_v61 = vadd.f32 %v930_v37, %v923_v46 }
 0x5e4   :  { %v903_v14 = vpop.xlane.xlu0 %902  ;;  %v1250_v4 = vpop.xlane.xlu1 %1249 }
 0x5e5   :  { %v943_v23 = vadd.f32 %v940_v25, %v933_v61  ;;  %v939_v1 = vmul.f32 %v3246_v55, %v903_v14  ;;  %v1269_v41 = vmul.f32 %v4548_v33, %v1250_v4 }
 0x5e7   :  { %v942_v21 = vadd.f32 %v939_v1, %v932_v26  ;;  %v950_v0 = vmul.f32 %v3247_v42, %v943_v23  ;;  %v1272_v31 = vsel %vm193_vm4, %v1269_v41, 0.0  ;;  %v966_v46 = vmul.f32 %v3248_v60, %v943_v23 }
 0x5e8   :  { %v907_v48 = vpop.xlane.xlu0 %906  ;;  %v1256_v9 = vpop.xlane.xlu1 %1255 }
 0x5e9   :  { %v941_v37 = vmul.f32 %v3246_v55, %v907_v48  ;;  %v955_v43 = vsel %vm164_vm0, %v950_v0, 0.0  ;;  %v3882_v28 = vpack.c.bf16 %v943_v23, %v942_v21  ;;  %v949_v34 = vmul.f32 %v3247_v42, %v942_v21 }
 0x5ea   :  { %956 = vadd.xlane.f32.xlu0 %v955_v43  ;;  %v965_v25 = vmul.f32 %v3248_v60, %v942_v21  ;;  %v1271_v6 = vmul.f32 %v4558_v39, %v1256_v9 }
 0x5eb   :  { %v944_v14 = vadd.f32 %v941_v37, %v934_v29  ;;  %3883 = vmatpush3.bf16.msra.mxu1 %v3882_v28  ;;  %v952_v1 = vsel %vm164_vm0, %v949_v34, 0.0 }
 0x5ec   :  { %v1253_v5 = vpop.xlane.xlu0 %1252  ;;  %953 = vadd.xlane.f32.xlu1 %v952_v1  ;;  %3520 = vmatprep.subr.mxu1 %v5624_v22  ;;  %v968_v49 = vsel %vm164_vm0, %v965_v25, 0.0  ;;  %v1275_v38 = vsel %vm193_vm4, %v1271_v6, 0.0  ;;  %v1265_v37 = vpop.xlane.xlu1 %1264 }
 0x5ed   :  { %v1270_v45 = vmul.f32 %v4551_v35, %v1253_v5  ;;  %v951_v30 = vmul.f32 %v3247_v42, %v944_v14  ;;  %v967_v55 = vmul.f32 %v3248_v60, %v944_v14  ;;  %v971_v42 = vsel %vm164_vm0, %v966_v46, 0.0 }
 0x5ee   :  { %969 = vadd.xlane.f32.xlu0 %v968_v49 }
 0x5ef   :  { %v1273_v21 = vsel %vm193_vm4, %v1270_v45, 0.0  ;;  %3521 = vmatpush3.msra.mxu1 %v944_v14  ;;  %v958_v51 = vsel %vm164_vm0, %v951_v30, 0.0  ;;  %v974_v61 = vsel %vm164_vm0, %v967_v55, 0.0 }
 0x5f0   :  { %v1274_v57 = vadd.f32 %v1273_v21, %v1272_v31  ;;  %959 = vadd.xlane.f32.xlu1 %v958_v51  ;;  %3888 = vmatprep.subr.bf16.mxu1 %v4592_v50  ;;  %v1262_v29 = vpop.xlane.xlu0 %1261 }
 0x5f2   :  { %v1276_v4 = vadd.f32 %v1275_v38, %v1274_v57  ;;  %975 = vadd.xlane.f32.xlu0 %v974_v61 }
 0x5f4   :  { %v1277_v26 = vrot.slane %v1276_v4, 4  ;;  %972 = vadd.xlane.f32.xlu1 %v971_v42  ;;  %v1268_v43 = vpop.xlane.xlu0 %1267 }
 0x5f6   :  { %v1278_v0 = vadd.f32 %v1277_v26, %v1276_v4 }
 0x5f8   :  { %v1279_v48 = vrot.slane %v1278_v0, 2 }
 0x5fa   :  { %v1280_v41 = vadd.f32 %v1279_v48, %v1278_v0 }
 0x5fc   :  { %v1281_v9 = vrot.slane %v1280_v41, 1 }
 0x5fe   :  { %v1282_v23 = vadd.f32 %v1281_v9, %v1280_v41 }
 0x600   :  { %v1283_v28 = vadd.f32 %v1282_v23, %v1262_v29  ;;  %v1284_v34 = vadd.f32 %v1282_v23, %v1265_v37  ;;  %v1285_v60 = vadd.f32 %v1282_v23, %v1268_v43 }
 0x602   :  { %vm1286_vm7 = vcmp.ge.f32.partialorder %v1283_v28, 0.0  ;;  %v1289_v25 = vmul.f32 0.01, %v1283_v28  ;;  %vm1287_vm9 = vcmp.ge.f32.partialorder %v1284_v34, 0.0  ;;  %v1290_v14 = vmul.f32 0.01, %v1284_v34 }
 0x603   :  { %vm1288_vm10 = vcmp.ge.f32.partialorder %v1285_v60, 0.0  ;;  %v1291_v1 = vmul.f32 0.01, %v1285_v60 }
 0x604   :  { %v1292_v6 = vsel %vm1286_vm7, %v1283_v28, %v1289_v25  ;;  %v1293_v31 = vsel %vm1287_vm9, %v1284_v34, %v1290_v14 }
 0x605   :  { %v1295_v5 = vsel %vm193_vm4, %v1292_v6, -inf  ;;  %v1298_v45 = vsel %vm193_vm4, %v1293_v31, -inf  ;;  %v1294_v49 = vsel %vm1288_vm10, %v1285_v60, %v1291_v1 }
 0x606   :  { %1296 = vmax.xlane.f32.xlu1 %v1295_v5  ;;  %1299 = vmax.xlane.f32.xlu0 %v1298_v45  ;;  %v1301_v30 = vsel %vm193_vm4, %v1294_v49, -inf }
 0x60a   :  { %1302 = vmax.xlane.f32.xlu1 %v1301_v30 }
 0x677   :  { %v957_v55 = vpop.xlane.xlu0 %956 }
 0x678   :  { %v978_v38 = vmul.f32 %v4551_v35, %v957_v55 }
 0x679   :  { %v954_v21 = vpop.xlane.xlu1 %953 }
 0x67a   :  { %v977_v51 = vmul.f32 %v4548_v33, %v954_v21  ;;  %v981_v61 = vsel %vm193_vm4, %v978_v38, 0.0 }
 0x67b   :  { %v970_v9 = vpop.xlane.xlu0 %969 }
 0x67c   :  { %v980_v46 = vsel %vm193_vm4, %v977_v51, 0.0 }
 0x67d   :  { %v960_v57 = vpop.xlane.xlu1 %959  ;;  %v982_v42 = vadd.f32 %v981_v61, %v980_v46 }
 0x67e   :  { %v979_v4 = vmul.f32 %v4558_v39, %v960_v57 }
 0x67f   :  { %v976_v28 = vpop.xlane.xlu0 %975 }
 0x680   :  { %v983_v26 = vsel %vm193_vm4, %v979_v4, 0.0 }
 0x681   :  { %v984_v0 = vadd.f32 %v983_v26, %v982_v42  ;;  %v973_v34 = vpop.xlane.xlu1 %972 }
 0x683   :  { %v985_v29 = vrot.slane %v984_v0, 4 }
 0x685   :  { %v986_v48 = vadd.f32 %v985_v29, %v984_v0 }
 0x687   :  { %v987_v41 = vrot.slane %v986_v48, 2 }
 0x689   :  { %v988_v37 = vadd.f32 %v987_v41, %v986_v48 }
 0x68b   :  { %v989_v43 = vrot.slane %v988_v37, 1 }
 0x68d   :  { %v990_v23 = vadd.f32 %v989_v43, %v988_v37 }
 0x68f   :  { %v993_v60 = vadd.f32 %v990_v23, %v976_v28  ;;  %v992_v25 = vadd.f32 %v990_v23, %v973_v34  ;;  %v991_v14 = vadd.f32 %v990_v23, %v970_v9 }
 0x691   :  { %vm994_vm11 = vcmp.ge.f32.partialorder %v991_v14, 0.0  ;;  %v997_v1 = vmul.f32 0.01, %v991_v14  ;;  %vm995_vm12 = vcmp.ge.f32.partialorder %v992_v25, 0.0  ;;  %v998_v5 = vmul.f32 0.01, %v992_v25 }
 0x692   :  { %vm996_vm13 = vcmp.ge.f32.partialorder %v993_v60, 0.0  ;;  %v999_v45 = vmul.f32 0.01, %v993_v60 }
 0x693   :  { %v1300_v30 = vpop.xlane.xlu0 %1299  ;;  %v1297_v55 = vpop.xlane.xlu1 %1296  ;;  %v1000_v21 = vsel %vm994_vm11, %v991_v14, %v997_v1  ;;  %v1001_v38 = vsel %vm995_vm12, %v992_v25, %v998_v5 }
 0x694   :  { %v1305_v51 = vsub.f32 %v1293_v31, %v1300_v30  ;;  %v1304_v46 = vsub.f32 %v1292_v6, %v1297_v55  ;;  %v1003_v57 = vsel %vm193_vm4, %v1000_v21, -inf  ;;  %v1006_v61 = vsel %vm193_vm4, %v1001_v38, -inf }
 0x695   :  { %1004 = vmax.xlane.f32.xlu0 %v1003_v57  ;;  %1007 = vmax.xlane.f32.xlu1 %v1006_v61  ;;  %v1002_v4 = vsel %vm996_vm13, %v993_v60, %v999_v45 }
 0x696   :  { %v1309_v42 = vmul.f32 1.442695, %v1305_v51  ;;  %v1307_v26 = vmul.f32 1.442695, %v1304_v46  ;;  %v1009_v48 = vsel %vm193_vm4, %v1002_v4, -inf }
 0x697   :  { %v1303_v0 = vpop.xlane.xlu1 %1302 }
 0x698   :  { %4260 = vpow2.f32 %v1309_v42  ;;  %v1306_v29 = vsub.f32 %v1294_v49, %v1303_v0 }
 0x699   :  { %4262 = vpow2.f32 %v1307_v26  ;;  %1010 = vmax.xlane.f32.xlu0 %v1009_v48 }
 0x69a   :  { %v1311_v41 = vmul.f32 1.442695, %v1306_v29 }
 0x69c   :  { %4264 = vpow2.f32 %v1311_v41 }
 0x6a2   :  { %v4261_v31 = vpop.eup %4260 }
 0x6a3   :  { %v4263_v6 = vpop.eup %4262  ;;  %v1316_v9 = vsel %vm193_vm4, %v4261_v31, 0.0 }
 0x6a4   :  { %1317 = vadd.xlane.f32.xlu0 %v1316_v9  ;;  %v1313_v37 = vsel %vm193_vm4, %v4263_v6, 0.0 }
 0x6a5   :  { %1314 = vadd.xlane.f32.xlu1 %v1313_v37 }
 0x6a6   :  { %v4265_v43 = vpop.eup %4264 }
 0x6a7   :  { %v1319_v23 = vsel %vm193_vm4, %v4265_v43, 0.0 }
 0x6a9   :  { %1320 = vadd.xlane.f32.xlu1 %v1319_v23 }
 0x722   :  { %v1005_v28 = vpop.xlane.xlu0 %1004  ;;  %v1008_v49 = vpop.xlane.xlu1 %1007 }
 0x723   :  { %v1012_v34 = vsub.f32 %v1000_v21, %v1005_v28  ;;  %v1013_v60 = vsub.f32 %v1001_v38, %v1008_v49 }
 0x725   :  { %v1015_v25 = vmul.f32 1.442695, %v1012_v34  ;;  %v1017_v14 = vmul.f32 1.442695, %v1013_v60  ;;  %v5647_v60 = vld [vmem:[#allocation11_spill] sm:$0xff] }
 0x726   :  { %v1011_v1 = vpop.xlane.xlu0 %1010 }
 0x727   :  { %4266 = vpow2.f32 %v1015_v25  ;;  %v1014_v5 = vsub.f32 %v1002_v4, %v1011_v1  ;;  %v5648_v25 = vld [vmem:[#allocation12_spill] sm:$0xff]  ;;  %v5650_v1 = vld [vmem:[#allocation14_spill] sm:$0xff] }
 0x728   :  { %4268 = vpow2.f32 %v1017_v14  ;;  %v5649_v14 = vld [vmem:[#allocation13_spill] sm:$0xff] }
 0x729   :  { %v1019_v45 = vmul.f32 1.442695, %v1014_v5  ;;  %v5651_v5 = vld [vmem:[#allocation15_spill] sm:$0xff] }
 0x72b   :  { %4270 = vpow2.f32 %v1019_v45  ;;  %v5652_v45 = vld [vmem:[#allocation16_spill] sm:$0xff] }
 0x731   :  { %v4267_v30 = vpop.eup %4266  ;;  %v1318_v51 = vpop.xlane.xlu0 %1317 }
 0x732   :  { %v4269_v55 = vpop.eup %4268  ;;  %v1315_v46 = vpop.xlane.xlu1 %1314  ;;  %v1021_v57 = vsel %vm193_vm4, %v4267_v30, 0.0 }
 0x733   :  { %4272 = vrcp.f32 %v1315_v46  ;;  %1022 = vadd.xlane.f32.xlu0 %v1021_v57  ;;  %v1024_v61 = vsel %vm193_vm4, %v4269_v55, 0.0  ;;  %v5653_v46 = vmov 1  }
 0x734   :  { %1025 = vadd.xlane.f32.xlu1 %v1024_v61  ;;  %4274 = vrcp.f32 %v1318_v51 }
 0x735   :  { %v4271_v21 = vpop.eup %4270 }
 0x736   :  { %v1321_v38 = vpop.xlane.xlu1 %1320  ;;  %v1027_v42 = vsel %vm193_vm4, %v4271_v21, 0.0 }
 0x737   :  { %1028 = vadd.xlane.f32.xlu0 %v1027_v42  ;;  %4276 = vrcp.f32 %v1321_v38  ;;  %v5654_v38 = vmov 2   ;;  %v5655_v42 = vmov 3  }
 0x73d   :  { %v4273_v4 = vpop.eup %4272 }
 0x73e   :  { %v1325_v26 = vmul.f32 %v4273_v4, %v4263_v6  ;;  %v4275_v0 = vpop.eup %4274  ;;  %v5656_v4 = vmov 0  }
 0x73f   :  { %v1326_v29 = vmul.f32 %v4275_v0, %v4261_v31 }
 0x740   :  { %3538 = vmatmul.mubr.msk.f32.vlgmr.msra.gmra.mrb[4].mxu0 %vm193_vm4, %v1325_v26 }
 0x741   :  { %3540 = vmatprep.mubr.msk.f32.mxu0 %vm4435_vm8, %v5624_v22  ;;  %3921 = vmatpush3.bf16.msra.mxu0 %v4599_v56  ;;  %v4277_v48 = vpop.eup %4276 }
 0x742   :  { %3922 = vmatprep.subr.bf16.mxu0 %v5623_v11  ;;  %v1327_v41 = vmul.f32 %v4277_v48, %v4265_v43 }
 0x744   :  { %3541 = vmatmul.mubr.msk.f32.gmra.mrb[6].mxu0 %vm193_vm4, %v1326_v29 }
 0x745   :  { %3543 = vmatprep.mubr.msk.f32.mxu0 %vm4435_vm8, %v5624_v22  ;;  %3924 = vmatpush3.bf16.msra.mxu0 %v4611_v2 }
 0x746   :  { %3925 = vmatprep.subr.bf16.mxu0 %v5623_v11 }
 0x748   :  { %3544 = vmatmul.mubr.msk.f32.gmra.mrb[8].mxu0 %vm193_vm4, %v1327_v41 }
 0x749   :  { %3927 = vmatpush3.bf16.msra.mxu0 %v4622_v13  ;;  %3578 = vmatprep.mubr.msk.f32.mxu0 %vm4435_vm8, %v5624_v22 }
 0x74a   :  { %3928 = vmatprep.subr.bf16.mxu0 %v5623_v11 }
 0x74d   :  { %3930 = vmatpush3.bf16.msra.mxu0 %v4633_v24 }
 0x74e   :  { %3931 = vmatprep.subr.bf16.mxu0 %v5623_v11 }
 0x751   :  { %3933 = vmatpush3.bf16.msra.mxu0 %v4645_v40 }
 0x752   :  { %3934 = vmatprep.subr.bf16.mxu0 %v5623_v11 }
 0x755   :  { %3936 = vmatpush3.bf16.msra.mxu0 %v4656_v52 }
 0x756   :  { %3937 = vmatprep.subr.bf16.mxu0 %v5623_v11 }
 0x759   :  { %3939 = vmatpush3.bf16.msra.mxu0 %v4666_v3 }
 0x75a   :  { %3940 = vmatprep.subr.bf16.mxu0 %v5623_v11 }
 0x75d   :  { %3942 = vmatpush3.bf16.msra.mxu0 %v4676_v18 }
 0x75e   :  { %3975 = vmatprep.subr.bf16.mxu0 %v5623_v11 }
 0x7c0   :  { %v1023_v31 = vpop.xlane.xlu0 %1022 }
 0x7c1   :  { %4278 = vrcp.f32 %v1023_v31  ;;  %v1026_v6 = vpop.xlane.xlu1 %1025 }
 0x7c2   :  { %4280 = vrcp.f32 %v1026_v6 }
 0x7c4   :  { %v1029_v9 = vpop.xlane.xlu0 %1028 }
 0x7c5   :  { %4282 = vrcp.f32 %v1029_v9 }
 0x7cb   :  { %v4279_v37 = vpop.eup %4278 }
 0x7cc   :  { %v1033_v43 = vmul.f32 %v4279_v37, %v4267_v30  ;;  %v4281_v23 = vpop.eup %4280 }
 0x7cd   :  { %v1034_v28 = vmul.f32 %v4281_v23, %v4269_v55 }
 0x7ce   :  { %3523 = vmatmul.mubr.msk.f32.vlgmr.msra.gmra.mrb[8].mxu1 %vm193_vm4, %v1033_v43 }
 0x7cf   :  { %3525 = vmatprep.mubr.msk.f32.mxu1 %vm4435_vm8, %v5624_v22  ;;  %3890 = vmatpush1.bf16.msra.mxu1 %v4596_v53  ;;  %v4283_v49 = vpop.eup %4282 }
 0x7d0   :  { %3892 = vmatprep.subr.bf16.mxu1 %v4603_v59  ;;  %v1035_v34 = vmul.f32 %v4283_v49, %v4271_v21 }
 0x7d2   :  { %3526 = vmatmul.mubr.msk.f32.gmra.mrb[10].mxu1 %vm193_vm4, %v1034_v28 }
 0x7d3   :  { %3528 = vmatprep.mubr.msk.f32.mxu1 %vm4435_vm8, %v5624_v22  ;;  %3894 = vmatpush1.bf16.msra.mxu1 %v4606_v62 }
 0x7d4   :  { %3896 = vmatprep.subr.bf16.mxu1 %v4615_v7 }
 0x7d6   :  { %3529 = vmatmul.mubr.msk.f32.gmra.mrb[12].mxu1 %vm193_vm4, %v1035_v34 }
 0x7d7   :  { %3898 = vmatpush1.bf16.msra.mxu1 %v4617_v10  ;;  %1579 = vmatprep.mubr.f32.mxu1 %v5624_v22 }
 0x7d8   :  { %3900 = vmatprep.subr.bf16.mxu1 %v4627_v16 }
 0x7db   :  { %3902 = vmatpush1.bf16.msra.mxu1 %v4629_v19 }
 0x7dc   :  { %3904 = vmatprep.subr.bf16.mxu1 %v4639_v27 }
 0x7df   :  { %3906 = vmatpush1.bf16.msra.mxu1 %v4641_v36 }
 0x7e0   :  { %3908 = vmatprep.subr.bf16.mxu1 %v4649_v44 }
 0x7e3   :  { %3910 = vmatpush1.bf16.msra.mxu1 %v5647_v60 }
 0x7e4   :  { %3912 = vmatprep.subr.bf16.mxu1 %v5648_v25 }
 0x7e7   :  { %3914 = vmatpush1.bf16.msra.mxu1 %v5649_v14 }
 0x7e8   :  { %3916 = vmatprep.subr.bf16.mxu1 %v5650_v1 }
 0x7eb   :  { %3918 = vmatpush1.bf16.msra.mxu1 %v5651_v5 }
 0x7ec   :  { %3944 = vmatprep.subr.bf16.mxu1 %v5652_v45 }
 0x813   :  { %v1403_v30 = vpop.f32.mrb[4].mxu0 }
 0x814   :  { %1419 = vperm.xlu1 %4188, %v1403_v30   ;;  %v3539_v55 = vpop.f32.mrb[5].mxu0 }
 0x817   :  { %v1408_v51 = vpop.f32.mrb[6].mxu0 }
 0x818   :  { %4189 = vset.pattern.permute.xlu1 %v5653_v46  ;;  %1424 = vperm.xlu0 %4187, %v1408_v51   ;;  %v3542_v57 = vpop.f32.mrb[7].mxu0 }
 0x819   :  { %1444 = vperm.xlu1 %4189, %v1403_v30  }
 0x81b   :  { %v1413_v61 = vpop.f32.mrb[8].mxu0 }
 0x81c   :  { %1429 = vperm.xlu0 %4187, %v1413_v61   ;;  %v3545_v21 = vpop.f32.mrb[9].mxu0 }
 0x81d   :  { %1448 = vperm.xlu1 %4189, %v1408_v51  }
 0x820   :  { %4190 = vset.pattern.permute.xlu0 %v5654_v38 }
 0x821   :  { %1452 = vperm.xlu1 %4189, %v1413_v61   ;;  %1468 = vperm.xlu0 %4190, %v1403_v30  }
 0x825   :  { %4191 = vset.pattern.permute.xlu1 %v5654_v38  ;;  %4192 = vset.pattern.permute.xlu0 %v5655_v42 }
 0x826   :  { %1472 = vperm.xlu1 %4191, %v1408_v51   ;;  %1492 = vperm.xlu0 %4192, %v1403_v30  }
 0x82a   :  { %1476 = vperm.xlu1 %4191, %v1413_v61   ;;  %4194 = vset.pattern.permute.xlu0 %v5656_v4 }
 0x82e   :  { %4193 = vset.pattern.permute.xlu1 %v5655_v42 }
 0x82f   :  { %1496 = vperm.xlu1 %4193, %v1408_v51  }
 0x833   :  { %1500 = vperm.xlu1 %4193, %v1413_v61  }
 0x837   :  { %4195 = vset.pattern.permute.xlu1 %v5653_v46 }
 0x893   :  { %v1420_v26 = vpop.permute.xlu1 %1419 }
 0x894   :  { %v1432_v43 = vmul.f32 %v4703_v63, %v1420_v26 }
 0x897   :  { %v1425_v0 = vpop.permute.xlu0 %1424 }
 0x898   :  { %v1445_v29 = vpop.permute.xlu1 %1444  ;;  %v1433_v6 = vmul.f32 %v4699_v58, %v1425_v0 }
 0x899   :  { %v1455_v9 = vmul.f32 %v4716_v20, %v1445_v29 }
 0x89a   :  { %v1435_v55 = vadd.f32 %v1433_v6, %v1432_v43 }
 0x89b   :  { %v1430_v31 = vpop.permute.xlu0 %1429 }
 0x89c   :  { %v1449_v48 = vpop.permute.xlu1 %1448  ;;  %v1434_v23 = vmul.f32 %v4709_v8, %v1430_v31 }
 0x89d   :  { %v1456_v41 = vmul.f32 %v4713_v12, %v1449_v48 }
 0x89e   :  { %v1436_v57 = vadd.f32 %v1435_v55, %v1434_v23 }
 0x89f   :  { %v1458_v28 = vadd.f32 %v1456_v41, %v1455_v9 }
 0x8a0   :  { %v1453_v37 = vpop.permute.xlu1 %1452  ;;  %v1469_v61 = vpop.permute.xlu0 %1468  ;;  %v1437_v31 = vrot.slane %v1436_v57, 4 }
 0x8a1   :  { %v1457_v49 = vmul.f32 %v4724_v54, %v1453_v37  ;;  %v1111_v34 = vpop.f32.mrb[8].mxu1  ;;  %v1479_v41 = vmul.f32 %v4731_v32, %v1469_v61 }
 0x8a2   :  { %v3524_v30 = vpop.f32.mrb[9].mxu1  ;;  %1152 = vperm.xlu1 %4195, %v1111_v34   ;;  %1127 = vperm.xlu0 %4194, %v1111_v34  }
 0x8a3   :  { %v1459_v51 = vadd.f32 %v1458_v28, %v1457_v49  ;;  %v1438_v30 = vadd.f32 %v1437_v31, %v1436_v57  ;;  %v5658_v31 = vld [vmem:[#allocation24_spill] sm:$0xff] }
 0x8a5   :  { %v1473_v21 = vpop.permute.xlu1 %1472  ;;  %v1116_v29 = vpop.f32.mrb[10].mxu1  ;;  %v1460_v26 = vrot.slane %v1459_v51, 4 }
 0x8a6   :  { %v1480_v0 = vmul.f32 %v4728_v47, %v1473_v21  ;;  %4197 = vset.pattern.permute.xlu1 %v5656_v4  ;;  %4196 = vset.pattern.permute.xlu0 %v5654_v38  ;;  %v3527_v48 = vpop.f32.mrb[11].mxu1  ;;  %v1493_v55 = vpop.permute.xlu0 %1492 }
 0x8a7   :  { %1176 = vperm.xlu0 %4196, %v1111_v34   ;;  %1132 = vperm.xlu1 %4197, %v1116_v29   ;;  %v1461_v28 = vadd.f32 %v1460_v26, %v1459_v51  ;;  %v1439_v51 = vrot.slane %v1438_v30, 2 }
 0x8a8   :  { %v1482_v37 = vadd.f32 %v1480_v0, %v1479_v41  ;;  %v5657_v0 = vld [vmem:[#allocation22_spill] sm:$0xff] }
 0x8a9   :  { %v1477_v9 = vpop.permute.xlu1 %1476  ;;  %v1121_v6 = vpop.f32.mrb[12].mxu1  ;;  %v1462_v61 = vrot.slane %v1461_v28, 2  ;;  %v1503_v26 = vmul.f32 %v5657_v0, %v1493_v55 }
 0x8aa   :  { %v1481_v43 = vmul.f32 %v4739_v15, %v1477_v9  ;;  %v3530_v23 = vpop.f32.mrb[13].mxu1 }
 0x8ab   :  { %4198 = vset.pattern.permute.xlu0 %v5653_v46  ;;  %4200 = vset.pattern.permute.xlu1 %v5654_v38  ;;  %v1440_v23 = vadd.f32 %v1439_v51, %v1438_v30 }
 0x8ac   :  { %v1483_v49 = vadd.f32 %v1482_v37, %v1481_v43  ;;  %1156 = vperm.xlu0 %4198, %v1116_v29   ;;  %1180 = vperm.xlu1 %4200, %v1116_v29   ;;  %v1463_v37 = vadd.f32 %v1462_v61, %v1461_v28 }
 0x8ae   :  { %v1484_v21 = vrot.slane %v1483_v49, 4  ;;  %v1497_v48 = vpop.permute.xlu1 %1496 }
 0x8af   :  { %v1504_v45 = vmul.f32 %v4746_v17, %v1497_v48  ;;  %v1441_v48 = vrot.slane %v1440_v23, 1 }
 0x8b0   :  { %v1485_v5 = vadd.f32 %v1484_v21, %v1483_v49  ;;  %4199 = vset.pattern.permute.xlu0 %v5655_v42  ;;  %4201 = vset.pattern.permute.xlu1 %v5655_v42  ;;  %v1464_v49 = vrot.slane %v1463_v37, 1 }
 0x8b1   :  { %1200 = vperm.xlu0 %4199, %v1111_v34   ;;  %1204 = vperm.xlu1 %4201, %v1116_v29   ;;  %v1506_v57 = vadd.f32 %v1504_v45, %v1503_v26  ;;  %v1442_v45 = vadd.f32 %v1441_v48, %v1440_v23  ;;  %v5665_v23 = vld [vmem:[#allocation31_spill] sm:$0xff]  ;;  %v5668_v48 = vld [vmem:[#allocation34_spill] sm:$0xff] }
 0x8b2   :  { %v1486_v41 = vrot.slane %v1485_v5, 2  ;;  %v1501_v9 = vpop.permute.xlu1 %1500  ;;  %v1465_v29 = vadd.f32 %v1464_v49, %v1463_v37  ;;  %v5660_v37 = vld [vmem:[#allocation26_spill] sm:$0xff]  ;;  %v5666_v49 = vld [vmem:[#allocation32_spill] sm:$0xff] }
 0x8b3   :  { %v1505_v43 = vmul.f32 %v5658_v31, %v1501_v9 }
 0x8b4   :  { %v1487_v1 = vadd.f32 %v1486_v41, %v1485_v5  ;;  %v1466_v5 = vadd.f32 %v1465_v29, %v1442_v45  ;;  %v5671_v29 = vld [vmem:[#allocation37_spill] sm:$0xff]  ;;  %v5673_v45 = vld [vmem:[#allocation39_spill] sm:$0xff] }
 0x8b5   :  { %v1507_v14 = vadd.f32 %v1506_v57, %v1505_v43  ;;  %4202 = vset.pattern.permute.xlu1 %v5656_v4  ;;  %4210 = vset.pattern.permute.xlu0 %v5656_v4  ;;  %v5661_v57 = vld [vmem:[#allocation27_spill] sm:$0xff]  ;;  %v5663_v43 = vld [vmem:[#allocation29_spill] sm:$0xff] }
 0x8b6   :  { %1137 = vperm.xlu1 %4202, %v1121_v6   ;;  %v1488_v55 = vrot.slane %v1487_v1, 1 }
 0x8b7   :  { %v1508_v21 = vrot.slane %v1507_v14, 4 }
 0x8b8   :  { %v1489_v61 = vadd.f32 %v1488_v55, %v1487_v1  ;;  %v5662_v1 = vld [vmem:[#allocation28_spill] sm:$0xff]  ;;  %v5669_v55 = vld [vmem:[#allocation35_spill] sm:$0xff] }
 0x8b9   :  { %v1509_v34 = vadd.f32 %v1508_v21, %v1507_v14  ;;  %v5659_v14 = vld [vmem:[#allocation25_spill] sm:$0xff] }
 0x8ba   :  { %4203 = vset.pattern.permute.xlu1 %v5653_v46  ;;  %v1490_v26 = vadd.f32 %v1489_v61, %v1466_v5  ;;  %v5667_v21 = vld [vmem:[#allocation33_spill] sm:$0xff]  ;;  %v5674_v61 = vld [vmem:[#allocation40_spill] sm:$0xff]  ;;  %v5676_v5 = vld [vmem:[#allocation42_spill] sm:$0xff] }
 0x8bb   :  { %v1510_v28 = vrot.slane %v1509_v34, 2  ;;  %1160 = vperm.xlu1 %4203, %v1121_v6  }
 0x8bd   :  { %v1511_v30 = vadd.f32 %v1510_v28, %v1509_v34  ;;  %v5670_v34 = vld [vmem:[#allocation36_spill] sm:$0xff]  ;;  %v5672_v28 = vld [vmem:[#allocation38_spill] sm:$0xff] }
 0x8bf   :  { %v1512_v51 = vrot.slane %v1511_v30, 1  ;;  %4204 = vset.pattern.permute.xlu1 %v5654_v38 }
 0x8c0   :  { %1184 = vperm.xlu1 %4204, %v1121_v6  }
 0x8c1   :  { %v1513_v41 = vadd.f32 %v1512_v51, %v1511_v30  ;;  %v5675_v30 = vld [vmem:[#allocation41_spill] sm:$0xff]  ;;  %v5677_v51 = vld [vmem:[#allocation43_spill] sm:$0xff] }
 0x8c3   :  { %v1514_v9 = vadd.f32 %v1513_v41, %v1490_v26  ;;  %v5678_v26 = vld [vmem:[#allocation44_spill] sm:$0xff]  ;;  %v5679_v41 = vld [vmem:[#allocation45_spill] sm:$0xff] }
 0x8c4   :  { %4205 = vset.pattern.permute.xlu1 %v5655_v42 }
 0x8c5   :  { %1580 = vmatmul.mubr.f32.vlgmr.msra.gmra.mrb[14].mxu1 %v1514_v9  ;;  %3579 = vmatmul.mubr.f32.vlgmr.msra.gmra.mrb[10].mxu0 %v1514_v9  ;;  %v5680_v9 = vld [vmem:[#allocation46_spill] sm:$0xff] }
 0x8c6   :  { %1208 = vperm.xlu1 %4205, %v1121_v6   ;;  %3946 = vmatpush1.bf16.msra.mxu1 %v5659_v14  ;;  %v5664_v6 = vld [vmem:[#allocation30_spill] sm:$0xff] }
 0x8c7   :  { %3977 = vmatpush3.bf16.msra.mxu0 %v5660_v37  ;;  %3948 = vmatprep.subr.bf16.mxu1 %v5661_v57 }
 0x8c8   :  { %3978 = vmatprep.subr.bf16.mxu0 %v5623_v11  ;;  %1720 = vmatprep.mubr.f32.mxu1 %v5624_v22 }
 0x8c9   :  { %3613 = vmatprep.mubr.msk.f32.mxu0 %vm4435_vm8, %v5624_v22 }
 0x8ca   :  { %3950 = vmatpush1.bf16.msra.mxu1 %v5662_v1  ;;  %4206 = vset.pattern.permute.xlu1 %v5656_v4 }
 0x8cb   :  { %3980 = vmatpush3.bf16.msra.mxu0 %v5663_v43  ;;  %3952 = vmatprep.subr.bf16.mxu1 %v5664_v6 }
 0x8cc   :  { %3981 = vmatprep.subr.bf16.mxu0 %v5623_v11 }
 0x8ce   :  { %3954 = vmatpush1.bf16.msra.mxu1 %v5665_v23 }
 0x8cf   :  { %3983 = vmatpush3.bf16.msra.mxu0 %v5666_v49  ;;  %3956 = vmatprep.subr.bf16.mxu1 %v5667_v21 }
 0x8d0   :  { %3984 = vmatprep.subr.bf16.mxu0 %v5623_v11 }
 0x8d2   :  { %3958 = vmatpush1.bf16.msra.mxu1 %v5668_v48 }
 0x8d3   :  { %3986 = vmatpush3.bf16.msra.mxu0 %v5669_v55  ;;  %3960 = vmatprep.subr.bf16.mxu1 %v5670_v34 }
 0x8d4   :  { %3987 = vmatprep.subr.bf16.mxu0 %v5623_v11 }
 0x8d6   :  { %3962 = vmatpush1.bf16.msra.mxu1 %v5671_v29 }
 0x8d7   :  { %3989 = vmatpush3.bf16.msra.mxu0 %v5672_v28  ;;  %3964 = vmatprep.subr.bf16.mxu1 %v5673_v45  ;;  %v5681_v45 = vld [vmem:[#allocation47_spill] sm:$0xff] }
 0x8d8   :  { %3990 = vmatprep.subr.bf16.mxu0 %v5623_v11 }
 0x8da   :  { %3966 = vmatpush1.bf16.msra.mxu1 %v5674_v61 }
 0x8db   :  { %3992 = vmatpush3.bf16.msra.mxu0 %v5675_v30  ;;  %3968 = vmatprep.subr.bf16.mxu1 %v5676_v5 }
 0x8dc   :  { %3993 = vmatprep.subr.bf16.mxu0 %v5623_v11 }
 0x8de   :  { %3970 = vmatpush1.bf16.msra.mxu1 %v5677_v51 }
 0x8df   :  { %3995 = vmatpush3.bf16.msra.mxu0 %v5678_v26  ;;  %3972 = vmatprep.subr.bf16.mxu1 %v5679_v41 }
 0x8e0   :  { %3996 = vmatprep.subr.bf16.mxu0 %v5623_v11 }
 0x8e2   :  { %3974 = vmatpush1.bf16.msra.mxu1 %v5680_v9 }
 0x8e3   :  { %3998 = vmatpush3.bf16.msra.mxu0 %v5681_v45  ;;  %3999 = vmatprep.subr.bf16.mxu1 %v5623_v11 }
 0x8e4   :  { %4002 = vmatprep.subr.bf16.mxu0 %v5623_v11 }
 0x921   :  { %v1153_v30 = vpop.permute.xlu1 %1152  ;;  %v1128_v61 = vpop.permute.xlu0 %1127 }
 0x922   :  { %v1140_v41 = vmul.f32 %v4703_v63, %v1128_v61  ;;  %v1163_v49 = vmul.f32 %v4716_v20, %v1153_v30 }
 0x926   :  { %v1133_v5 = vpop.permute.xlu1 %1132  ;;  %v1177_v29 = vpop.permute.xlu0 %1176 }
 0x927   :  { %v1141_v26 = vmul.f32 %v4699_v58, %v1133_v5  ;;  %v1187_v61 = vmul.f32 %v4731_v32, %v1177_v29 }
 0x929   :  { %v1143_v48 = vadd.f32 %v1141_v26, %v1140_v41 }
 0x92b   :  { %v1181_v28 = vpop.permute.xlu1 %1180  ;;  %v1157_v34 = vpop.permute.xlu0 %1156 }
 0x92c   :  { %v1164_v45 = vmul.f32 %v4713_v12, %v1157_v34  ;;  %v1188_v1 = vmul.f32 %v4728_v47, %v1181_v28 }
 0x92e   :  { %v1166_v6 = vadd.f32 %v1164_v45, %v1163_v49  ;;  %v1190_v41 = vadd.f32 %v1188_v1, %v1187_v61 }
 0x930   :  { %v1205_v51 = vpop.permute.xlu1 %1204  ;;  %v1201_v37 = vpop.permute.xlu0 %1200 }
 0x931   :  { %v1211_v30 = vmul.f32 %v5657_v0, %v1201_v37  ;;  %v1212_v49 = vmul.f32 %v4746_v17, %v1205_v51 }
 0x935   :  { %v1138_v55 = vpop.permute.xlu1 %1137 }
 0x936   :  { %v1142_v9 = vmul.f32 %v4709_v8, %v1138_v55 }
 0x938   :  { %v1144_v21 = vadd.f32 %v1143_v48, %v1142_v9 }
 0x93a   :  { %v1161_v23 = vpop.permute.xlu1 %1160  ;;  %v1145_v57 = vrot.slane %v1144_v21, 4 }
 0x93b   :  { %v1165_v43 = vmul.f32 %v4724_v54, %v1161_v23 }
 0x93c   :  { %v1146_v55 = vadd.f32 %v1145_v57, %v1144_v21 }
 0x93d   :  { %v1167_v5 = vadd.f32 %v1166_v6, %v1165_v43  ;;  %v1214_v43 = vadd.f32 %v1212_v49, %v1211_v30 }
 0x93e   :  { %v1147_v9 = vrot.slane %v1146_v55, 2 }
 0x93f   :  { %v1168_v14 = vrot.slane %v1167_v5, 4  ;;  %v1185_v26 = vpop.permute.xlu1 %1184 }
 0x940   :  { %v1189_v34 = vmul.f32 %v4739_v15, %v1185_v26  ;;  %v1148_v42 = vadd.f32 %v1147_v9, %v1146_v55 }
 0x941   :  { %v1169_v48 = vadd.f32 %v1168_v14, %v1167_v5 }
 0x942   :  { %v1191_v45 = vadd.f32 %v1190_v41, %v1189_v34  ;;  %v1149_v5 = vrot.slane %v1148_v42, 1 }
 0x943   :  { %v1170_v23 = vrot.slane %v1169_v48, 2 }
 0x944   :  { %v1192_v28 = vrot.slane %v1191_v45, 4  ;;  %v1150_v34 = vadd.f32 %v1149_v5, %v1148_v42  ;;  %v5682_v42 = vld [vmem:[#allocation49_spill] sm:$0xff] }
 0x945   :  { %v1209_v4 = vpop.permute.xlu1 %1208  ;;  %v1171_v6 = vadd.f32 %v1170_v23, %v1169_v48 }
 0x946   :  { %v1193_v29 = vadd.f32 %v1192_v28, %v1191_v45  ;;  %v1213_v38 = vmul.f32 %v5658_v31, %v1209_v4 }
 0x947   :  { %v1172_v21 = vrot.slane %v1171_v6, 1 }
 0x948   :  { %v1194_v1 = vrot.slane %v1193_v29, 2  ;;  %v1215_v57 = vadd.f32 %v1214_v43, %v1213_v38 }
 0x949   :  { %v1173_v51 = vadd.f32 %v1172_v21, %v1171_v6 }
 0x94a   :  { %v1195_v61 = vadd.f32 %v1194_v1, %v1193_v29  ;;  %v1216_v14 = vrot.slane %v1215_v57, 4 }
 0x94b   :  { %v1174_v30 = vadd.f32 %v1173_v51, %v1150_v34 }
 0x94c   :  { %v1196_v37 = vrot.slane %v1195_v61, 1  ;;  %v1217_v26 = vadd.f32 %v1216_v14, %v1215_v57 }
 0x94e   :  { %v1218_v41 = vrot.slane %v1217_v26, 2  ;;  %v1197_v46 = vadd.f32 %v1196_v37, %v1195_v61  ;;  %v5684_v61 = vld [vmem:[#allocation51_spill] sm:$0xff]  ;;  %v5685_v37 = vld [vmem:[#allocation52_spill] sm:$0xff] }
 0x950   :  { %v1219_v25 = vadd.f32 %v1218_v41, %v1217_v26  ;;  %v1198_v48 = vadd.f32 %v1197_v46, %v1174_v30  ;;  %v5683_v46 = vld [vmem:[#allocation50_spill] sm:$0xff] }
 0x952   :  { %v1220_v60 = vrot.slane %v1219_v25, 1 }
 0x954   :  { %v1221_v49 = vadd.f32 %v1220_v60, %v1219_v25 }
 0x956   :  { %v1222_v45 = vadd.f32 %v1221_v49, %v1198_v48 }
 0x958   :  { %1721 = vmatmul.mubr.f32.vlgmr.msra.gmra.mrb[14].mxu1 %v1222_v45  ;;  %3614 = vmatmul.mubr.f32.vlgmr.msra.gmra.mrb[12].mxu0 %v1222_v45 }
 0x959   :  { %3637 = vmatprep.mubr.msk.f32.mxu0 %vm4435_vm8, %v5624_v22  ;;  %3622 = vmatprep.mubr.msk.f32.mxu1 %vm4435_vm8, %v5624_v22 }
 0x998   :  { %v1652_v38 = vpop.f32.mrb[10].mxu0 }
 0x999   :  { %v3580_v4 = vpop.f32.mrb[11].mxu0  ;;  %v1653_v26 = vadd.f32 %v1652_v38, %v5685_v37  ;;  %v3266_v37 = vld [vmem:[%s5495_s1 + $0xb] ss:$0 sm:$0xff] }
 0xa2b   :  { %v1722_v55 = vpop.f32.mrb[14].mxu1  ;;  %v1793_v23 = vpop.f32.mrb[12].mxu0 }
 0xa2c   :  { %v4149_v9 = vadd.f32 %v5682_v42, %v1722_v55  ;;  %v1724_v28 = vpop.f32.mrb[15].mxu1  ;;  %v3615_v43 = vpop.f32.mrb[13].mxu0  ;;  %v1794_v14 = vadd.f32 %v1793_v23, %v5684_v61 }
 0xa2d   :  { %v4151_v60 = vadd.f32 %v5683_v46, %v1724_v28 }
 0xa2e   :  { %v3258_v6 = vmul.f32 -1.442695, %v4149_v9  ;;  %v5686_v9 = vld [vmem:[#allocation48_spill] sm:$0xff] }
 0xa2f   :  { %v3259_v25 = vmul.f32 -1.442695, %v4151_v60 }
 0xa30   :  { %4284 = vpow2.f32 %v3258_v6 }
 0xa31   :  { %4286 = vpow2.f32 %v3259_v25 }
 0xa3a   :  { %v4285_v29 = vpop.eup %4284 }
 0xa3b   :  { %v1801_v1 = vadd.f32 1.0, %v4285_v29  ;;  %v4287_v57 = vpop.eup %4286 }
 0xa3c   :  { %v1808_v21 = vadd.f32 1.0, %v4287_v57 }
 0xa3d   :  { %4288 = vrcp.f32 %v1801_v1 }
 0xa3e   :  { %4290 = vrcp.f32 %v1808_v21 }
 0xa47   :  { %v4289_v5 = vpop.eup %4288 }
 0xa48   :  { %v1811_v51 = vmul.f32 %v4289_v5, %v1794_v14  ;;  %v4291_v34 = vpop.eup %4290 }
 0xa49   :  { %v1814_v30 = vsub.f32 1.0, %v4291_v34  ;;  %v1816_v4 = vmul.f32 %v4291_v34, %v1222_v45  ;;  %v3263_v34 = vld [vmem:[%s5495_s1 + $0x9] ss:$0 sm:$0xff] }
 0xa4a   :  { %v1812_v41 = vadd.f32 %v1811_v51, %v1653_v26 }
 0xa4c   :  { %4292 = vtanh.f32 %v1812_v41 }
 0xa56   :  { %v4293_v48 = vpop.eup %4292 }
 0xa57   :  { %v1815_v49 = vmul.f32 %v4293_v48, %v1814_v30 }
 0xa59   :  { %v1817_v55 = vadd.f32 %v1816_v4, %v1815_v49  ;;  %v3265_v4 = vld [vmem:[%s5495_s1 + $0xa] ss:$0 sm:$0xff] }
 0xa5b   :  { %v1821_v28 = vrot.slane %v1817_v55, %v5686_v9  ;;  %v3264_v55 = vld [vmem:[%s5495_s1 + $0xd] ss:$0 sm:$0xff] }
 0xa5d   :  { %v1823_v43 = vmul.f32 %v4699_v58, %v1821_v28  ;;  %v1822_v6 = vmul.f32 %v4703_v63, %v1821_v28  ;;  %v1832_v38 = vmul.f32 %v4713_v12, %v1821_v28  ;;  %v1824_v23 = vmul.f32 %v4709_v8, %v1821_v28 }
 0xa5e   :  { %v1840_v60 = vmul.f32 %v4731_v32, %v1821_v28  ;;  %v1831_v25 = vmul.f32 %v4716_v20, %v1821_v28  ;;  %v1842_v45 = vmul.f32 %v4739_v15, %v1821_v28  ;;  %v1833_v29 = vmul.f32 %v4724_v54, %v1821_v28 }
 0xa5f   :  { %1827 = vadd.xlane.f32.xlu1 %v1823_v43  ;;  %1825 = vadd.xlane.f32.xlu0 %v1822_v6  ;;  %v1850_v1 = vmul.f32 %v4746_v17, %v1821_v28  ;;  %v1841_v57 = vmul.f32 %v4728_v47, %v1821_v28  ;;  %v1849_v21 = vmul.f32 %v5657_v0, %v1821_v28  ;;  %v4342_v43 = vld [vmem:[%s5495_s1 + $0x4] ss:$0 sm:$0xff] }
 0xa60   :  { %v1851_v14 = vmul.f32 %v5658_v31, %v1821_v28 }
 0xa63   :  { %1836 = vadd.xlane.f32.xlu1 %v1832_v38  ;;  %1829 = vadd.xlane.f32.xlu0 %v1824_v23 }
 0xa67   :  { %1843 = vadd.xlane.f32.xlu1 %v1840_v60  ;;  %1834 = vadd.xlane.f32.xlu0 %v1831_v25 }
 0xa6b   :  { %1847 = vadd.xlane.f32.xlu1 %v1842_v45  ;;  %1838 = vadd.xlane.f32.xlu0 %v1833_v29  ;;  %v4343_v29 = vld [vmem:[%s5495_s1 + $0x3] ss:$0 sm:$0xff] }
 0xa6f   :  { %1854 = vadd.xlane.f32.xlu1 %v1850_v1  ;;  %1845 = vadd.xlane.f32.xlu0 %v1841_v57 }
 0xa73   :  { %1852 = vadd.xlane.f32.xlu0 %v1849_v21 }
 0xa77   :  { %1856 = vadd.xlane.f32.xlu0 %v1851_v14 }
 0xaec   :  { %v1828_v5 = vpop.xlane.xlu1 %1827  ;;  %v1826_v26 = vpop.xlane.xlu0 %1825 }
 0xaed   :  { %v2153_v49 = vmul.f32 %v3263_v34, %v1826_v26  ;;  %v2154_v28 = vmul.f32 %v3263_v34, %v1828_v5  ;;  %v1858_v1 = vmul.f32 %v4343_v29, %v1826_v26  ;;  %v1859_v14 = vmul.f32 %v4343_v29, %v1828_v5  ;;  %v4344_v5 = vld [vmem:[%s5495_s1 + $0x5] ss:$0 sm:$0xff] }
 0xaef   :  { %v2160_v57 = vadd.f32 %v3264_v55, %v2153_v49  ;;  %v2161_v9 = vadd.f32 %v3264_v55, %v2154_v28 }
 0xaf0   :  { %v1837_v51 = vpop.xlane.xlu1 %1836  ;;  %v1830_v41 = vpop.xlane.xlu0 %1829 }
 0xaf1   :  { %v1862_v25 = vmul.f32 %v4342_v43, %v1837_v51  ;;  %v2168_v45 = vmul.f32 %v3265_v4, %v1837_v51  ;;  %v2155_v21 = vmul.f32 %v3263_v34, %v1830_v41  ;;  %v3267_v51 = vld [vmem:[%s5495_s1 + $0xc] ss:$0 sm:$0xff] }
 0xaf3   :  { %v1865_v17 = vadd.f32 %v1862_v25, %v1859_v14  ;;  %v2171_v0 = vadd.f32 %v2168_v45, %v2161_v9  ;;  %v2162_v49 = vadd.f32 %v3264_v55, %v2155_v21  ;;  %v4345_v9 = vld [vmem:[%s5495_s1 + $0x6] ss:$0 sm:$0xff] }
 0xaf4   :  { %v1844_v30 = vpop.xlane.xlu1 %1843  ;;  %v1835_v48 = vpop.xlane.xlu0 %1834 }
 0xaf5   :  { %v1861_v6 = vmul.f32 %v4342_v43, %v1835_v48  ;;  %v2167_v38 = vmul.f32 %v3265_v4, %v1835_v48  ;;  %v1867_v28 = vmul.f32 %v4344_v5, %v1844_v30  ;;  %v2177_v15 = vmul.f32 %v3266_v37, %v1844_v30 }
 0xaf7   :  { %v1864_v61 = vadd.f32 %v1861_v6, %v1858_v1  ;;  %v2170_v46 = vadd.f32 %v2167_v38, %v2160_v57  ;;  %v1860_v57 = vmul.f32 %v4343_v29, %v1830_v41 }
 0xaf8   :  { %v1848_v23 = vpop.xlane.xlu1 %1847  ;;  %v1839_v60 = vpop.xlane.xlu0 %1838 }
 0xaf9   :  { %v2169_v48 = vmul.f32 %v3265_v4, %v1839_v60  ;;  %v1863_v6 = vmul.f32 %v4342_v43, %v1839_v60  ;;  %v1870_v47 = vadd.f32 %v1867_v28, %v1864_v61  ;;  %v2180_v54 = vadd.f32 %v2177_v15, %v2170_v46 }
 0xafa   :  { %v2179_v55 = vmul.f32 %v3266_v37, %v1848_v23  ;;  %v1869_v15 = vmul.f32 %v4344_v5, %v1848_v23 }
 0xafb   :  { %v2172_v32 = vadd.f32 %v2169_v48, %v2162_v49  ;;  %v1866_v21 = vadd.f32 %v1863_v6, %v1860_v57 }
 0xafc   :  { %v1855_v42 = vpop.xlane.xlu1 %1854  ;;  %v1846_v31 = vpop.xlane.xlu0 %1845 }
 0xafd   :  { %v1868_v26 = vmul.f32 %v4344_v5, %v1846_v31  ;;  %v2178_v34 = vmul.f32 %v3266_v37, %v1846_v31  ;;  %v2188_v38 = vmul.f32 %v3267_v51, %v1855_v42  ;;  %v1874_v25 = vmul.f32 %v4345_v9, %v1855_v42 }
 0xafe   :  { %v2182_v46 = vadd.f32 %v2179_v55, %v2172_v32 }
 0xaff   :  { %v1871_v4 = vadd.f32 %v1868_v26, %v1865_v17  ;;  %v2181_v1 = vadd.f32 %v2178_v34, %v2171_v0  ;;  %v4346_v17 = vld [vmem:[%s5495_s1 + $0x1] ss:$0 sm:$0xff]  ;;  %v1872_v26 = vadd.f32 %v1869_v15, %v1866_v21 }
 0xb00   :  { %v1853_v20 = vpop.xlane.xlu0 %1852 }
 0xb01   :  { %v2191_v45 = vadd.f32 %v2188_v38, %v2181_v1  ;;  %v1873_v14 = vmul.f32 %v4345_v9, %v1853_v20  ;;  %v2187_v31 = vmul.f32 %v3267_v51, %v1853_v20  ;;  %v1877_v30 = vadd.f32 %v1874_v25, %v1871_v4  ;;  %v5155_v4 = vld [vmem:[%s5495_s1 + $0x7] ss:$0 sm:$0xff]  ;;  %v5165_v25 = vld [vmem:[%s5495_s1 + $0x8] ss:$0 sm:$0xff] }
 0xb03   :  { %v1876_v43 = vadd.f32 %v1873_v14, %v1870_v47  ;;  %v2190_v60 = vadd.f32 %v2187_v31, %v2180_v54  ;;  %v2194_v0 = vmul.f32 %v4346_v17, %v2191_v45  ;;  %v4347_v47 = vld [vmem:[%s5495_s1 + $0x2] ss:$0 sm:$0xff]  ;;  %v1880_v1 = vmul.f32 %v5155_v4, %v1877_v30 }
 0xb04   :  { %v1857_v61 = vpop.xlane.xlu0 %1856  ;;  %v2206_v6 = vmul.f32 %v4347_v47, %v2191_v45 }
 0xb05   :  { %v1875_v41 = vmul.f32 %v4345_v9, %v1857_v61  ;;  %v2189_v29 = vmul.f32 %v3267_v51, %v1857_v61  ;;  %v2199_v42 = vsel %vm164_vm0, %v2194_v0, 0.0  ;;  %v4000_v48 = vpack.c.bf16 %v1877_v30, %v1876_v43 }
 0xb06   :  { %2200 = vadd.xlane.f32.xlu0 %v2199_v42  ;;  %v4003_v20 = vpack.c.bf16 %v2191_v45, %v2190_v60  ;;  %v2193_v37 = vmul.f32 %v4346_v17, %v2190_v60  ;;  %v2205_v54 = vmul.f32 %v4347_v47, %v2190_v60  ;;  %v2211_v57 = vsel %vm164_vm0, %v2206_v6, 0.0 }
 0xb07   :  { %v2192_v34 = vadd.f32 %v2189_v29, %v2182_v46  ;;  %4001 = vmatpush3.bf16.msra.mxu1 %v4000_v48  ;;  %v1878_v23 = vadd.f32 %v1875_v41, %v1872_v26  ;;  %v1879_v9 = vmul.f32 %v5155_v4, %v1876_v43  ;;  %v1891_v45 = vmul.f32 %v5165_v25, %v1876_v43 }
 0xb08   :  { %4004 = vmatpush3.bf16.msra.mxu0 %v4003_v20  ;;  %v2196_v32 = vsel %vm164_vm0, %v2193_v37, 0.0  ;;  %3620 = vmatprep.subr.mxu1 %v5624_v22  ;;  %v2208_v51 = vsel %vm164_vm0, %v2205_v54, 0.0 }
 0xb09   :  { %2197 = vadd.xlane.f32.xlu1 %v2196_v32  ;;  %3635 = vmatprep.subr.mxu0 %v5624_v22  ;;  %v2195_v5 = vmul.f32 %v4346_v17, %v2192_v34  ;;  %v2207_v49 = vmul.f32 %v4347_v47, %v2192_v34  ;;  %v1882_v14 = vsel %vm164_vm0, %v1879_v9, 0.0  ;;  %v1881_v31 = vmul.f32 %v5155_v4, %v1878_v23 }
 0xb0a   :  { %2209 = vadd.xlane.f32.xlu0 %v2208_v51  ;;  %v1894_v55 = vsel %vm164_vm0, %v1891_v45, 0.0  ;;  %v1893_v21 = vmul.f32 %v5165_v25, %v1878_v23  ;;  %v1892_v17 = vmul.f32 %v5165_v25, %v1877_v30 }
 0xb0b   :  { %3621 = vmatpush3.msra.mxu1 %v1878_v23  ;;  %v2202_v28 = vsel %vm164_vm0, %v2195_v5, 0.0  ;;  %v2214_v38 = vsel %vm164_vm0, %v2207_v49, 0.0  ;;  %v1888_v60 = vsel %vm164_vm0, %v1881_v31, 0.0 }
 0xb0c   :  { %3636 = vmatpush3.msra.mxu0 %v2192_v34  ;;  %4006 = vmatprep.subr.bf16.mxu1 %v4592_v50  ;;  %v1885_v50 = vsel %vm164_vm0, %v1880_v1, 0.0  ;;  %v1900_v0 = vsel %vm164_vm0, %v1893_v21, 0.0  ;;  %v1897_v43 = vsel %vm164_vm0, %v1892_v17, 0.0 }
 0xb0d   :  { %2203 = vadd.xlane.f32.xlu1 %v2202_v28  ;;  %4037 = vmatprep.subr.bf16.mxu0 %v5623_v11 }
 0xb0e   :  { %2215 = vadd.xlane.f32.xlu0 %v2214_v38 }
 0xb11   :  { %2212 = vadd.xlane.f32.xlu1 %v2211_v57 }
 0xb12   :  { %1886 = vadd.xlane.f32.xlu0 %v1885_v50 }
 0xb15   :  { %1883 = vadd.xlane.f32.xlu1 %v1882_v14 }
 0xb16   :  { %1895 = vadd.xlane.f32.xlu0 %v1894_v55 }
 0xb19   :  { %1889 = vadd.xlane.f32.xlu1 %v1888_v60 }
 0xb1a   :  { %1901 = vadd.xlane.f32.xlu0 %v1900_v0 }
 0xb1d   :  { %1898 = vadd.xlane.f32.xlu1 %v1897_v43 }
 0xb93   :  { %v2201_v15 = vpop.xlane.xlu0 %2200 }
 0xb94   :  { %v2218_v61 = vmul.f32 %v4551_v35, %v2201_v15 }
 0xb96   :  { %v2198_v46 = vpop.xlane.xlu1 %2197  ;;  %v2221_v20 = vsel %vm193_vm4, %v2218_v61, 0.0 }
 0xb97   :  { %v2217_v41 = vmul.f32 %v4548_v33, %v2198_v46  ;;  %v2210_v29 = vpop.xlane.xlu0 %2209 }
 0xb99   :  { %v2220_v42 = vsel %vm193_vm4, %v2217_v41, 0.0 }
 0xb9a   :  { %v2204_v48 = vpop.xlane.xlu1 %2203  ;;  %v2222_v47 = vadd.f32 %v2221_v20, %v2220_v42 }
 0xb9b   :  { %v2219_v30 = vmul.f32 %v4558_v39, %v2204_v48  ;;  %v2216_v37 = vpop.xlane.xlu0 %2215 }
 0xb9d   :  { %v2223_v54 = vsel %vm193_vm4, %v2219_v30, 0.0 }
 0xb9e   :  { %v2224_v26 = vadd.f32 %v2223_v54, %v2222_v47  ;;  %v2213_v34 = vpop.xlane.xlu1 %2212 }
 0xb9f   :  { %v1887_v23 = vpop.xlane.xlu0 %1886 }
 0xba0   :  { %v2225_v32 = vrot.slane %v2224_v26, 4  ;;  %v1904_v49 = vmul.f32 %v4551_v35, %v1887_v23 }
 0xba2   :  { %v2226_v51 = vadd.f32 %v2225_v32, %v2224_v26  ;;  %v1884_v5 = vpop.xlane.xlu1 %1883  ;;  %v1907_v9 = vsel %vm193_vm4, %v1904_v49, 0.0 }
 0xba3   :  { %v1903_v28 = vmul.f32 %v4548_v33, %v1884_v5  ;;  %v1896_v20 = vpop.xlane.xlu0 %1895 }
 0xba4   :  { %v2227_v6 = vrot.slane %v2226_v51, 2 }
 0xba5   :  { %v1906_v38 = vsel %vm193_vm4, %v1903_v28, 0.0 }
 0xba6   :  { %v2228_v1 = vadd.f32 %v2227_v6, %v2226_v51  ;;  %v1890_v57 = vpop.xlane.xlu1 %1889  ;;  %v1908_v14 = vadd.f32 %v1907_v9, %v1906_v38 }
 0xba7   :  { %v1905_v50 = vmul.f32 %v4558_v39, %v1890_v57  ;;  %v1902_v23 = vpop.xlane.xlu0 %1901 }
 0xba8   :  { %v2229_v45 = vrot.slane %v2228_v1, 1 }
 0xba9   :  { %v1909_v31 = vsel %vm193_vm4, %v1905_v50, 0.0 }
 0xbaa   :  { %v2230_v55 = vadd.f32 %v2229_v45, %v2228_v1  ;;  %v1910_v21 = vadd.f32 %v1909_v31, %v1908_v14  ;;  %v1899_v51 = vpop.xlane.xlu1 %1898 }
 0xbac   :  { %v2233_v60 = vadd.f32 %v2230_v55, %v2216_v37  ;;  %v2232_v17 = vadd.f32 %v2230_v55, %v2213_v34  ;;  %v1911_v0 = vrot.slane %v1910_v21, 4  ;;  %v2231_v43 = vadd.f32 %v2230_v55, %v2210_v29 }
 0xbae   :  { %v2238_v15 = vmul.f32 0.01, %v2232_v17  ;;  %v1912_v46 = vadd.f32 %v1911_v0, %v1910_v21  ;;  %vm2235_vm14 = vcmp.ge.f32.partialorder %v2232_v17, 0.0  ;;  %v2239_v61 = vmul.f32 0.01, %v2233_v60 }
 0xbaf   :  { %vm2234_vm15 = vcmp.ge.f32.partialorder %v2231_v43, 0.0  ;;  %v2237_v41 = vmul.f32 0.01, %v2231_v43  ;;  %vm2236_vm1 = vcmp.ge.f32.partialorder %v2233_v60, 0.0 }
 0xbb0   :  { %v1913_v42 = vrot.slane %v1912_v46, 2  ;;  %v2241_v48 = vsel %vm2235_vm14, %v2232_v17, %v2238_v15  ;;  %v2242_v26 = vsel %vm2236_vm1, %v2233_v60, %v2239_v61 }
 0xbb1   :  { %v2246_v30 = vsel %vm193_vm4, %v2241_v48, -inf  ;;  %v2240_v47 = vsel %vm2234_vm15, %v2231_v43, %v2237_v41  ;;  %v2249_v32 = vsel %vm193_vm4, %v2242_v26, -inf }
 0xbb2   :  { %v1914_v54 = vadd.f32 %v1913_v42, %v1912_v46  ;;  %2247 = vmax.xlane.f32.xlu0 %v2246_v30  ;;  %v2243_v37 = vsel %vm193_vm4, %v2240_v47, -inf }
 0xbb3   :  { %2244 = vmax.xlane.f32.xlu1 %v2243_v37 }
 0xbb4   :  { %v1915_v29 = vrot.slane %v1914_v54, 1 }
 0xbb6   :  { %v1916_v34 = vadd.f32 %v1915_v29, %v1914_v54 }
 0xbb7   :  { %2250 = vmax.xlane.f32.xlu1 %v2249_v32 }
 0xbb8   :  { %v1919_v5 = vadd.f32 %v1916_v34, %v1902_v23  ;;  %v1918_v49 = vadd.f32 %v1916_v34, %v1899_v51  ;;  %v1917_v28 = vadd.f32 %v1916_v34, %v1896_v20 }
 0xbba   :  { %v1924_v6 = vmul.f32 0.01, %v1918_v49  ;;  %vm1921_vm2 = vcmp.ge.f32.partialorder %v1918_v49, 0.0  ;;  %vm1920_vm3 = vcmp.ge.f32.partialorder %v1917_v28, 0.0  ;;  %v1925_v38 = vmul.f32 0.01, %v1919_v5 }
 0xbbb   :  { %v1923_v1 = vmul.f32 0.01, %v1917_v28  ;;  %vm1922_vm5 = vcmp.ge.f32.partialorder %v1919_v5, 0.0 }
 0xbbc   :  { %v1927_v57 = vsel %vm1921_vm2, %v1918_v49, %v1924_v6  ;;  %v1928_v14 = vsel %vm1922_vm5, %v1919_v5, %v1925_v38 }
 0xbbd   :  { %v1932_v9 = vsel %vm193_vm4, %v1927_v57, -inf  ;;  %v1926_v50 = vsel %vm1920_vm3, %v1917_v28, %v1923_v1  ;;  %v1935_v31 = vsel %vm193_vm4, %v1928_v14, -inf }
 0xbbe   :  { %1933 = vmax.xlane.f32.xlu1 %v1932_v9  ;;  %v1929_v45 = vsel %vm193_vm4, %v1926_v50, -inf }
 0xbbf   :  { %1930 = vmax.xlane.f32.xlu0 %v1929_v45 }
 0xbc3   :  { %1936 = vmax.xlane.f32.xlu0 %v1935_v31 }
 0xc3f   :  { %v2248_v55 = vpop.xlane.xlu0 %2247 }
 0xc40   :  { %v2245_v21 = vpop.xlane.xlu1 %2244  ;;  %v2253_v60 = vsub.f32 %v2241_v48, %v2248_v55 }
 0xc41   :  { %v2252_v17 = vsub.f32 %v2240_v47, %v2245_v21 }
 0xc42   :  { %v2257_v0 = vmul.f32 1.442695, %v2253_v60 }
 0xc43   :  { %v2255_v43 = vmul.f32 1.442695, %v2252_v17 }
 0xc44   :  { %4294 = vpow2.f32 %v2257_v0  ;;  %v2251_v15 = vpop.xlane.xlu1 %2250 }
 0xc45   :  { %4296 = vpow2.f32 %v2255_v43  ;;  %v2254_v46 = vsub.f32 %v2242_v26, %v2251_v15 }
 0xc47   :  { %v2259_v61 = vmul.f32 1.442695, %v2254_v46 }
 0xc49   :  { %4298 = vpow2.f32 %v2259_v61 }
 0xc4b   :  { %v1934_v41 = vpop.xlane.xlu1 %1933 }
 0xc4c   :  { %v1939_v42 = vsub.f32 %v1927_v57, %v1934_v41  ;;  %v1931_v20 = vpop.xlane.xlu0 %1930 }
 0xc4d   :  { %v1938_v30 = vsub.f32 %v1926_v50, %v1931_v20 }
 0xc4e   :  { %v4295_v54 = vpop.eup %4294  ;;  %v1943_v37 = vmul.f32 1.442695, %v1939_v42 }
 0xc4f   :  { %v4297_v29 = vpop.eup %4296  ;;  %v1941_v34 = vmul.f32 1.442695, %v1938_v30  ;;  %v2264_v32 = vsel %vm193_vm4, %v4295_v54, 0.0  ;;  %v5696_v30 = vmov 0  }
 0xc50   :  { %4300 = vpow2.f32 %v1943_v37  ;;  %v1937_v48 = vpop.xlane.xlu0 %1936  ;;  %v2261_v47 = vsel %vm193_vm4, %v4297_v29, 0.0  ;;  %2265 = vadd.xlane.f32.xlu0 %v2264_v32 }
 0xc51   :  { %4302 = vpow2.f32 %v1941_v34  ;;  %v1940_v23 = vsub.f32 %v1928_v14, %v1937_v48  ;;  %2262 = vadd.xlane.f32.xlu1 %v2261_v47 }
 0xc53   :  { %v4299_v26 = vpop.eup %4298  ;;  %v1945_v51 = vmul.f32 1.442695, %v1940_v23 }
 0xc54   :  { %v2267_v5 = vsel %vm193_vm4, %v4299_v26, 0.0 }
 0xc55   :  { %4304 = vpow2.f32 %v1945_v51  ;;  %2268 = vadd.xlane.f32.xlu1 %v2267_v5 }
 0xc5a   :  { %v4301_v49 = vpop.eup %4300 }
 0xc5b   :  { %v4303_v28 = vpop.eup %4302  ;;  %v1950_v6 = vsel %vm193_vm4, %v4301_v49, 0.0 }
 0xc5c   :  { %1951 = vadd.xlane.f32.xlu1 %v1950_v6  ;;  %v1947_v38 = vsel %vm193_vm4, %v4303_v28, 0.0 }
 0xc5d   :  { %1948 = vadd.xlane.f32.xlu0 %v1947_v38 }
 0xc5f   :  { %v4305_v1 = vpop.eup %4304 }
 0xc60   :  { %v1953_v57 = vsel %vm193_vm4, %v4305_v1, 0.0 }
 0xc61   :  { %1954 = vadd.xlane.f32.xlu0 %v1953_v57 }
 0xcdd   :  { %v2266_v50 = vpop.xlane.xlu0 %2265 }
 0xcde   :  { %v2263_v9 = vpop.xlane.xlu1 %2262 }
 0xcdf   :  { %4306 = vrcp.f32 %v2263_v9 }
 0xce0   :  { %4308 = vrcp.f32 %v2266_v50  ;;  %v5697_v50 = vld [vmem:[#allocation17_spill] sm:$0xff] }
 0xce2   :  { %v2269_v45 = vpop.xlane.xlu1 %2268 }
 0xce3   :  { %4310 = vrcp.f32 %v2269_v45 }
 0xce9   :  { %v4307_v14 = vpop.eup %4306  ;;  %v1952_v55 = vpop.xlane.xlu1 %1951 }
 0xcea   :  { %v2273_v31 = vmul.f32 %v4307_v14, %v4297_v29  ;;  %v1949_v21 = vpop.xlane.xlu0 %1948  ;;  %v4309_v60 = vpop.eup %4308 }
 0xceb   :  { %4312 = vrcp.f32 %v1949_v21  ;;  %v2274_v0 = vmul.f32 %v4309_v60, %v4295_v54  ;;  %v5698_v21 = vld [vmem:[#allocation18_spill] sm:$0xff] }
 0xcec   :  { %3638 = vmatmul.mubr.msk.f32.vlgmr.msra.gmra.mrb[14].mxu0 %vm193_vm4, %v2273_v31  ;;  %4314 = vrcp.f32 %v1952_v55 }
 0xced   :  { %3640 = vmatprep.mubr.msk.f32.mxu0 %vm4435_vm8, %v5624_v22  ;;  %4039 = vmatpush3.bf16.msra.mxu0 %v4599_v56  ;;  %v4311_v43 = vpop.eup %4310 }
 0xcee   :  { %v1955_v17 = vpop.xlane.xlu0 %1954  ;;  %4040 = vmatprep.subr.bf16.mxu0 %v5623_v11  ;;  %v2275_v15 = vmul.f32 %v4311_v43, %v4299_v26 }
 0xcef   :  { %4316 = vrcp.f32 %v1955_v17  ;;  %v5699_v17 = vld [vmem:[#allocation19_spill] sm:$0xff] }
 0xcf0   :  { %3641 = vmatmul.mubr.msk.f32.gmra.mrb[16].mxu0 %vm193_vm4, %v2274_v0 }
 0xcf1   :  { %3643 = vmatprep.mubr.msk.f32.mxu0 %vm4435_vm8, %v5624_v22  ;;  %4042 = vmatpush3.bf16.msra.mxu0 %v4611_v2 }
 0xcf2   :  { %4043 = vmatprep.subr.bf16.mxu0 %v5623_v11 }
 0xcf4   :  { %3644 = vmatmul.mubr.msk.f32.gmra.mrb[18].mxu0 %vm193_vm4, %v2275_v15  ;;  %v5700_v15 = vld [vmem:[#allocation20_spill] sm:$0xff] }
 0xcf5   :  { %v4313_v46 = vpop.eup %4312  ;;  %4045 = vmatpush3.bf16.msra.mxu0 %v4622_v13  ;;  %3678 = vmatprep.mubr.msk.f32.mxu0 %vm4435_vm8, %v5624_v22 }
 0xcf6   :  { %v1959_v56 = vmul.f32 %v4313_v46, %v4303_v28  ;;  %4046 = vmatprep.subr.bf16.mxu0 %v5623_v11  ;;  %v4315_v61 = vpop.eup %4314 }
 0xcf7   :  { %v1960_v2 = vmul.f32 %v4315_v61, %v4301_v49 }
 0xcf8   :  { %3623 = vmatmul.mubr.msk.f32.vlgmr.msra.gmra.mrb[16].mxu1 %vm193_vm4, %v1959_v56 }
 0xcf9   :  { %3625 = vmatprep.mubr.msk.f32.mxu1 %vm4435_vm8, %v5624_v22  ;;  %4008 = vmatpush1.bf16.msra.mxu1 %v4596_v53  ;;  %v4317_v13 = vpop.eup %4316  ;;  %v5687_v53 = vld [vmem:[#allocation11_spill] sm:$0xff] }
 0xcfa   :  { %4010 = vmatprep.subr.bf16.mxu1 %v4603_v59  ;;  %4048 = vmatpush3.bf16.msra.mxu0 %v4633_v24  ;;  %v1961_v41 = vmul.f32 %v4317_v13, %v4305_v1  ;;  %v5688_v59 = vld [vmem:[#allocation12_spill] sm:$0xff] }
 0xcfb   :  { %4049 = vmatprep.subr.bf16.mxu0 %v5623_v11 }
 0xcfc   :  { %3626 = vmatmul.mubr.msk.f32.gmra.mrb[18].mxu1 %vm193_vm4, %v1960_v2 }
 0xcfd   :  { %3628 = vmatprep.mubr.msk.f32.mxu1 %vm4435_vm8, %v5624_v22  ;;  %4012 = vmatpush1.bf16.msra.mxu1 %v4606_v62  ;;  %v5689_v62 = vld [vmem:[#allocation13_spill] sm:$0xff] }
 0xcfe   :  { %4014 = vmatprep.subr.bf16.mxu1 %v4615_v7  ;;  %4051 = vmatpush3.bf16.msra.mxu0 %v4645_v40  ;;  %v5690_v7 = vld [vmem:[#allocation14_spill] sm:$0xff] }
 0xcff   :  { %4052 = vmatprep.subr.bf16.mxu0 %v5623_v11 }
 0xd00   :  { %3629 = vmatmul.mubr.msk.f32.gmra.mrb[20].mxu1 %vm193_vm4, %v1961_v41 }
 0xd01   :  { %4016 = vmatpush1.bf16.msra.mxu1 %v4617_v10  ;;  %2527 = vmatprep.mubr.f32.mxu1 %v5624_v22  ;;  %v5691_v10 = vld [vmem:[#allocation15_spill] sm:$0xff] }
 0xd02   :  { %4018 = vmatprep.subr.bf16.mxu1 %v4627_v16  ;;  %4054 = vmatpush3.bf16.msra.mxu0 %v4656_v52  ;;  %v5692_v16 = vld [vmem:[#allocation16_spill] sm:$0xff]  ;;  %v5694_v52 = vmov 3  }
 0xd03   :  { %4055 = vmatprep.subr.bf16.mxu0 %v5623_v11 }
 0xd05   :  { %4020 = vmatpush1.bf16.msra.mxu1 %v4629_v19 }
 0xd06   :  { %4022 = vmatprep.subr.bf16.mxu1 %v4639_v27  ;;  %4057 = vmatpush3.bf16.msra.mxu0 %v4666_v3 }
 0xd07   :  { %4058 = vmatprep.subr.bf16.mxu0 %v5623_v11 }
 0xd09   :  { %4024 = vmatpush1.bf16.msra.mxu1 %v4641_v36  ;;  %v5693_v36 = vmov 1  }
 0xd0a   :  { %4026 = vmatprep.subr.bf16.mxu1 %v4649_v44  ;;  %4060 = vmatpush3.bf16.msra.mxu0 %v4676_v18  ;;  %v5695_v18 = vmov 2  }
 0xd0b   :  { %4093 = vmatprep.subr.bf16.mxu0 %v5623_v11 }
 0xd0d   :  { %4028 = vmatpush1.bf16.msra.mxu1 %v5687_v53  ;;  %v5701_v53 = vld [vmem:[#allocation21_spill] sm:$0xff] }
 0xd0e   :  { %4030 = vmatprep.subr.bf16.mxu1 %v5688_v59 }
 0xd11   :  { %4032 = vmatpush1.bf16.msra.mxu1 %v5689_v62  ;;  %v5702_v62 = vld [vmem:[#allocation22_spill] sm:$0xff] }
 0xd12   :  { %4034 = vmatprep.subr.bf16.mxu1 %v5690_v7 }
 0xd15   :  { %4036 = vmatpush1.bf16.msra.mxu1 %v5691_v10 }
 0xd16   :  { %4062 = vmatprep.subr.bf16.mxu1 %v5692_v16 }
 0xdbf   :  { %v2351_v19 = vpop.f32.mrb[14].mxu0 }
 0xdc0   :  { %2367 = vperm.xlu1 %4206, %v2351_v19   ;;  %v3639_v24 = vpop.f32.mrb[15].mxu0 }
 0xdc3   :  { %v2356_v27 = vpop.f32.mrb[16].mxu0 }
 0xdc4   :  { %4207 = vset.pattern.permute.xlu1 %v5693_v36  ;;  %2372 = vperm.xlu0 %4210, %v2356_v27   ;;  %v3642_v40 = vpop.f32.mrb[17].mxu0 }
 0xdc5   :  { %2392 = vperm.xlu1 %4207, %v2351_v19  }
 0xdc7   :  { %v2361_v44 = vpop.f32.mrb[18].mxu0 }
 0xdc8   :  { %4213 = vset.pattern.permute.xlu0 %v5694_v52  ;;  %v3645_v3 = vpop.f32.mrb[19].mxu0 }
 0xdc9   :  { %4208 = vset.pattern.permute.xlu1 %v5695_v18  ;;  %2444 = vperm.xlu0 %4213, %v2356_v27  }
 0xdca   :  { %2416 = vperm.xlu1 %4208, %v2351_v19  }
 0xdcb   :  { %v2037_v42 = vpop.f32.mrb[16].mxu1 }
 0xdcc   :  { %v3624_v20 = vpop.f32.mrb[17].mxu1 }
 0xdcd   :  { %4219 = vset.pattern.permute.xlu0 %v5696_v30 }
 0xdce   :  { %4209 = vset.pattern.permute.xlu1 %v5694_v52 }
 0xdcf   :  { %2440 = vperm.xlu1 %4209, %v2351_v19   ;;  %v2042_v54 = vpop.f32.mrb[18].mxu1  ;;  %v5703_v19 = vld [vmem:[#allocation23_spill] sm:$0xff] }
 0xdd0   :  { %2058 = vperm.xlu0 %4219, %v2042_v54   ;;  %v3627_v37 = vpop.f32.mrb[19].mxu1 }
 0xdd3   :  { %4211 = vset.pattern.permute.xlu1 %v5693_v36  ;;  %v2047_v29 = vpop.f32.mrb[20].mxu1 }
 0xdd4   :  { %2396 = vperm.xlu1 %4211, %v2356_v27   ;;  %2063 = vperm.xlu0 %4219, %v2047_v29   ;;  %v3630_v34 = vpop.f32.mrb[21].mxu1 }
 0xdd8   :  { %4212 = vset.pattern.permute.xlu1 %v5695_v18  ;;  %4221 = vset.pattern.permute.xlu0 %v5695_v18 }
 0xdd9   :  { %2420 = vperm.xlu1 %4212, %v2356_v27   ;;  %2102 = vperm.xlu0 %4221, %v2037_v42  }
 0xddd   :  { %4214 = vset.pattern.permute.xlu1 %v5696_v30  ;;  %4223 = vset.pattern.permute.xlu0 %v5694_v52 }
 0xdde   :  { %2377 = vperm.xlu1 %4214, %v2361_v44   ;;  %2126 = vperm.xlu0 %4223, %v2037_v42  }
 0xde2   :  { %4215 = vset.pattern.permute.xlu1 %v5693_v36  ;;  %4228 = vset.pattern.permute.xlu0 %v5696_v30 }
 0xde3   :  { %2400 = vperm.xlu1 %4215, %v2361_v44  }
 0xde7   :  { %4216 = vset.pattern.permute.xlu1 %v5695_v18 }
 0xde8   :  { %2424 = vperm.xlu1 %4216, %v2361_v44  }
 0xdec   :  { %4217 = vset.pattern.permute.xlu1 %v5694_v52 }
 0xded   :  { %2448 = vperm.xlu1 %4217, %v2361_v44  }
 0xdf1   :  { %4218 = vset.pattern.permute.xlu1 %v5696_v30 }
 0xdf2   :  { %2053 = vperm.xlu1 %4218, %v2037_v42  }
 0xdf6   :  { %4220 = vset.pattern.permute.xlu1 %v5693_v36 }
 0xdf7   :  { %2078 = vperm.xlu1 %4220, %v2037_v42  }
 0xdfb   :  { %2082 = vperm.xlu1 %4220, %v2042_v54  }
 0xdff   :  { %2086 = vperm.xlu1 %4220, %v2047_v29  }
 0xe03   :  { %4222 = vset.pattern.permute.xlu1 %v5695_v18 }
 0xe04   :  { %2106 = vperm.xlu1 %4222, %v2042_v54  }
 0xe08   :  { %2110 = vperm.xlu1 %4222, %v2047_v29  }
 0xe0c   :  { %4224 = vset.pattern.permute.xlu1 %v5694_v52 }
 0xe0d   :  { %2130 = vperm.xlu1 %4224, %v2042_v54   ;;  %v5704_v54 = vld [vmem:[#allocation24_spill] sm:$0xff] }
 0xe11   :  { %2134 = vperm.xlu1 %4224, %v2047_v29  }
 0xe15   :  { %4225 = vset.pattern.permute.xlu1 %v5696_v30 }
 0xe3f   :  { %v2368_v32 = vpop.permute.xlu1 %2367 }
 0xe40   :  { %v2380_v28 = vmul.f32 %v4703_v63, %v2368_v32 }
 0xe43   :  { %v2373_v51 = vpop.permute.xlu0 %2372 }
 0xe44   :  { %v2393_v48 = vpop.permute.xlu1 %2392  ;;  %v2381_v49 = vmul.f32 %v4699_v58, %v2373_v51 }
 0xe45   :  { %v2403_v45 = vmul.f32 %v5697_v50, %v2393_v48 }
 0xe46   :  { %v2383_v38 = vadd.f32 %v2381_v49, %v2380_v28 }
 0xe48   :  { %v2445_v13 = vpop.permute.xlu0 %2444 }
 0xe49   :  { %v2417_v47 = vpop.permute.xlu1 %2416  ;;  %v2452_v24 = vmul.f32 %v5703_v19, %v2445_v13 }
 0xe4a   :  { %v2427_v46 = vmul.f32 %v5700_v15, %v2417_v47 }
 0xe4e   :  { %v2441_v23 = vpop.permute.xlu1 %2440 }
 0xe4f   :  { %v2451_v7 = vmul.f32 %v5702_v62, %v2441_v23 }
 0xe51   :  { %v2454_v42 = vadd.f32 %v2452_v24, %v2451_v7  ;;  %v5705_v24 = vld [vmem:[#allocation25_spill] sm:$0xff] }
 0xe53   :  { %v2397_v26 = vpop.permute.xlu1 %2396 }
 0xe54   :  { %v2404_v57 = vmul.f32 %v4713_v12, %v2397_v26 }
 0xe56   :  { %v2406_v31 = vadd.f32 %v2404_v57, %v2403_v45  ;;  %v2059_v57 = vpop.permute.xlu0 %2058 }
 0xe58   :  { %v2421_v5 = vpop.permute.xlu1 %2420 }
 0xe59   :  { %v2428_v0 = vmul.f32 %v5699_v17, %v2421_v5 }
 0xe5b   :  { %v2430_v41 = vadd.f32 %v2428_v0, %v2427_v46 }
 0xe5d   :  { %v2378_v6 = vpop.permute.xlu1 %2377 }
 0xe5e   :  { %v2382_v1 = vmul.f32 %v4709_v8, %v2378_v6 }
 0xe60   :  { %v2384_v9 = vadd.f32 %v2383_v38, %v2382_v1 }
 0xe62   :  { %v2401_v14 = vpop.permute.xlu1 %2400  ;;  %v2385_v55 = vrot.slane %v2384_v9, 4 }
 0xe63   :  { %v2405_v60 = vmul.f32 %v5698_v21, %v2401_v14 }
 0xe64   :  { %v2386_v56 = vadd.f32 %v2385_v55, %v2384_v9 }
 0xe65   :  { %v2407_v43 = vadd.f32 %v2406_v31, %v2405_v60 }
 0xe66   :  { %v2387_v27 = vrot.slane %v2386_v56, 2 }
 0xe67   :  { %v2408_v61 = vrot.slane %v2407_v43, 4  ;;  %v2425_v2 = vpop.permute.xlu1 %2424 }
 0xe68   :  { %v2429_v59 = vmul.f32 %v5701_v53, %v2425_v2  ;;  %v2388_v34 = vadd.f32 %v2387_v27, %v2386_v56  ;;  %v2064_v2 = vpop.permute.xlu0 %2063  ;;  %v5706_v27 = vld [vmem:[#allocation26_spill] sm:$0xff] }
 0xe69   :  { %v2409_v10 = vadd.f32 %v2408_v61, %v2407_v43  ;;  %v2067_v61 = vmul.f32 %v4699_v58, %v2059_v57 }
 0xe6a   :  { %v2431_v16 = vadd.f32 %v2430_v41, %v2429_v59  ;;  %v2389_v5 = vrot.slane %v2388_v34, 1 }
 0xe6b   :  { %v2410_v40 = vrot.slane %v2409_v10, 2 }
 0xe6c   :  { %v2432_v44 = vrot.slane %v2431_v16, 4  ;;  %v2449_v3 = vpop.permute.xlu1 %2448  ;;  %v2390_v9 = vadd.f32 %v2389_v5, %v2388_v34  ;;  %v5708_v34 = vld [vmem:[#allocation28_spill] sm:$0xff] }
 0xe6d   :  { %v2411_v20 = vadd.f32 %v2410_v40, %v2409_v10  ;;  %v2453_v37 = vmul.f32 %v5704_v54, %v2449_v3  ;;  %v2068_v40 = vmul.f32 %v4709_v8, %v2064_v2  ;;  %v5707_v3 = vld [vmem:[#allocation27_spill] sm:$0xff] }
 0xe6e   :  { %v2433_v29 = vadd.f32 %v2432_v44, %v2431_v16 }
 0xe6f   :  { %v2455_v32 = vadd.f32 %v2454_v42, %v2453_v37  ;;  %v2412_v47 = vrot.slane %v2411_v20, 1  ;;  %v2103_v42 = vpop.permute.xlu0 %2102 }
 0xe70   :  { %v2434_v48 = vrot.slane %v2433_v29, 2 }
 0xe71   :  { %v2456_v26 = vrot.slane %v2455_v32, 4  ;;  %v2054_v51 = vpop.permute.xlu1 %2053  ;;  %v2413_v6 = vadd.f32 %v2412_v47, %v2411_v20  ;;  %v5710_v47 = vld [vmem:[#allocation30_spill] sm:$0xff] }
 0xe72   :  { %v2435_v23 = vadd.f32 %v2434_v48, %v2433_v29  ;;  %v2066_v46 = vmul.f32 %v4703_v63, %v2054_v51 }
 0xe73   :  { %v2457_v49 = vadd.f32 %v2456_v26, %v2455_v32  ;;  %v2414_v31 = vadd.f32 %v2413_v6, %v2390_v9  ;;  %v5709_v32 = vld [vmem:[#allocation29_spill] sm:$0xff]  ;;  %v2113_v26 = vmul.f32 %v5700_v15, %v2103_v42  ;;  %v5712_v6 = vld [vmem:[#allocation32_spill] sm:$0xff] }
 0xe74   :  { %v2436_v28 = vrot.slane %v2435_v23, 1  ;;  %v2069_v7 = vadd.f32 %v2067_v61, %v2066_v46  ;;  %v5716_v46 = vld [vmem:[#allocation36_spill] sm:$0xff] }
 0xe75   :  { %v2458_v38 = vrot.slane %v2457_v49, 2  ;;  %v5720_v42 = vld [vmem:[#allocation40_spill] sm:$0xff] }
 0xe76   :  { %v2079_v1 = vpop.permute.xlu1 %2078  ;;  %v2437_v45 = vadd.f32 %v2436_v28, %v2435_v23  ;;  %v2070_v20 = vadd.f32 %v2069_v7, %v2068_v40  ;;  %v5711_v28 = vld [vmem:[#allocation31_spill] sm:$0xff]  ;;  %v5718_v7 = vld [vmem:[#allocation38_spill] sm:$0xff] }
 0xe77   :  { %v2459_v14 = vadd.f32 %v2458_v38, %v2457_v49  ;;  %v2089_v41 = vmul.f32 %v5697_v50, %v2079_v1  ;;  %v5713_v1 = vld [vmem:[#allocation33_spill] sm:$0xff] }
 0xe78   :  { %v2438_v0 = vadd.f32 %v2437_v45, %v2414_v31  ;;  %v2071_v51 = vrot.slane %v2070_v20, 4  ;;  %v2127_v45 = vpop.permute.xlu0 %2126 }
 0xe79   :  { %v2460_v55 = vrot.slane %v2459_v14, 1  ;;  %v2137_v61 = vmul.f32 %v5702_v62, %v2127_v45 }
 0xe7a   :  { %v2083_v60 = vpop.permute.xlu1 %2082  ;;  %v2072_v9 = vadd.f32 %v2071_v51, %v2070_v20  ;;  %v5721_v20 = vld [vmem:[#allocation41_spill] sm:$0xff]  ;;  %v5724_v51 = vld [vmem:[#allocation44_spill] sm:$0xff] }
 0xe7b   :  { %v2461_v43 = vadd.f32 %v2460_v55, %v2459_v14  ;;  %v2090_v56 = vmul.f32 %v4713_v12, %v2083_v60  ;;  %v5714_v55 = vld [vmem:[#allocation34_spill] sm:$0xff]  ;;  %v5715_v60 = vld [vmem:[#allocation35_spill] sm:$0xff] }
 0xe7c   :  { %v2073_v2 = vrot.slane %v2072_v9, 2 }
 0xe7d   :  { %v2462_v13 = vadd.f32 %v2461_v43, %v2438_v0  ;;  %v2092_v10 = vadd.f32 %v2090_v56, %v2089_v41 }
 0xe7e   :  { %v2087_v59 = vpop.permute.xlu1 %2086  ;;  %v2074_v40 = vadd.f32 %v2073_v2, %v2072_v9 }
 0xe7f   :  { %v2091_v16 = vmul.f32 %v5698_v21, %v2087_v59  ;;  %2528 = vmatmul.mubr.f32.vlgmr.msra.gmra.mrb[22].mxu1 %v2462_v13  ;;  %3679 = vmatmul.mubr.f32.vlgmr.msra.gmra.mrb[20].mxu0 %v2462_v13  ;;  %v5717_v59 = vld [vmem:[#allocation37_spill] sm:$0xff] }
 0xe80   :  { %4064 = vmatpush1.bf16.msra.mxu1 %v5705_v24  ;;  %4095 = vmatpush3.bf16.msra.mxu0 %v5706_v27  ;;  %v5719_v27 = vld [vmem:[#allocation39_spill] sm:$0xff] }
 0xe81   :  { %v2093_v44 = vadd.f32 %v2092_v10, %v2091_v16  ;;  %4066 = vmatprep.subr.bf16.mxu1 %v5707_v3  ;;  %4096 = vmatprep.subr.bf16.mxu0 %v5623_v11 }
 0xe82   :  { %2668 = vmatprep.mubr.f32.mxu1 %v5624_v22  ;;  %3713 = vmatprep.mubr.msk.f32.mxu0 %vm4435_vm8, %v5624_v22 }
 0xe83   :  { %v2107_v37 = vpop.permute.xlu1 %2106  ;;  %v2094_v48 = vrot.slane %v2093_v44, 4 }
 0xe84   :  { %v2114_v29 = vmul.f32 %v5699_v17, %v2107_v37  ;;  %4068 = vmatpush1.bf16.msra.mxu1 %v5708_v34  ;;  %4098 = vmatpush3.bf16.msra.mxu0 %v5709_v32  ;;  %v5722_v34 = vld [vmem:[#allocation42_spill] sm:$0xff]  ;;  %v2075_v32 = vrot.slane %v2074_v40, 1 }
 0xe85   :  { %4070 = vmatprep.subr.bf16.mxu1 %v5710_v47  ;;  %4099 = vmatprep.subr.bf16.mxu0 %v5623_v11  ;;  %v2095_v38 = vadd.f32 %v2094_v48, %v2093_v44 }
 0xe86   :  { %v2116_v5 = vadd.f32 %v2114_v29, %v2113_v26  ;;  %v5723_v26 = vld [vmem:[#allocation43_spill] sm:$0xff] }
 0xe87   :  { %v2111_v23 = vpop.permute.xlu1 %2110  ;;  %v2096_v0 = vrot.slane %v2095_v38, 2 }
 0xe88   :  { %v2115_v49 = vmul.f32 %v5701_v53, %v2111_v23  ;;  %4072 = vmatpush1.bf16.msra.mxu1 %v5711_v28  ;;  %4101 = vmatpush3.bf16.msra.mxu0 %v5712_v6  ;;  %v2076_v28 = vadd.f32 %v2075_v32, %v2074_v40 }
 0xe89   :  { %4074 = vmatprep.subr.bf16.mxu1 %v5713_v1  ;;  %4102 = vmatprep.subr.bf16.mxu0 %v5623_v11  ;;  %v2097_v10 = vadd.f32 %v2096_v0, %v2095_v38  ;;  %v5726_v1 = vld [vmem:[#allocation46_spill] sm:$0xff] }
 0xe8a   :  { %v2117_v57 = vadd.f32 %v2116_v5, %v2115_v49  ;;  %v5725_v49 = vld [vmem:[#allocation45_spill] sm:$0xff] }
 0xe8b   :  { %v2098_v37 = vrot.slane %v2097_v10, 1 }
 0xe8c   :  { %v2118_v14 = vrot.slane %v2117_v57, 4  ;;  %v2131_v31 = vpop.permute.xlu1 %2130  ;;  %4076 = vmatpush1.bf16.msra.mxu1 %v5714_v55  ;;  %4104 = vmatpush3.bf16.msra.mxu0 %v5715_v60 }
 0xe8d   :  { %v2138_v43 = vmul.f32 %v5703_v19, %v2131_v31  ;;  %4078 = vmatprep.subr.bf16.mxu1 %v5716_v46  ;;  %4105 = vmatprep.subr.bf16.mxu0 %v5623_v11  ;;  %v2099_v23 = vadd.f32 %v2098_v37, %v2097_v10 }
 0xe8e   :  { %v2119_v56 = vadd.f32 %v2118_v14, %v2117_v57  ;;  %v5727_v57 = vld [vmem:[#allocation47_spill] sm:$0xff] }
 0xe8f   :  { %v2140_v16 = vadd.f32 %v2138_v43, %v2137_v61  ;;  %v2100_v9 = vadd.f32 %v2099_v23, %v2076_v28 }
 0xe90   :  { %v2120_v13 = vrot.slane %v2119_v56, 2  ;;  %v2135_v41 = vpop.permute.xlu1 %2134  ;;  %4080 = vmatpush1.bf16.msra.mxu1 %v5717_v59  ;;  %4107 = vmatpush3.bf16.msra.mxu0 %v5718_v7  ;;  %v5729_v59 = vld [vmem:[#allocation50_spill] sm:$0xff] }
 0xe91   :  { %v2139_v24 = vmul.f32 %v5704_v54, %v2135_v41  ;;  %4082 = vmatprep.subr.bf16.mxu1 %v5719_v27  ;;  %4108 = vmatprep.subr.bf16.mxu0 %v5623_v11 }
 0xe92   :  { %v2121_v44 = vadd.f32 %v2120_v13, %v2119_v56  ;;  %v5728_v56 = vld [vmem:[#allocation49_spill] sm:$0xff] }
 0xe93   :  { %v2141_v3 = vadd.f32 %v2140_v16, %v2139_v24 }
 0xe94   :  { %4084 = vmatpush1.bf16.msra.mxu1 %v5720_v42  ;;  %4110 = vmatpush3.bf16.msra.mxu0 %v5721_v20  ;;  %v2122_v48 = vrot.slane %v2121_v44, 1  ;;  %v5731_v20 = vld [vmem:[#allocation52_spill] sm:$0xff] }
 0xe95   :  { %v2142_v29 = vrot.slane %v2141_v3, 4  ;;  %4086 = vmatprep.subr.bf16.mxu1 %v5722_v34  ;;  %4111 = vmatprep.subr.bf16.mxu0 %v5623_v11 }
 0xe96   :  { %v2123_v6 = vadd.f32 %v2122_v48, %v2121_v44  ;;  %v5730_v44 = vld [vmem:[#allocation51_spill] sm:$0xff] }
 0xe97   :  { %v2143_v47 = vadd.f32 %v2142_v29, %v2141_v3 }
 0xe98   :  { %4088 = vmatpush1.bf16.msra.mxu1 %v5723_v26  ;;  %4113 = vmatpush3.bf16.msra.mxu0 %v5724_v51  ;;  %v2124_v31 = vadd.f32 %v2123_v6, %v2100_v9 }
 0xe99   :  { %v2144_v5 = vrot.slane %v2143_v47, 2  ;;  %4090 = vmatprep.subr.bf16.mxu1 %v5725_v49  ;;  %4114 = vmatprep.subr.bf16.mxu0 %v5623_v11 }
 0xe9b   :  { %v2145_v38 = vadd.f32 %v2144_v5, %v2143_v47  ;;  %v5732_v5 = vld [vmem:[#allocation48_spill] sm:$0xff] }
 0xe9c   :  { %4092 = vmatpush1.bf16.msra.mxu1 %v5726_v1  ;;  %4116 = vmatpush3.bf16.msra.mxu0 %v5727_v57 }
 0xe9d   :  { %v2146_v45 = vrot.slane %v2145_v38, 1  ;;  %4117 = vmatprep.subr.bf16.mxu1 %v5623_v11  ;;  %4120 = vmatprep.subr.bf16.mxu0 %v5623_v11 }
 0xe9f   :  { %v2147_v14 = vadd.f32 %v2146_v45, %v2145_v38 }
 0xea1   :  { %v2148_v55 = vadd.f32 %v2147_v14, %v2124_v31 }
 0xea3   :  { %2669 = vmatmul.mubr.f32.vlgmr.msra.gmra.mrb[22].mxu1 %v2148_v55  ;;  %3714 = vmatmul.mubr.f32.vlgmr.msra.gmra.mrb[22].mxu0 %v2148_v55 }
 0xea4   :  { %3722 = vmatprep.mubr.msk.f32.mxu1 %vm4435_vm8, %v5624_v22  ;;  %3763 = vmatprep.mubr.msk.f32.mxu0 %vm4435_vm8, %v5624_v22 }
 0xf52   :  { %v2600_v60 = vpop.f32.mrb[20].mxu0 }
 0xf53   :  { %v3680_v0 = vpop.f32.mrb[21].mxu0  ;;  %v2601_v37 = vadd.f32 %v2600_v60, %v5731_v20  ;;  %v4352_v20 = vld [vmem:[%s5495_s1 + $0x5] ss:$0 sm:$0xff] }
 0xf76   :  { %v2670_v43 = vpop.f32.mrb[22].mxu1  ;;  %v2741_v46 = vpop.f32.mrb[22].mxu0 }
 0xf77   :  { %v4153_v61 = vadd.f32 %v5728_v56, %v2670_v43  ;;  %v2672_v2 = vpop.f32.mrb[23].mxu1  ;;  %v3715_v13 = vpop.f32.mrb[23].mxu0  ;;  %v2742_v3 = vadd.f32 %v2741_v46, %v5730_v44 }
 0xf78   :  { %v4155_v7 = vadd.f32 %v5729_v59, %v2672_v2 }
 0xf79   :  { %v3271_v41 = vmul.f32 -1.442695, %v4153_v61 }
 0xf7a   :  { %v3272_v10 = vmul.f32 -1.442695, %v4155_v7  ;;  %v4350_v7 = vld [vmem:[%s5495_s1 + $0x4] ss:$0 sm:$0xff] }
 0xf7b   :  { %4318 = vpow2.f32 %v3271_v41 }
 0xf7c   :  { %4320 = vpow2.f32 %v3272_v10 }
 0xf85   :  { %v4319_v16 = vpop.eup %4318 }
 0xf86   :  { %v2749_v24 = vadd.f32 1.0, %v4319_v16  ;;  %v4321_v27 = vpop.eup %4320  ;;  %v4351_v16 = vld [vmem:[%s5495_s1 + $0x3] ss:$0 sm:$0xff] }
 0xf87   :  { %v2756_v40 = vadd.f32 1.0, %v4321_v27 }
 0xf88   :  { %4322 = vrcp.f32 %v2749_v24 }
 0xf89   :  { %4324 = vrcp.f32 %v2756_v40 }
 0xf92   :  { %v4323_v42 = vpop.eup %4322 }
 0xf93   :  { %v2759_v29 = vmul.f32 %v4323_v42, %v2742_v3  ;;  %v4325_v32 = vpop.eup %4324 }
 0xf94   :  { %v2762_v48 = vsub.f32 1.0, %v4325_v32  ;;  %v2764_v51 = vmul.f32 %v4325_v32, %v2148_v55 }
 0xf95   :  { %v2760_v34 = vadd.f32 %v2759_v29, %v2601_v37 }
 0xf97   :  { %4326 = vtanh.f32 %v2760_v34 }
 0xfa1   :  { %v4327_v47 = vpop.eup %4326 }
 0xfa2   :  { %v2763_v26 = vmul.f32 %v4327_v47, %v2762_v48  ;;  %v4353_v47 = vld [vmem:[%s5495_s1 + $0x6] ss:$0 sm:$0xff] }
 0xfa4   :  { %v2765_v23 = vadd.f32 %v2764_v51, %v2763_v26 }
 0xfa6   :  { %v2769_v49 = vrot.slane %v2765_v23, %v5732_v5 }
 0xfa8   :  { %v2771_v28 = vmul.f32 %v4699_v58, %v2769_v49  ;;  %v2770_v6 = vmul.f32 %v4703_v63, %v2769_v49  ;;  %v2772_v38 = vmul.f32 %v4709_v8, %v2769_v49  ;;  %v2779_v1 = vmul.f32 %v5697_v50, %v2769_v49 }
 0xfa9   :  { %v2788_v57 = vmul.f32 %v5700_v15, %v2769_v49  ;;  %v2780_v9 = vmul.f32 %v4713_v12, %v2769_v49  ;;  %v2790_v45 = vmul.f32 %v5701_v53, %v2769_v49  ;;  %v2781_v14 = vmul.f32 %v5698_v21, %v2769_v49 }
 0xfaa   :  { %2775 = vadd.xlane.f32.xlu1 %v2771_v28  ;;  %2773 = vadd.xlane.f32.xlu0 %v2770_v6  ;;  %v2798_v31 = vmul.f32 %v5703_v19, %v2769_v49  ;;  %v2789_v55 = vmul.f32 %v5699_v17, %v2769_v49  ;;  %v2797_v60 = vmul.f32 %v5702_v62, %v2769_v49 }
 0xfab   :  { %v2799_v0 = vmul.f32 %v5704_v54, %v2769_v49 }
 0xfae   :  { %2777 = vadd.xlane.f32.xlu1 %v2772_v38  ;;  %2782 = vadd.xlane.f32.xlu0 %v2779_v1 }
 0xfb2   :  { %2791 = vadd.xlane.f32.xlu1 %v2788_v57  ;;  %2784 = vadd.xlane.f32.xlu0 %v2780_v9 }
 0xfb6   :  { %2795 = vadd.xlane.f32.xlu1 %v2790_v45  ;;  %2786 = vadd.xlane.f32.xlu0 %v2781_v14 }
 0xfba   :  { %2802 = vadd.xlane.f32.xlu1 %v2798_v31  ;;  %2793 = vadd.xlane.f32.xlu0 %v2789_v55 }
 0xfbe   :  { %2800 = vadd.xlane.f32.xlu0 %v2797_v60 }
 0xfc2   :  { %2804 = vadd.xlane.f32.xlu0 %v2799_v0 }
0x1037   :  { %v2776_v43 = vpop.xlane.xlu1 %2775  ;;  %v2774_v46 = vpop.xlane.xlu0 %2773 }
0x1038   :  { %v2807_v24 = vmul.f32 %v4351_v16, %v2776_v43  ;;  %v2806_v42 = vmul.f32 %v4351_v16, %v2774_v46 }
0x103b   :  { %v2778_v56 = vpop.xlane.xlu1 %2777  ;;  %v2783_v61 = vpop.xlane.xlu0 %2782 }
0x103c   :  { %v2809_v27 = vmul.f32 %v4350_v7, %v2783_v61  ;;  %v2808_v32 = vmul.f32 %v4351_v16, %v2778_v56  ;;  %v4354_v61 = vld [vmem:[%s5495_s1 + $0x7] ss:$0 sm:$0xff] }
0x103e   :  { %v2812_v48 = vadd.f32 %v2809_v27, %v2806_v42 }
0x103f   :  { %v2792_v2 = vpop.xlane.xlu1 %2791  ;;  %v2785_v13 = vpop.xlane.xlu0 %2784 }
0x1040   :  { %v2810_v10 = vmul.f32 %v4350_v7, %v2785_v13  ;;  %v2815_v37 = vmul.f32 %v4352_v20, %v2792_v2 }
0x1042   :  { %v2813_v29 = vadd.f32 %v2810_v10, %v2807_v24  ;;  %v2818_v49 = vadd.f32 %v2815_v37, %v2812_v48 }
0x1043   :  { %v2796_v41 = vpop.xlane.xlu1 %2795  ;;  %v2787_v59 = vpop.xlane.xlu0 %2786 }
0x1044   :  { %v2811_v40 = vmul.f32 %v4350_v7, %v2787_v59  ;;  %v2817_v38 = vmul.f32 %v4352_v20, %v2796_v41 }
0x1046   :  { %v2814_v23 = vadd.f32 %v2811_v40, %v2808_v32 }
0x1047   :  { %v2803_v44 = vpop.xlane.xlu1 %2802  ;;  %v2794_v3 = vpop.xlane.xlu0 %2793 }
0x1048   :  { %v2816_v34 = vmul.f32 %v4352_v20, %v2794_v3  ;;  %v2822_v26 = vmul.f32 %v4353_v47, %v2803_v44  ;;  %v2820_v9 = vadd.f32 %v2817_v38, %v2814_v23 }
0x104a   :  { %v2819_v51 = vadd.f32 %v2816_v34, %v2813_v29 }
0x104b   :  { %v2801_v5 = vpop.xlane.xlu0 %2800 }
0x104c   :  { %v2825_v28 = vadd.f32 %v2822_v26, %v2819_v51  ;;  %v2821_v6 = vmul.f32 %v4353_v47, %v2801_v5 }
0x104e   :  { %v2824_v1 = vadd.f32 %v2821_v6, %v2818_v49  ;;  %v2828_v57 = vmul.f32 %v5155_v4, %v2825_v28 }
0x104f   :  { %v2805_v45 = vpop.xlane.xlu0 %2804 }
0x1050   :  { %v4118_v14 = vpack.c.bf16 %v2825_v28, %v2824_v1  ;;  %v2823_v31 = vmul.f32 %v4353_v47, %v2805_v45  ;;  %v2833_v55 = vsel %vm164_vm0, %v2828_v57, 0.0  ;;  %v2827_v60 = vmul.f32 %v5155_v4, %v2824_v1  ;;  %v4355_v4 = vld [vmem:[%s5495_s1 + $0x8] ss:$0 sm:$0xff] }
0x1051   :  { %2834 = vadd.xlane.f32.xlu0 %v2833_v55  ;;  %v2839_v0 = vmul.f32 %v5165_v25, %v2824_v1  ;;  %v2840_v41 = vmul.f32 %v4355_v4, %v2825_v28 }
0x1052   :  { %v2826_v43 = vadd.f32 %v2823_v31, %v2820_v9  ;;  %4119 = vmatpush3.bf16.msra.mxu1 %v4118_v14  ;;  %v2830_v46 = vsel %vm164_vm0, %v2827_v60, 0.0 }
0x1053   :  { %2831 = vadd.xlane.f32.xlu1 %v2830_v46  ;;  %3720 = vmatprep.subr.mxu1 %v5624_v22  ;;  %v2842_v56 = vsel %vm164_vm0, %v2839_v0, 0.0  ;;  %v2845_v7 = vsel %vm164_vm0, %v2840_v41, 0.0 }
0x1054   :  { %v2829_v2 = vmul.f32 %v4354_v61, %v2826_v43  ;;  %v2841_v13 = vmul.f32 %v4355_v4, %v2826_v43 }
0x1055   :  { %2843 = vadd.xlane.f32.xlu0 %v2842_v56 }
0x1056   :  { %3721 = vmatpush3.msra.mxu1 %v2826_v43  ;;  %v2836_v25 = vsel %vm164_vm0, %v2829_v2, 0.0  ;;  %v2848_v59 = vsel %vm164_vm0, %v2841_v13, 0.0 }
0x1057   :  { %2837 = vadd.xlane.f32.xlu1 %v2836_v25 }
0x1059   :  { %2849 = vadd.xlane.f32.xlu0 %v2848_v59 }
0x105b   :  { %2846 = vadd.xlane.f32.xlu1 %v2845_v7 }
0x10de   :  { %v2835_v10 = vpop.xlane.xlu0 %2834 }
0x10df   :  { %v2852_v24 = vmul.f32 %v4551_v35, %v2835_v10 }
0x10e0   :  { %v2832_v16 = vpop.xlane.xlu1 %2831 }
0x10e1   :  { %v2851_v27 = vmul.f32 %v4548_v33, %v2832_v16  ;;  %v2855_v3 = vsel %vm193_vm4, %v2852_v24, 0.0 }
0x10e2   :  { %v2844_v47 = vpop.xlane.xlu0 %2843 }
0x10e3   :  { %v2854_v40 = vsel %vm193_vm4, %v2851_v27, 0.0 }
0x10e4   :  { %v2838_v44 = vpop.xlane.xlu1 %2837  ;;  %v2856_v20 = vadd.f32 %v2855_v3, %v2854_v40 }
0x10e5   :  { %v2853_v42 = vmul.f32 %v4558_v39, %v2838_v44 }
0x10e6   :  { %v2850_v23 = vpop.xlane.xlu0 %2849 }
0x10e7   :  { %v2857_v37 = vsel %vm193_vm4, %v2853_v42, 0.0 }
0x10e8   :  { %v2858_v29 = vadd.f32 %v2857_v37, %v2856_v20  ;;  %v2847_v33 = vpop.xlane.xlu1 %2846 }
0x10ea   :  { %v2859_v34 = vrot.slane %v2858_v29, 4 }
0x10ec   :  { %v2860_v32 = vadd.f32 %v2859_v34, %v2858_v29 }
0x10ee   :  { %v2861_v48 = vrot.slane %v2860_v32, 2 }
0x10f0   :  { %v2862_v26 = vadd.f32 %v2861_v48, %v2860_v32 }
0x10f2   :  { %v2863_v51 = vrot.slane %v2862_v26, 1 }
0x10f4   :  { %v2864_v35 = vadd.f32 %v2863_v51, %v2862_v26  ;;  %v3114_v51 = vld [vmem:[%s5499_s5 + $0x8] sm:$0xff] }
0x10f6   :  { %v2867_v5 = vadd.f32 %v2864_v35, %v2850_v23  ;;  %v2866_v49 = vadd.f32 %v2864_v35, %v2847_v33  ;;  %v2865_v28 = vadd.f32 %v2864_v35, %v2844_v47  ;;  %v3116_v23 = vld [vmem:[%s5499_s5 + $0x18] sm:$0xff] }
0x10f8   :  { %v2872_v6 = vmul.f32 0.01, %v2866_v49  ;;  %vm2869_vm0 = vcmp.ge.f32.partialorder %v2866_v49, 0.0  ;;  %vm2868_vm6 = vcmp.ge.f32.partialorder %v2865_v28, 0.0  ;;  %v2873_v39 = vmul.f32 0.01, %v2867_v5 }
0x10f9   :  { %v2871_v38 = vmul.f32 0.01, %v2865_v28  ;;  %vm2870_vm7 = vcmp.ge.f32.partialorder %v2867_v5, 0.0 }
0x10fa   :  { %v2875_v1 = vsel %vm2869_vm0, %v2866_v49, %v2872_v6  ;;  %v2876_v14 = vsel %vm2870_vm7, %v2867_v5, %v2873_v39  ;;  %v3118_v5 = vld [vmem:[%s5499_s5 + $0x28] sm:$0xff]  ;;  %v3121_v39 = vld [vmem:[%s5499_s5 + $0x40] sm:$0xff] }
0x10fb   :  { %v2880_v57 = vsel %vm193_vm4, %v2875_v1, -inf  ;;  %v2874_v9 = vsel %vm2868_vm6, %v2865_v28, %v2871_v38  ;;  %v2883_v31 = vsel %vm193_vm4, %v2876_v14, -inf  ;;  %v3119_v28 = vld [vmem:[%s5499_s5 + $0x30] sm:$0xff]  ;;  %v3122_v38 = vld [vmem:[%s5499_s5 + $0x48] sm:$0xff] }
0x10fc   :  { %2881 = vmax.xlane.f32.xlu0 %v2880_v57  ;;  %v2877_v45 = vsel %vm193_vm4, %v2874_v9, -inf  ;;  %v3124_v57 = vld [vmem:[%s5499_s5 + $0x58] sm:$0xff] }
0x10fd   :  { %2878 = vmax.xlane.f32.xlu1 %v2877_v45  ;;  %v3125_v45 = vld [vmem:[%s5499_s5 + $0x60] sm:$0xff] }
0x1101   :  { %2884 = vmax.xlane.f32.xlu1 %v2883_v31 }
0x1189   :  { %v2882_v55 = vpop.xlane.xlu0 %2881 }
0x118a   :  { %v2879_v60 = vpop.xlane.xlu1 %2878  ;;  %v2887_v0 = vsub.f32 %v2875_v1, %v2882_v55  ;;  %v4133_v1 = vpack.c.bf16 %v3122_v38, %v3121_v39  ;;  %v3127_v55 = vld [vmem:[%s5499_s5 + $0x70] sm:$0xff] }
0x118b   :  { %v2886_v43 = vsub.f32 %v2874_v9, %v2879_v60  ;;  %v3128_v60 = vld [vmem:[%s5499_s5 + $0x78] sm:$0xff] }
0x118c   :  { %v2891_v46 = vmul.f32 1.442695, %v2887_v0  ;;  %v4142_v0 = vpack.c.bf16 %v3128_v60, %v3127_v55 }
0x118d   :  { %v2889_v56 = vmul.f32 1.442695, %v2886_v43  ;;  %v3097_v43 = vld [vmem:[%s5494_s0 + $0xe] sm:$0x7f] }
0x118e   :  { %4328 = vpow2.f32 %v2891_v46  ;;  %v2885_v61 = vpop.xlane.xlu1 %2884 }
0x118f   :  { %4330 = vpow2.f32 %v2889_v56  ;;  %v2888_v2 = vsub.f32 %v2876_v14, %v2885_v61  ;;  %v3126_v14 = vld [vmem:[%s5499_s5 + $0x68] sm:$0xff] }
0x1190   :  { %v4139_v31 = vpack.c.bf16 %v3126_v14, %v3125_v45 }
0x1191   :  { %v2893_v4 = vmul.f32 1.442695, %v2888_v2 }
0x1193   :  { %4332 = vpow2.f32 %v2893_v4 }
0x1198   :  { %v4329_v13 = vpop.eup %4328 }
0x1199   :  { %v4331_v25 = vpop.eup %4330  ;;  %v2898_v41 = vsel %vm193_vm4, %v4329_v13, 0.0 }
0x119a   :  { %v2895_v59 = vsel %vm193_vm4, %v4331_v25, 0.0  ;;  %2899 = vadd.xlane.f32.xlu1 %v2898_v41 }
0x119b   :  { %2896 = vadd.xlane.f32.xlu0 %v2895_v59 }
0x119d   :  { %v4333_v7 = vpop.eup %4332 }
0x119e   :  { %v2901_v10 = vsel %vm193_vm4, %v4333_v7, 0.0 }
0x119f   :  { %2902 = vadd.xlane.f32.xlu0 %v2901_v10 }
0x1227   :  { %v2900_v16 = vpop.xlane.xlu1 %2899 }
0x1228   :  { %v2897_v24 = vpop.xlane.xlu0 %2896 }
0x1229   :  { %4334 = vrcp.f32 %v2897_v24 }
0x122a   :  { %4336 = vrcp.f32 %v2900_v16 }
0x122c   :  { %v2903_v27 = vpop.xlane.xlu0 %2902 }
0x122d   :  { %4338 = vrcp.f32 %v2903_v27 }
0x1233   :  { %v4335_v40 = vpop.eup %4334 }
0x1234   :  { %v2907_v44 = vmul.f32 %v4335_v40, %v4331_v25  ;;  %v4337_v3 = vpop.eup %4336 }
0x1235   :  { %v2908_v42 = vmul.f32 %v4337_v3, %v4329_v13 }
0x1236   :  { %3723 = vmatmul.mubr.msk.f32.vlgmr.msra.gmra.mrb[24].mxu1 %vm193_vm4, %v2907_v44 }
0x1237   :  { %3725 = vmatprep.mubr.msk.f32.mxu1 %vm4435_vm8, %v5624_v22  ;;  %v4339_v20 = vpop.eup %4338 }
0x1238   :  { %v2909_v37 = vmul.f32 %v4339_v20, %v4333_v7 }
0x123a   :  { %3726 = vmatmul.mubr.msk.f32.gmra.mrb[26].mxu1 %vm193_vm4, %v2908_v42 }
0x123b   :  { %3728 = vmatprep.mubr.msk.f32.mxu1 %vm4435_vm8, %v5624_v22  ;;  %v3113_v22 = vld [vmem:[%s5499_s5] sm:$0xff]  ;;  %vm3201_vm8 = vcmask 253952  }
0x123c   :  { %v4121_v35 = vpack.c.bf16 %v3114_v51, %v3113_v22 }
0x123e   :  { %3729 = vmatmul.mubr.msk.f32.gmra.mrb[28].mxu1 %vm193_vm4, %v2909_v37  ;;  %4122 = vmatpush3.bf16.msra.mxu0 %v4121_v35  ;;  %vm3105_vm4 = vcmask 260096  }
0x123f   :  { %4123 = vmatprep.subr.bf16.mxu0 %v5623_v11 }
0x1309   :  { %v2985_v29 = vpop.f32.mrb[24].mxu1 }
0x130a   :  { %3001 = vperm.xlu1 %4225, %v2985_v29   ;;  %v3724_v34 = vpop.f32.mrb[25].mxu1 }
0x130d   :  { %v2990_v32 = vpop.f32.mrb[26].mxu1 }
0x130e   :  { %4226 = vset.pattern.permute.xlu1 %v5693_v36  ;;  %3006 = vperm.xlu0 %4228, %v2990_v32   ;;  %v3727_v48 = vpop.f32.mrb[27].mxu1 }
0x130f   :  { %3026 = vperm.xlu1 %4226, %v2985_v29  }
0x1311   :  { %v2995_v47 = vpop.f32.mrb[28].mxu1 }
0x1312   :  { %4229 = vset.pattern.permute.xlu0 %v5694_v52  ;;  %v3730_v26 = vpop.f32.mrb[29].mxu1 }
0x1313   :  { %4227 = vset.pattern.permute.xlu1 %v5695_v18  ;;  %3074 = vperm.xlu0 %4229, %v2985_v29  }
0x1314   :  { %3050 = vperm.xlu1 %4227, %v2985_v29  }
0x1317   :  { %4237 = vset.pattern.permute.xlu0 %v5696_v30 }
0x1318   :  { %4230 = vset.pattern.permute.xlu1 %v5693_v36  ;;  %3101 = vperm.xlu0 %4237, %v3097_v43  }
0x1319   :  { %3030 = vperm.xlu1 %4230, %v2990_v32  }
0x131d   :  { %4231 = vset.pattern.permute.xlu1 %v5695_v18 }
0x131e   :  { %3054 = vperm.xlu1 %4231, %v2990_v32  }
0x1322   :  { %4232 = vset.pattern.permute.xlu1 %v5694_v52 }
0x1323   :  { %3078 = vperm.xlu1 %4232, %v2990_v32  }
0x1327   :  { %4233 = vset.pattern.permute.xlu1 %v5696_v30  ;;  %v3115_v30 = vld [vmem:[%s5499_s5 + $0x10] sm:$0xff] }
0x1328   :  { %3011 = vperm.xlu1 %4233, %v2995_v47   ;;  %v4124_v33 = vpack.c.bf16 %v3116_v23, %v3115_v30 }
0x132a   :  { %4125 = vmatpush3.bf16.msra.mxu0 %v4124_v33 }
0x132b   :  { %4126 = vmatprep.subr.bf16.mxu0 %v5623_v11 }
0x132c   :  { %4234 = vset.pattern.permute.xlu1 %v5693_v36  ;;  %v3117_v36 = vld [vmem:[%s5499_s5 + $0x20] sm:$0xff] }
0x132d   :  { %3034 = vperm.xlu1 %4234, %v2995_v47   ;;  %v4127_v49 = vpack.c.bf16 %v3118_v5, %v3117_v36 }
0x132f   :  { %4128 = vmatpush3.bf16.msra.mxu0 %v4127_v49 }
0x1330   :  { %4129 = vmatprep.subr.bf16.mxu0 %v5623_v11 }
0x1331   :  { %4235 = vset.pattern.permute.xlu1 %v5695_v18  ;;  %v3120_v18 = vld [vmem:[%s5499_s5 + $0x38] sm:$0xff] }
0x1332   :  { %3058 = vperm.xlu1 %4235, %v2995_v47   ;;  %v4130_v6 = vpack.c.bf16 %v3120_v18, %v3119_v28 }
0x1334   :  { %4131 = vmatpush3.bf16.msra.mxu0 %v4130_v6 }
0x1335   :  { %4132 = vmatprep.subr.bf16.mxu0 %v5623_v11 }
0x1336   :  { %4236 = vset.pattern.permute.xlu1 %v5694_v52  ;;  %v3123_v52 = vld [vmem:[%s5499_s5 + $0x50] sm:$0xff] }
0x1337   :  { %3082 = vperm.xlu1 %4236, %v2995_v47   ;;  %v4136_v9 = vpack.c.bf16 %v3124_v57, %v3123_v52 }
0x1338   :  { %4134 = vmatpush3.bf16.msra.mxu0 %v4133_v1 }
0x1339   :  { %4135 = vmatprep.subr.bf16.mxu0 %v5623_v11 }
0x133c   :  { %4137 = vmatpush3.bf16.msra.mxu0 %v4136_v9 }
0x133d   :  { %4138 = vmatprep.subr.bf16.mxu0 %v5623_v11 }
0x1340   :  { %4140 = vmatpush3.bf16.msra.mxu0 %v4139_v31  ;;  %v3098_v31 = vld [vmem:[%s5495_s1 + $0xe] sm:$0x7f] }
0x1341   :  { %4141 = vmatprep.subr.bf16.mxu0 %v5623_v11 }
0x1344   :  { %4143 = vmatpush3.bf16.msra.mxu0 %v4142_v0 }
0x1389   :  { %v3002_v46 = vpop.permute.xlu1 %3001 }
0x138a   :  { %v3014_v41 = vmul.f32 %v4703_v63, %v3002_v46 }
0x138d   :  { %v3007_v4 = vpop.permute.xlu0 %3006 }
0x138e   :  { %v3027_v56 = vpop.permute.xlu1 %3026  ;;  %v3015_v25 = vmul.f32 %v4699_v58, %v3007_v4 }
0x138f   :  { %v3037_v27 = vmul.f32 %v5697_v50, %v3027_v56 }
0x1390   :  { %v3017_v7 = vadd.f32 %v3015_v25, %v3014_v41 }
0x1392   :  { %v3075_v32 = vpop.permute.xlu0 %3074 }
0x1393   :  { %v3051_v61 = vpop.permute.xlu1 %3050  ;;  %v3085_v26 = vmul.f32 %v5702_v62, %v3075_v32 }
0x1394   :  { %v3061_v58 = vmul.f32 %v5700_v15, %v3051_v61 }
0x1397   :  { %v3102_v55 = vpop.permute.xlu0 %3101 }
0x1398   :  { %v3031_v2 = vpop.permute.xlu1 %3030  ;;  %v3104_v60 = vmul.f32 %v3102_v55, %v3098_v31 }
0x1399   :  { %v3038_v16 = vmul.f32 %v4713_v12, %v3031_v2 }
0x139a   :  { %v3106_v0 = vsel %vm3105_vm4, %v3104_v60, 0.0 }
0x139b   :  { %v3040_v44 = vadd.f32 %v3038_v16, %v3037_v27  ;;  %v3107_v43 = vrot.slane %v3106_v0, 4 }
0x139d   :  { %v3055_v11 = vpop.permute.xlu1 %3054  ;;  %v3108_v46 = vadd.f32 %v3107_v43, %v3106_v0 }
0x139e   :  { %v3062_v20 = vmul.f32 %v5699_v17, %v3055_v11 }
0x139f   :  { %v3109_v56 = vrot.slane %v3108_v46, 2 }
0x13a1   :  { %v3110_v61 = vadd.f32 %v3109_v56, %v3108_v46 }
0x13a2   :  { %v3079_v13 = vpop.permute.xlu1 %3078 }
0x13a3   :  { %v3086_v48 = vmul.f32 %v5703_v19, %v3079_v13  ;;  %v3111_v2 = vrot.slane %v3110_v61, 1  ;;  %v3199_v13 = vld [vmem:[%s5495_s1 + $0x15] sm:$0x1] }
0x13a5   :  { %v3088_v35 = vadd.f32 %v3086_v48, %v3085_v26  ;;  %v3112_v11 = vadd.f32 %v3111_v2, %v3110_v61 }
0x13a7   :  { %v3012_v59 = vpop.permute.xlu1 %3011 }
0x13a8   :  { %v3016_v10 = vmul.f32 %v4709_v8, %v3012_v59  ;;  %v3064_v8 = vadd.f32 %v3062_v20, %v3061_v58 }
0x13aa   :  { %v3018_v24 = vadd.f32 %v3017_v7, %v3016_v10 }
0x13ac   :  { %v3035_v40 = vpop.permute.xlu1 %3034  ;;  %v3019_v3 = vrot.slane %v3018_v24, 4 }
0x13ad   :  { %v3039_v42 = vmul.f32 %v5698_v21, %v3035_v40 }
0x13ae   :  { %v3020_v63 = vadd.f32 %v3019_v3, %v3018_v24 }
0x13af   :  { %v3041_v37 = vadd.f32 %v3040_v44, %v3039_v42 }
0x13b0   :  { %v3021_v22 = vrot.slane %v3020_v63, 2 }
0x13b1   :  { %v3042_v29 = vrot.slane %v3041_v37, 4  ;;  %v3059_v34 = vpop.permute.xlu1 %3058 }
0x13b2   :  { %v3063_v12 = vmul.f32 %v5701_v53, %v3059_v34  ;;  %v3022_v33 = vadd.f32 %v3021_v22, %v3020_v63 }
0x13b3   :  { %v3043_v50 = vadd.f32 %v3042_v29, %v3041_v37 }
0x13b4   :  { %v3065_v47 = vadd.f32 %v3064_v8, %v3063_v12  ;;  %v3023_v19 = vrot.slane %v3022_v33, 1 }
0x13b5   :  { %v3044_v21 = vrot.slane %v3043_v50, 2 }
0x13b6   :  { %v3066_v51 = vrot.slane %v3065_v47, 4  ;;  %v3083_v17 = vpop.permute.xlu1 %3082  ;;  %v3024_v38 = vadd.f32 %v3023_v19, %v3022_v33 }
0x13b7   :  { %v3045_v30 = vadd.f32 %v3044_v21, %v3043_v50  ;;  %v3087_v15 = vmul.f32 %v5704_v54, %v3083_v17 }
0x13b8   :  { %v3067_v23 = vadd.f32 %v3066_v51, %v3065_v47 }
0x13b9   :  { %v3089_v36 = vadd.f32 %v3088_v35, %v3087_v15  ;;  %v3046_v49 = vrot.slane %v3045_v30, 1 }
0x13ba   :  { %v3068_v5 = vrot.slane %v3067_v23, 2 }
0x13bb   :  { %v3090_v53 = vrot.slane %v3089_v36, 4  ;;  %v3047_v39 = vadd.f32 %v3046_v49, %v3045_v30 }
0x13bc   :  { %v3069_v28 = vadd.f32 %v3068_v5, %v3067_v23 }
0x13bd   :  { %v3091_v18 = vadd.f32 %v3090_v53, %v3089_v36  ;;  %v3048_v57 = vadd.f32 %v3047_v39, %v3024_v38 }
0x13be   :  { %v3070_v6 = vrot.slane %v3069_v28, 1 }
0x13bf   :  { %v3092_v62 = vrot.slane %v3091_v18, 2 }
0x13c0   :  { %v3071_v1 = vadd.f32 %v3070_v6, %v3069_v28 }
0x13c1   :  { %v3093_v52 = vadd.f32 %v3092_v62, %v3091_v18 }
0x13c2   :  { %v3072_v14 = vadd.f32 %v3071_v1, %v3048_v57 }
0x13c3   :  { %v3094_v9 = vrot.slane %v3093_v52, 1 }
0x13c5   :  { %v3095_v45 = vadd.f32 %v3094_v9, %v3093_v52 }
0x13c7   :  { %v3096_v54 = vadd.f32 %v3095_v45, %v3072_v14 }
0x13c9   :  { %3764 = vmatmul.mubr.f32.vlgmr.msra.gmra.mrb[24].mxu0 %v3096_v54 }
0x149c   :  { %v3195_v4 = vpop.f32.mrb[24].mxu0 }
0x149d   :  { %v3196_v25 = vadd.f32 %v3195_v4, %v3112_v11  ;;  %v3765_v41 = vpop.f32.mrb[25].mxu0 }
0x149f   :  { %v3200_v59 = vadd.f32 %v3199_v13, %v3196_v25 }
0x14a1   :  { %3202 = vst.msk [vmem:[#allocation7] sm:$0x1] %vm3201_vm8, %v3200_v59 }
0x14a2   :  { %4411 = shalt.err (!%p4408_p6)
}
0x14a3   :  { %s4412_s1 = scalar_lea.hbm %s5500_s6, 16 }
0x14a4   :  { %p4413_p7 = scmp.ne.s32.totalorder %s5500_s6, %s4412_s1  ;;  %p4416_p8 = scmp.lt.u32.totalorder %s4412_s1, %s5500_s6 }
0x14a6   :  { %p4418_p9 = pnand %p4416_p8, %p4413_p7 }
0x14a8   :  { %4421 = shalt.err (!%p4418_p9)
}
0x14a9   :  { %3212 = dma.vmem_to_hbm [thread:$0]  %s3210_s26, 16, %s5500_s6, [#allocation4]  }
0x14aa   :  { %4426 = dma.done.wait [#allocation4], 16  }
0x14ab   :  { %4427 = vsyncadd [#allocation4], 4294967280 }
0x14ac   :  { %3216 = vsyncpa [#allocation3], 1 }
0x14ad   :  { %3217 = vsyncpa [#allocation6], 1 }
0x14ae   :  { %3218 = vsyncpa [#allocation4], 1 }

</bundles_post_ra>
